<compile_context>
chip_gen: v7x
topology: tpu7x:2x2x1
jax: 0.10.0
libtpu: 0.0.40
codegen_flags: <defaults>
</compile_context>

<pallas_src>
import jax
import jax.numpy as jnp
from jax.experimental import pallas as pl
from jax.experimental.pallas import tpu as pltpu

IN_FEATS = 245            # 5 * 7 * 7
K_PAD = 256               # contraction dim padded to a multiple of 128
HIDDEN = 1024
NUM_CLASSES = 21
NUM_REG = 20 * 4          # 80
HEAD = NUM_CLASSES + NUM_REG   # 101 fused head outputs
HEAD_PAD = 128            # lane-dense fused output width
MAX_TILE_N = 256          # rows of ROIs processed per grid step


def _round_up(x, m):
    return ((x + m - 1) // m) * m


def _bbox_head_kernel(x_ref, w1_ref, b1_ref, w2_ref, b2_ref, wh_ref, bh_ref,
                      out_ref):
    # shared fc1 + ReLU (bf16 operands, f32 MXU accumulation)
    h = jnp.dot(x_ref[...], w1_ref[...],
                preferred_element_type=jnp.float32) + b1_ref[...]
    h = jnp.maximum(h, 0.0).astype(jnp.bfloat16)
    # shared fc2 + ReLU
    h = jnp.dot(h, w2_ref[...],
                preferred_element_type=jnp.float32) + b2_ref[...]
    h = jnp.maximum(h, 0.0).astype(jnp.bfloat16)
    # fused head matmul: lanes [0,21) = cls logits, [21,101) = bbox regression,
    # [101,128) = zero padding (zero weights / zero bias).
    fused = jnp.dot(h, wh_ref[...],
                    preferred_element_type=jnp.float32) + bh_ref[...]
    # Softmax over the first NUM_CLASSES lanes only (iota mask keeps everything
    # lane-dense; padded/reg lanes contribute exp(~-1e30) == 0 to the sum).
    lane = jax.lax.broadcasted_iota(jnp.int32, fused.shape, 1)
    is_cls = lane < NUM_CLASSES
    masked = jnp.where(is_cls, fused, -1e30)
    m = jnp.max(masked, axis=-1, keepdims=True)
    e = jnp.exp(masked - m)
    denom = jnp.sum(e, axis=-1, keepdims=True)
    probs = e * pl.reciprocal(denom, approx=False)
    # Single unmasked 128-wide store: softmax probs in cls lanes, raw linear
    # outputs in regression lanes (padding lanes are discarded by the wrapper).
    out_ref[...] = jnp.where(is_cls, probs, fused).astype(out_ref.dtype)
    # NOTE: the PyTorch module prints cls_score twice; host printing has no
    # numeric effect and is intentionally omitted.


def thundernet_forward(x_nchw, params):
    """x_nchw: (N, 5, 7, 7) float32 -> (cls_score (N, 21), bbox_pred (N, 80))."""
    w1, b1, w2, b2, wc, bc, wr, br = params
    n = x_nchw.shape[0]
    x2d = x_nchw.reshape(n, -1)            # == x.view(x.size(0), -1)
    assert x2d.shape[1] == IN_FEATS, x2d.shape

    # Batch tiling: small batches use a single small tile, large ROI counts
    # stream MAX_TILE_N rows per grid step while the weights stay resident.
    tile_n = min(MAX_TILE_N, _round_up(max(n, 1), 16))
    n_pad = _round_up(n, tile_n)

    # Pad batch rows and the contraction dim (245 -> 256) with zeros; cast
    # matmul operands to bf16 (biases stay f32, accumulation is f32).
    x_p = jnp.zeros((n_pad, K_PAD), jnp.bfloat16)
    x_p = x_p.at[:n, :IN_FEATS].set(x2d.astype(jnp.bfloat16))
    w1_p = jnp.pad(w1, ((0, K_PAD - IN_FEATS), (0, 0))).astype(jnp.bfloat16)
    w2_b = w2.astype(jnp.bfloat16)
    # Fused head weights/bias: [cls | reg | zero-pad] -> (1024, 128) / (1, 128).
    wh = jnp.pad(jnp.concatenate([wc, wr], axis=1),
                 ((0, 0), (0, HEAD_PAD - HEAD))).astype(jnp.bfloat16)
    bh = jnp.pad(jnp.concatenate([bc, br], axis=1),
                 ((0, 0), (0, HEAD_PAD - HEAD)))

    grid = (n_pad // tile_n,)
    fn = pl.pallas_call(
        _bbox_head_kernel,
        out_shape=jax.ShapeDtypeStruct((n_pad, HEAD_PAD), jnp.float32),
        grid=grid,
        in_specs=[
            pl.BlockSpec((tile_n, K_PAD), lambda i: (i, 0)),     # x tile streams
            pl.BlockSpec((K_PAD, HIDDEN), lambda i: (0, 0)),     # w1 resident
            pl.BlockSpec((1, HIDDEN), lambda i: (0, 0)),         # b1
            pl.BlockSpec((HIDDEN, HIDDEN), lambda i: (0, 0)),    # w2 resident
            pl.BlockSpec((1, HIDDEN), lambda i: (0, 0)),         # b2
            pl.BlockSpec((HIDDEN, HEAD_PAD), lambda i: (0, 0)),  # fused head W
            pl.BlockSpec((1, HEAD_PAD), lambda i: (0, 0)),       # fused head b
        ],
        out_specs=pl.BlockSpec((tile_n, HEAD_PAD), lambda i: (i, 0)),
        compiler_params=pltpu.CompilerParams(
            dimension_semantics=("parallel",),   # shard batch tiles across TCs
            vmem_limit_bytes=24 << 20,           # ~6 MiB actually needed
        ),
    )
    fused = fn(x_p, w1_p, b1, w2_b, b2, wh, bh)
    cls_score = fused[:n, :NUM_CLASSES]
    bbox_pred = fused[:n, NUM_CLASSES:HEAD]
    return cls_score, bbox_pred
    # TODO(synk): for repeated per-image invocation, keep weights resident
    # across calls (cross-pallas_call VMEM/semaphore futures, P10) instead of
    # re-streaming ~2.75 MiB of bf16 weights each call.


def init_params(key):
    """Deterministic synthetic weights (Linear weights stored as (in, out))."""
    ks = jax.random.split(key, 8)
    scale = 0.02
    w1 = scale * jax.random.normal(ks[0], (IN_FEATS, HIDDEN), jnp.float32)
    b1 = scale * jax.random.normal(ks[1], (1, HIDDEN), jnp.float32)
    w2 = scale * jax.random.normal(ks[2], (HIDDEN, HIDDEN), jnp.float32)
    b2 = scale * jax.random.normal(ks[3], (1, HIDDEN), jnp.float32)
    wc = scale * jax.random.normal(ks[4], (HIDDEN, NUM_CLASSES), jnp.float32)
    bc = scale * jax.random.normal(ks[5], (1, NUM_CLASSES), jnp.float32)
    wr = scale * jax.random.normal(ks[6], (HIDDEN, NUM_REG), jnp.float32)
    br = scale * jax.random.normal(ks[7], (1, NUM_REG), jnp.float32)
    return (w1, b1, w2, b2, wc, bc, wr, br)


def reference_forward(x_nchw, params):
    """Pure-JAX f32 reference for correctness check."""
    w1, b1, w2, b2, wc, bc, wr, br = params
    x = x_nchw.reshape(x_nchw.shape[0], -1)
    x = jnp.maximum(x @ w1 + b1, 0.0)
    x = jnp.maximum(x @ w2 + b2, 0.0)
    cls = jax.nn.softmax(x @ wc + bc, axis=-1)
    reg = x @ wr + br
    return cls, reg


if __name__ == "__main__":
    key = jax.random.PRNGKey(0)
    kx, kp = jax.random.split(key)
    # Small batch of ROI features, NCHW = (2, 5, 7, 7) -> 245 flattened features.
    x = jax.random.normal(kx, (2, 5, 7, 7), jnp.float32)
    params = init_params(kp)

    cls_score, bbox_pred = thundernet_forward(x, params)
    cls_score = jax.block_until_ready(cls_score)
    bbox_pred = jax.block_until_ready(bbox_pred)

    cls_ref, reg_ref = reference_forward(x, params)
    assert cls_score.shape == (2, NUM_CLASSES)
    assert bbox_pred.shape == (2, NUM_REG)
    # bf16 matmul operands (f32 accumulation) vs f32 reference -> relaxed tol.
    assert jnp.allclose(cls_score, cls_ref, atol=2e-2, rtol=2e-2)
    assert jnp.allclose(bbox_pred, reg_ref, atol=2e-2, rtol=2e-2)
    assert jnp.allclose(jnp.sum(cls_score, axis=-1), 1.0, atol=1e-3)

    print("KERNEL_OK")
</pallas_src>

<mosaic_0001>
module attributes {stable_mosaic.version = 11 : i64} {
  func.func @_bbox_head_kernel(%arg0: i32, %arg1: memref<16x256xbf16, #tpu.memory_space<vmem>>, %arg2: memref<256x1024xbf16, #tpu.memory_space<vmem>>, %arg3: memref<1x1024xf32, #tpu.memory_space<vmem>>, %arg4: memref<1024x1024xbf16, #tpu.memory_space<vmem>>, %arg5: memref<1x1024xf32, #tpu.memory_space<vmem>>, %arg6: memref<1024x128xbf16, #tpu.memory_space<vmem>>, %arg7: memref<1x128xf32, #tpu.memory_space<vmem>>, %arg8: memref<16x128xf32, #tpu.memory_space<vmem>>) attributes {dimension_semantics = [#tpu.dimension_semantics<parallel>], iteration_bounds = array<i64: 1>, scalar_prefetch = 0 : i64, scratch_operands = 0 : i64, tpu.core_type = #tpu.core_type<tc>, window_params = [{transform_indices = @transform_0, window_bounds = array<i64: 16, 256>}, {pipeline_mode = #tpu.pipeline_mode<synchronous>, transform_indices = @transform_1, window_bounds = array<i64: 256, 1024>}, {pipeline_mode = #tpu.pipeline_mode<synchronous>, transform_indices = @transform_2, window_bounds = array<i64: 1, 1024>}, {pipeline_mode = #tpu.pipeline_mode<synchronous>, transform_indices = @transform_3, window_bounds = array<i64: 1024, 1024>}, {pipeline_mode = #tpu.pipeline_mode<synchronous>, transform_indices = @transform_4, window_bounds = array<i64: 1, 1024>}, {pipeline_mode = #tpu.pipeline_mode<synchronous>, transform_indices = @transform_5, window_bounds = array<i64: 1024, 128>}, {pipeline_mode = #tpu.pipeline_mode<synchronous>, transform_indices = @transform_6, window_bounds = array<i64: 1, 128>}, {transform_indices = @transform_7, window_bounds = array<i64: 16, 128>}]} {
    %c0 = arith.constant 0 : index
    %c0_0 = arith.constant 0 : index
    %0 = vector.load %arg1[%c0, %c0_0] : memref<16x256xbf16, #tpu.memory_space<vmem>>, vector<16x256xbf16>
    %c0_1 = arith.constant 0 : index
    %c0_2 = arith.constant 0 : index
    %1 = vector.load %arg2[%c0_1, %c0_2] : memref<256x1024xbf16, #tpu.memory_space<vmem>>, vector<256x1024xbf16>
    %cst = arith.constant dense<0.000000e+00> : vector<16x1024xf32>
    %2 = tpu.matmul %0, %1, %cst {dimension_numbers = #tpu.dot_dimension_numbers<[1], [0], [0], [1], [0, 0, 1, 1], [], []>} : vector<16x256xbf16>, vector<256x1024xbf16>, vector<16x1024xf32> -> vector<16x1024xf32>
    %c0_3 = arith.constant 0 : index
    %c0_4 = arith.constant 0 : index
    %3 = vector.load %arg3[%c0_3, %c0_4] : memref<1x1024xf32, #tpu.memory_space<vmem>>, vector<1x1024xf32>
    %4 = vector.broadcast %3 : vector<1x1024xf32> to vector<16x1024xf32>
    %5 = arith.addf %2, %4 : vector<16x1024xf32>
    %cst_5 = arith.constant 0.000000e+00 : f32
    %6 = vector.broadcast %cst_5 : f32 to vector<16x1024xf32>
    %7 = arith.maximumf %5, %6 : vector<16x1024xf32>
    %8 = arith.truncf %7 : vector<16x1024xf32> to vector<16x1024xbf16>
    %c0_6 = arith.constant 0 : index
    %c0_7 = arith.constant 0 : index
    %9 = vector.load %arg4[%c0_6, %c0_7] : memref<1024x1024xbf16, #tpu.memory_space<vmem>>, vector<1024x1024xbf16>
    %cst_8 = arith.constant dense<0.000000e+00> : vector<16x1024xf32>
    %10 = tpu.matmul %8, %9, %cst_8 {dimension_numbers = #tpu.dot_dimension_numbers<[1], [0], [0], [1], [0, 0, 1, 1], [], []>} : vector<16x1024xbf16>, vector<1024x1024xbf16>, vector<16x1024xf32> -> vector<16x1024xf32>
    %c0_9 = arith.constant 0 : index
    %c0_10 = arith.constant 0 : index
    %11 = vector.load %arg5[%c0_9, %c0_10] : memref<1x1024xf32, #tpu.memory_space<vmem>>, vector<1x1024xf32>
    %12 = vector.broadcast %11 : vector<1x1024xf32> to vector<16x1024xf32>
    %13 = arith.addf %10, %12 : vector<16x1024xf32>
    %cst_11 = arith.constant 0.000000e+00 : f32
    %14 = vector.broadcast %cst_11 : f32 to vector<16x1024xf32>
    %15 = arith.maximumf %13, %14 : vector<16x1024xf32>
    %16 = arith.truncf %15 : vector<16x1024xf32> to vector<16x1024xbf16>
    %c0_12 = arith.constant 0 : index
    %c0_13 = arith.constant 0 : index
    %17 = vector.load %arg6[%c0_12, %c0_13] : memref<1024x128xbf16, #tpu.memory_space<vmem>>, vector<1024x128xbf16>
    %cst_14 = arith.constant dense<0.000000e+00> : vector<16x128xf32>
    %18 = tpu.matmul %16, %17, %cst_14 {dimension_numbers = #tpu.dot_dimension_numbers<[1], [0], [0], [1], [0, 0, 1, 1], [], []>} : vector<16x1024xbf16>, vector<1024x128xbf16>, vector<16x128xf32> -> vector<16x128xf32>
    %c0_15 = arith.constant 0 : index
    %c0_16 = arith.constant 0 : index
    %19 = vector.load %arg7[%c0_15, %c0_16] : memref<1x128xf32, #tpu.memory_space<vmem>>, vector<1x128xf32>
    %20 = vector.broadcast %19 : vector<1x128xf32> to vector<16x128xf32>
    %21 = arith.addf %18, %20 : vector<16x128xf32>
    %22 = tpu.iota {dimensions = array<i32: 1>} : vector<16x128xi32>
    %c21_i32 = arith.constant 21 : i32
    %23 = vector.broadcast %c21_i32 : i32 to vector<16x128xi32>
    %24 = arith.cmpi slt, %22, %23 : vector<16x128xi32>
    %cst_17 = arith.constant -1.000000e+30 : f32
    %25 = vector.broadcast %cst_17 : f32 to vector<16x128xf32>
    %26 = arith.select %24, %21, %25 : vector<16x128xi1>, vector<16x128xf32>
    %cst_18 = arith.constant dense<0xFF800000> : vector<16xf32>
    %27 = vector.multi_reduction <maximumf>, %26, %cst_18 [1] : vector<16x128xf32> to vector<16xf32>
    %28 = vector.shape_cast %27 : vector<16xf32> to vector<16x1xf32>
    %29 = vector.broadcast %28 : vector<16x1xf32> to vector<16x128xf32>
    %30 = arith.subf %26, %29 : vector<16x128xf32>
    %31 = math.exp %30 : vector<16x128xf32>
    %cst_19 = arith.constant dense<0.000000e+00> : vector<16xf32>
    %32 = vector.multi_reduction <add>, %31, %cst_19 [1] : vector<16x128xf32> to vector<16xf32>
    %33 = vector.shape_cast %32 : vector<16xf32> to vector<16x1xf32>
    %34 = tpu.reciprocal %33 : vector<16x1xf32> -> vector<16x1xf32>
    %35 = vector.broadcast %34 : vector<16x1xf32> to vector<16x128xf32>
    %36 = arith.mulf %31, %35 : vector<16x128xf32>
    %37 = arith.select %24, %36, %21 : vector<16x128xi1>, vector<16x128xf32>
    %c0_20 = arith.constant 0 : index
    %c0_21 = arith.constant 0 : index
    %38 = vector.load %arg8[%c0_20, %c0_21] : memref<16x128xf32, #tpu.memory_space<vmem>>, vector<16x128xf32>
    tpu.vector_store %arg8[%c0_20, %c0_21], %37 {strides = array<i32>} : memref<16x128xf32, #tpu.memory_space<vmem>>, vector<16x128xf32>,
    return
  }
  func.func @transform_0(%arg0: i32) -> (i32, i32) {
    %c0_i32 = arith.constant 0 : i32
    %c0_i32_0 = arith.constant 0 : i32
    return %arg0, %c0_i32 : i32, i32
  }
  func.func @transform_1(%arg0: i32) -> (i32, i32) {
    %c0_i32 = arith.constant 0 : i32
    %c0_i32_0 = arith.constant 0 : i32
    %c0_i32_1 = arith.constant 0 : i32
    return %c0_i32, %c0_i32_0 : i32, i32
  }
  func.func @transform_2(%arg0: i32) -> (i32, i32) {
    %c0_i32 = arith.constant 0 : i32
    %c0_i32_0 = arith.constant 0 : i32
    %c0_i32_1 = arith.constant 0 : i32
    return %c0_i32, %c0_i32_0 : i32, i32
  }
  func.func @transform_3(%arg0: i32) -> (i32, i32) {
    %c0_i32 = arith.constant 0 : i32
    %c0_i32_0 = arith.constant 0 : i32
    %c0_i32_1 = arith.constant 0 : i32
    return %c0_i32, %c0_i32_0 : i32, i32
  }
  func.func @transform_4(%arg0: i32) -> (i32, i32) {
    %c0_i32 = arith.constant 0 : i32
    %c0_i32_0 = arith.constant 0 : i32
    %c0_i32_1 = arith.constant 0 : i32
    return %c0_i32, %c0_i32_0 : i32, i32
  }
  func.func @transform_5(%arg0: i32) -> (i32, i32) {
    %c0_i32 = arith.constant 0 : i32
    %c0_i32_0 = arith.constant 0 : i32
    %c0_i32_1 = arith.constant 0 : i32
    return %c0_i32, %c0_i32_0 : i32, i32
  }
  func.func @transform_6(%arg0: i32) -> (i32, i32) {
    %c0_i32 = arith.constant 0 : i32
    %c0_i32_0 = arith.constant 0 : i32
    %c0_i32_1 = arith.constant 0 : i32
    return %c0_i32, %c0_i32_0 : i32, i32
  }
  func.func @transform_7(%arg0: i32) -> (i32, i32) {
    %c0_i32 = arith.constant 0 : i32
    %c0_i32_0 = arith.constant 0 : i32
    return %arg0, %c0_i32 : i32, i32
  }
}

</mosaic_0001>

<bundles_post_ra>
// kernel: tpu_custom_call.1
= control target key start
LH: loop header
LB: loop body
LE: loop exit
PB: predicated region body
PF: predicated region fallthrough
CT: control target
= control target key end

     0   :  { %12 = vsyncpa [#allocation3], 0  ;;  %s7143_s0 = inlined_call_operand.hbm [shape: bf16[16,256], index: 0, kind: input, shape index: {}]   ;;  %s7144_s1 = inlined_call_operand.hbm [shape: bf16[256,1024], index: 1, kind: input, shape index: {}]   ;;  %s7145_s2 = inlined_call_operand.hbm [shape: f32[1,1024], index: 2, kind: input, shape index: {}]   ;;  %s7146_s3 = inlined_call_operand.hbm [shape: bf16[1024,1024], index: 3, kind: input, shape index: {}]   ;;  %s7147_s4 = inlined_call_operand.hbm [shape: f32[1,1024], index: 4, kind: input, shape index: {}]   ;;  %s7148_s5 = inlined_call_operand.hbm [shape: bf16[1024,128], index: 5, kind: input, shape index: {}]   ;;  %s7149_s6 = inlined_call_operand.hbm [shape: f32[1,128], index: 6, kind: input, shape index: {}]   ;;  %s7150_s7 = inlined_call_operand.hbm [shape: f32[16,128], index: 7, kind: output, shape index: {}]  }
   0x1   :  { %13 = vsyncpa [#allocation6], 0 }
   0x2   :  { %14 = vsyncpa [#allocation9], 0 }
   0x3   :  { %15 = vsyncpa [#allocation12], 0 }
   0x4   :  { %16 = vsyncpa [#allocation4], 0  ;;  %s6825_s24 = smov [#allocation5]   ;;  %s6639_s28 = scalar_lea.hbm %s7144_s1, 16384 }
   0x5   :  { %s34_s25 = sshll.u32 %s6825_s24, 4  ;;  %p6640_p0 = scmp.ne.s32.totalorder %s7144_s1, %s6639_s28  ;;  %s35_s25 = int_to_ptr.vmem [resolvable:$true] %s34_s25 }
   0x6   :  { %p6643_p1 = scmp.lt.u32.totalorder %s6639_s28, %s7144_s1 }
   0x8   :  { %p6645_p2 = pnand %p6643_p1, %p6640_p0 }
   0xa   :  { %6648 = shalt.err (!%p6645_p2)
}
   0xb   :  { %s6649_s10 = scalar_lea.vmem %s35_s25, 16384  ;;  %p6654_p4 = scmp.lt.s32.totalorder %s35_s25, %s35_s25 }
   0xc   :  { %p6650_p3 = scmp.ne.s32.totalorder %s35_s25, %s6649_s10  ;;  %p6655_p5 = scmp.lt.s32.totalorder %s6649_s10, %s6649_s10 }
   0xe   :  { %p6656_p6 = por %p6655_p5, %p6654_p4 }
  0x10   :  { %p6657_p7 = pnand %p6656_p6, %p6650_p3 }
  0x12   :  { %6660 = shalt.err (!%p6657_p7)
}
  0x13   :  { %s6826_s11 = smov 512   ;;  %s6827_s12 = smov 32  }
  0x14   :  { %40 = dma.hbm_to_vmem [thread:$0]  %s7144_s1, 16384, %s35_s25, [#allocation6], %s6826_s11, %s6826_s11, %s6827_s12  }
  0x15   :  { %s6828_s15 = smov [#allocation8]   ;;  %s6829_s17 = smov [#allocation11]  }
  0x16   :  { %s56_s16 = sshll.u32 %s6828_s15, 4  ;;  %s78_s18 = sshll.u32 %s6829_s17, 4  ;;  %s57_s16 = int_to_ptr.vmem [resolvable:$true] %s56_s16  ;;  %s79_s18 = int_to_ptr.vmem [resolvable:$true] %s78_s18 }
  0x17   :  { %s6661_s21 = scalar_lea.hbm %s7146_s3, 65536 }
  0x18   :  { %p6662_p8 = scmp.ne.s32.totalorder %s7146_s3, %s6661_s21  ;;  %p6665_p9 = scmp.lt.u32.totalorder %s6661_s21, %s7146_s3 }
  0x1a   :  { %p6667_p10 = pnand %p6665_p9, %p6662_p8 }
  0x1c   :  { %6670 = shalt.err (!%p6667_p10)
}
  0x1d   :  { %s6671_s1 = scalar_lea.vmem %s57_s16, 65536  ;;  %p6676_p12 = scmp.lt.s32.totalorder %s57_s16, %s57_s16 }
  0x1e   :  { %p6672_p11 = scmp.ne.s32.totalorder %s57_s16, %s6671_s1  ;;  %p6677_p13 = scmp.lt.s32.totalorder %s6671_s1, %s6671_s1 }
  0x20   :  { %p6678_p0 = por %p6677_p13, %p6676_p12 }
  0x22   :  { %p6679_p1 = pnand %p6678_p0, %p6672_p11 }
  0x24   :  { %6682 = shalt.err (!%p6679_p1)
}
  0x25   :  { %62 = dma.hbm_to_vmem [thread:$0]  %s7146_s3, 65536, %s57_s16, [#allocation9], %s6826_s11, %s6826_s11, %s6827_s12  }
  0x26   :  { %s6683_s30 = scalar_lea.hbm %s7148_s5, 8192 }
  0x27   :  { %p6684_p2 = scmp.ne.s32.totalorder %s7148_s5, %s6683_s30  ;;  %p6687_p3 = scmp.lt.u32.totalorder %s6683_s30, %s7148_s5 }
  0x29   :  { %p6689_p4 = pnand %p6687_p3, %p6684_p2 }
  0x2b   :  { %6692 = shalt.err (!%p6689_p4)
}
  0x2c   :  { %s6693_s14 = scalar_lea.vmem %s79_s18, 8192  ;;  %p6698_p6 = scmp.lt.s32.totalorder %s79_s18, %s79_s18 }
  0x2d   :  { %p6694_p5 = scmp.ne.s32.totalorder %s79_s18, %s6693_s14  ;;  %p6699_p7 = scmp.lt.s32.totalorder %s6693_s14, %s6693_s14 }
  0x2f   :  { %p6700_p8 = por %p6699_p7, %p6698_p6 }
  0x31   :  { %p6701_p9 = pnand %p6700_p8, %p6694_p5 }
  0x33   :  { %6704 = shalt.err (!%p6701_p9)
}
  0x34   :  { %s6830_s3 = smov 64   ;;  %s6831_s11 = smov 4  }
  0x35   :  { %84 = dma.hbm_to_vmem [thread:$0]  %s7148_s5, 8192, %s79_s18, [#allocation12], %s6830_s3, %s6830_s3, %s6831_s11  }
  0x36   :  { %s6832_s16 = smov [#allocation2]   ;;  %s6705_s21 = scalar_lea.hbm %s7143_s0, 256 }
  0x37   :  { %s22_s17 = sshll.u32 %s6832_s16, 4  ;;  %p6706_p10 = scmp.ne.s32.totalorder %s7143_s0, %s6705_s21  ;;  %s23_s17 = int_to_ptr.vmem [resolvable:$true] %s22_s17 }
  0x38   :  { %p6709_p11 = scmp.lt.u32.totalorder %s6705_s21, %s7143_s0 }
  0x3a   :  { %p6711_p12 = pnand %p6709_p11, %p6706_p10 }
  0x3c   :  { %6714 = shalt.err (!%p6711_p12)
}
  0x3d   :  { %s6715_s1 = scalar_lea.vmem %s23_s17, 256  ;;  %p6720_p0 = scmp.lt.s32.totalorder %s23_s17, %s23_s17 }
  0x3e   :  { %p6716_p13 = scmp.ne.s32.totalorder %s23_s17, %s6715_s1  ;;  %p6721_p1 = scmp.lt.s32.totalorder %s6715_s1, %s6715_s1 }
  0x40   :  { %p6722_p2 = por %p6721_p1, %p6720_p0 }
  0x42   :  { %p6723_p3 = pnand %p6722_p2, %p6716_p13 }
  0x44   :  { %6726 = shalt.err (!%p6723_p3)
}
  0x45   :  { %s6833_s5 = smov 128   ;;  %s6834_s18 = smov 8  }
  0x46   :  { %28 = dma.hbm_to_vmem [thread:$0]  %s7143_s0, 256, %s23_s17, [#allocation3], %s6833_s5, %s6833_s5, %s6834_s18  }
  0x47   :  { %s6835_s28 = smov [#allocation7]   ;;  %s6836_s30 = smov [#allocation10]  }
  0x48   :  { %s47_s29 = sshll.u32 %s6835_s28, 4  ;;  %s69_s8 = sshll.u32 %s6836_s30, 4  ;;  %s48_s29 = int_to_ptr.vmem [resolvable:$true] %s47_s29  ;;  %s70_s8 = int_to_ptr.vmem [resolvable:$true] %s69_s8 }
  0x49   :  { %s6727_s13 = scalar_lea.hbm %s7145_s2, 128 }
  0x4a   :  { %p6728_p4 = scmp.ne.s32.totalorder %s7145_s2, %s6727_s13  ;;  %p6731_p5 = scmp.lt.u32.totalorder %s6727_s13, %s7145_s2 }
  0x4c   :  { %p6733_p6 = pnand %p6731_p5, %p6728_p4 }
  0x4e   :  { %6736 = shalt.err (!%p6733_p6)
}
  0x4f   :  { %s6737_s0 = scalar_lea.vmem %s48_s29, 128  ;;  %p6742_p8 = scmp.lt.s32.totalorder %s48_s29, %s48_s29 }
  0x50   :  { %p6738_p7 = scmp.ne.s32.totalorder %s48_s29, %s6737_s0  ;;  %p6743_p9 = scmp.lt.s32.totalorder %s6737_s0, %s6737_s0 }
  0x52   :  { %p6744_p10 = por %p6743_p9, %p6742_p8 }
  0x54   :  { %p6745_p11 = pnand %p6744_p10, %p6738_p7 }
  0x56   :  { %6748 = shalt.err (!%p6745_p11)
}
  0x57   :  { %50 = dma.hbm_to_vmem [thread:$0]  %s7145_s2, 128, %s48_s29, [#allocation6]  }
  0x58   :  { %s6749_s20 = scalar_lea.hbm %s7147_s4, 128 }
  0x59   :  { %p6750_p12 = scmp.ne.s32.totalorder %s7147_s4, %s6749_s20  ;;  %p6753_p13 = scmp.lt.u32.totalorder %s6749_s20, %s7147_s4 }
  0x5b   :  { %p6755_p0 = pnand %p6753_p13, %p6750_p12 }
  0x5d   :  { %6758 = shalt.err (!%p6755_p0)
}
  0x5e   :  { %s6759_s26 = scalar_lea.vmem %s70_s8, 128  ;;  %p6764_p2 = scmp.lt.s32.totalorder %s70_s8, %s70_s8 }
  0x5f   :  { %p6760_p1 = scmp.ne.s32.totalorder %s70_s8, %s6759_s26  ;;  %p6765_p3 = scmp.lt.s32.totalorder %s6759_s26, %s6759_s26 }
  0x61   :  { %p6766_p4 = por %p6765_p3, %p6764_p2 }
  0x63   :  { %p6767_p5 = pnand %p6766_p4, %p6760_p1 }
  0x65   :  { %6770 = shalt.err (!%p6767_p5)
}
  0x66   :  { %72 = dma.hbm_to_vmem [thread:$0]  %s7147_s4, 128, %s70_s8, [#allocation9]  }
  0x67   :  { %s6837_s25 = smov [#allocation13]   ;;  %s6771_s30 = scalar_lea.hbm %s7149_s6, 16 }
  0x68   :  { %s91_s27 = sshll.u32 %s6837_s25, 4  ;;  %p6772_p6 = scmp.ne.s32.totalorder %s7149_s6, %s6771_s30  ;;  %s92_s27 = int_to_ptr.vmem [resolvable:$true] %s91_s27 }
  0x69   :  { %p6775_p7 = scmp.lt.u32.totalorder %s6771_s30, %s7149_s6 }
  0x6b   :  { %p6777_p8 = pnand %p6775_p7, %p6772_p6 }
  0x6d   :  { %6780 = shalt.err (!%p6777_p8)
}
  0x6e   :  { %s6781_s3 = scalar_lea.vmem %s92_s27, 16  ;;  %s6785_s4 = scalar_lea.vmem %s92_s27, 32 }
  0x6f   :  { %p6782_p9 = scmp.ne.s32.totalorder %s92_s27, %s6781_s3  ;;  %p6786_p10 = scmp.lt.s32.totalorder %s92_s27, %s92_s27 }
  0x70   :  { %p6787_p11 = scmp.lt.s32.totalorder %s6785_s4, %s6781_s3 }
  0x72   :  { %p6788_p12 = por %p6787_p11, %p6786_p10 }
  0x74   :  { %p6789_p13 = pnand %p6788_p12, %p6782_p9 }
  0x76   :  { %6792 = shalt.err (!%p6789_p13)
}
  0x77   :  { %94 = dma.hbm_to_vmem [thread:$0]  %s7149_s6, 16, %s92_s27, [#allocation12]  }
  0x78   :  { %6815 = dma.done.wait [#allocation3], 256  }
  0x79   :  { %6816 = vsyncadd [#allocation3], 4294967040 }
  0x7a   :  { %6817 = dma.done.wait [#allocation6], 16512  }
  0x7b   :  { %6818 = vsyncadd [#allocation6], 4294950784 }
  0x7c   :  { %6819 = dma.done.wait [#allocation9], 65664  }
  0x7d   :  { %6820 = vsyncadd [#allocation9], 4294901632 }
  0x7e   :  { %6821 = dma.done.wait [#allocation12], 8208  }
  0x7f   :  { %6822 = vsyncadd [#allocation12], 4294959088  ;;  %v119_v0 = vld [vmem:[#allocation5] sm:$0xff]  ;;  %v120_v17 = vld [vmem:[#allocation5 + $0x8] sm:$0xff]  ;;  %s6838_s6 = smov [#allocation14]  }
  0x80   :  { %v123_v1 = vld [vmem:[#allocation5 + $0x20] sm:$0xff]  ;;  %v124_v18 = vld [vmem:[#allocation5 + $0x28] sm:$0xff]  ;;  %v6966_v22 = vld [vmem:[#allocation2 + $0x4] ss:$8 sps:$4 sm:$0xff]   ;;  %s5676_s12 = sshll.u32 %s6838_s6, 4  ;;  %s5677_s12 = int_to_ptr.vmem [resolvable:$true] %s5676_s12 }
  0x81   :  { %v127_v2 = vld [vmem:[#allocation5 + $0x40] sm:$0xff]  ;;  %v5694_v3 = vcombine.high %v119_v0, %v123_v1  ;;  %v5693_v4 = vcombine.low %v119_v0, %v123_v1  ;;  %v5696_v20 = vcombine.high %v120_v17, %v124_v18  ;;  %v5695_v21 = vcombine.low %v120_v17, %v124_v18  ;;  %v128_v23 = vld [vmem:[#allocation5 + $0x48] sm:$0xff]  ;;  %971 = vmatprep.mubr.bf16.mxu0 %v6966_v22  ;;  %s6793_s0 = scalar_lea.vmem %s5677_s12, 256  ;;  %p6798_p1 = scmp.lt.s32.totalorder %s5677_s12, %s5677_s12 }
  0x82   :  { %v131_v5 = vld [vmem:[#allocation5 + $0x60] sm:$0xff]  ;;  %v132_v25 = vld [vmem:[#allocation5 + $0x68] sm:$0xff]  ;;  %1014 = vmatprep.mubr.bf16.mxu1 %v6966_v22  ;;  %p6794_p0 = scmp.ne.s32.totalorder %s5677_s12, %s6793_s0  ;;  %p6799_p2 = scmp.lt.s32.totalorder %s6793_s0, %s6793_s0 }
  0x83   :  { %v5702_v6 = vcombine.high %v127_v2, %v131_v5  ;;  %v135_v7 = vld [vmem:[#allocation5 + $0x80] sm:$0xff]  ;;  %939 = vmatprep.subr.bf16.mxu0 %v5694_v3  ;;  %v5701_v9 = vcombine.low %v127_v2, %v131_v5  ;;  %v136_v26 = vld [vmem:[#allocation5 + $0x88] sm:$0xff]  ;;  %982 = vmatprep.subr.bf16.mxu1 %v5696_v20  ;;  %v5704_v30 = vcombine.high %v128_v23, %v132_v25 }
  0x84   :  { %v139_v8 = vld [vmem:[#allocation5 + $0xa0] sm:$0xff]  ;;  %940 = vmatpush1.bf16.msra.mxu0 %v5693_v4  ;;  %v140_v27 = vld [vmem:[#allocation5 + $0xa8] sm:$0xff]  ;;  %983 = vmatpush1.bf16.msra.mxu1 %v5695_v21  ;;  %v5703_v31 = vcombine.low %v128_v23, %v132_v25  ;;  %p6800_p3 = por %p6799_p2, %p6798_p1 }
  0x85   :  { %941 = vmatprep.subr.bf16.mxu0 %v5702_v6  ;;  %v5710_v10 = vcombine.high %v135_v7, %v139_v8  ;;  %v143_v11 = vld [vmem:[#allocation5 + $0xc0] sm:$0xff]  ;;  %v5709_v13 = vcombine.low %v135_v7, %v139_v8  ;;  %984 = vmatprep.subr.bf16.mxu1 %v5704_v30  ;;  %v5712_v33 = vcombine.high %v136_v26, %v140_v27  ;;  %v144_v35 = vld [vmem:[#allocation5 + $0xc8] sm:$0xff] }
  0x86   :  { %v147_v12 = vld [vmem:[#allocation5 + $0xe0] sm:$0xff]  ;;  %v148_v36 = vld [vmem:[#allocation5 + $0xe8] sm:$0xff]  ;;  %v5711_v39 = vcombine.low %v136_v26, %v140_v27  ;;  %p6801_p4 = pnand %p6800_p3, %p6794_p0 }
  0x87   :  { %v5718_v14 = vcombine.high %v143_v11, %v147_v12  ;;  %v151_v15 = vld [vmem:[#allocation5 + $0x100] sm:$0xff]  ;;  %v5717_v19 = vcombine.low %v143_v11, %v147_v12  ;;  %v5720_v41 = vcombine.high %v144_v35, %v148_v36  ;;  %v152_v43 = vld [vmem:[#allocation5 + $0x108] sm:$0xff]  ;;  %v5719_v47 = vcombine.low %v144_v35, %v148_v36 }
  0x88   :  { %942 = vmatpush1.bf16.msra.mxu0 %v5701_v9  ;;  %v155_v16 = vld [vmem:[#allocation5 + $0x120] sm:$0xff]  ;;  %985 = vmatpush1.bf16.msra.mxu1 %v5703_v31  ;;  %v156_v44 = vld [vmem:[#allocation5 + $0x128] sm:$0xff] }
  0x89   :  { %943 = vmatprep.subr.bf16.mxu0 %v5710_v10  ;;  %v5726_v24 = vcombine.high %v151_v15, %v155_v16  ;;  %v159_v28 = vld [vmem:[#allocation5 + $0x140] sm:$0xff]  ;;  %v5725_v32 = vcombine.low %v151_v15, %v155_v16  ;;  %986 = vmatprep.subr.bf16.mxu1 %v5712_v33  ;;  %v5728_v49 = vcombine.high %v152_v43, %v156_v44  ;;  %v160_v51 = vld [vmem:[#allocation5 + $0x148] sm:$0xff] }
  0x8a   :  { %v163_v29 = vld [vmem:[#allocation5 + $0x160] sm:$0xff]  ;;  %v164_v52 = vld [vmem:[#allocation5 + $0x168] sm:$0xff]  ;;  %v5727_v55 = vcombine.low %v152_v43, %v156_v44 }
  0x8b   :  { %v5734_v34 = vcombine.high %v159_v28, %v163_v29  ;;  %v167_v37 = vld [vmem:[#allocation5 + $0x180] sm:$0xff]  ;;  %v5733_v40 = vcombine.low %v159_v28, %v163_v29  ;;  %v5736_v57 = vcombine.high %v160_v51, %v164_v52  ;;  %v168_v59 = vld [vmem:[#allocation5 + $0x188] sm:$0xff]  ;;  %v5735_v63 = vcombine.low %v160_v51, %v164_v52 }
  0x8c   :  { %944 = vmatpush1.bf16.msra.mxu0 %v5709_v13  ;;  %v171_v38 = vld [vmem:[#allocation5 + $0x1a0] sm:$0xff]  ;;  %987 = vmatpush1.bf16.msra.mxu1 %v5711_v39  ;;  %v172_v60 = vld [vmem:[#allocation5 + $0x1a8] sm:$0xff] }
  0x8d   :  { %945 = vmatprep.subr.bf16.mxu0 %v5718_v14  ;;  %v5742_v42 = vcombine.high %v167_v37, %v171_v38  ;;  %v175_v45 = vld [vmem:[#allocation5 + $0x1c0] sm:$0xff]  ;;  %v5741_v48 = vcombine.low %v167_v37, %v171_v38  ;;  %988 = vmatprep.subr.bf16.mxu1 %v5720_v41  ;;  %v5744_v1 = vcombine.high %v168_v59, %v172_v60  ;;  %v176_v3 = vld [vmem:[#allocation5 + $0x1c8] sm:$0xff] }
  0x8e   :  { %v179_v46 = vld [vmem:[#allocation5 + $0x1e0] sm:$0xff]  ;;  %v180_v4 = vld [vmem:[#allocation5 + $0x1e8] sm:$0xff]  ;;  %v5743_v7 = vcombine.low %v168_v59, %v172_v60 }
  0x8f   :  { %v5750_v50 = vcombine.high %v175_v45, %v179_v46  ;;  %v183_v53 = vld [vmem:[#allocation5 + $0x200] sm:$0xff]  ;;  %v5749_v56 = vcombine.low %v175_v45, %v179_v46  ;;  %v5752_v9 = vcombine.high %v176_v3, %v180_v4  ;;  %v184_v11 = vld [vmem:[#allocation5 + $0x208] sm:$0xff]  ;;  %v5751_v15 = vcombine.low %v176_v3, %v180_v4 }
  0x90   :  { %946 = vmatpush1.bf16.msra.mxu0 %v5717_v19  ;;  %v187_v54 = vld [vmem:[#allocation5 + $0x220] sm:$0xff]  ;;  %989 = vmatpush1.bf16.msra.mxu1 %v5719_v47  ;;  %v188_v12 = vld [vmem:[#allocation5 + $0x228] sm:$0xff] }
  0x91   :  { %947 = vmatprep.subr.bf16.mxu0 %v5726_v24  ;;  %990 = vmatprep.subr.bf16.mxu1 %v5728_v49  ;;  %v5758_v58 = vcombine.high %v183_v53, %v187_v54  ;;  %v191_v61 = vld [vmem:[#allocation5 + $0x240] sm:$0xff]  ;;  %v5757_v0 = vcombine.low %v183_v53, %v187_v54  ;;  %v5760_v17 = vcombine.high %v184_v11, %v188_v12  ;;  %v192_v19 = vld [vmem:[#allocation5 + $0x248] sm:$0xff]  ;;  %v121_v54 = vld [vmem:[#allocation5 + $0x10] sm:$0xff] }
  0x92   :  { %v195_v62 = vld [vmem:[#allocation5 + $0x260] sm:$0xff]  ;;  %v196_v20 = vld [vmem:[#allocation5 + $0x268] sm:$0xff]  ;;  %v5759_v24 = vcombine.low %v184_v11, %v188_v12 }
  0x93   :  { %v5766_v2 = vcombine.high %v191_v61, %v195_v62  ;;  %v199_v5 = vld [vmem:[#allocation5 + $0x280] sm:$0xff]  ;;  %v5765_v8 = vcombine.low %v191_v61, %v195_v62  ;;  %v5768_v26 = vcombine.high %v192_v19, %v196_v20  ;;  %v200_v28 = vld [vmem:[#allocation5 + $0x288] sm:$0xff]  ;;  %v129_v61 = vld [vmem:[#allocation5 + $0x50] sm:$0xff] }
  0x94   :  { %948 = vmatpush1.bf16.msra.mxu0 %v5725_v32  ;;  %991 = vmatpush1.bf16.msra.mxu1 %v5727_v55  ;;  %v203_v6 = vld [vmem:[#allocation5 + $0x2a0] sm:$0xff]  ;;  %v204_v29 = vld [vmem:[#allocation5 + $0x2a8] sm:$0xff]  ;;  %v5767_v32 = vcombine.low %v192_v19, %v196_v20  ;;  %v125_v55 = vld [vmem:[#allocation5 + $0x30] sm:$0xff] }
  0x95   :  { %949 = vmatprep.subr.bf16.mxu0 %v5734_v34  ;;  %992 = vmatprep.subr.bf16.mxu1 %v5736_v57  ;;  %v5774_v10 = vcombine.high %v199_v5, %v203_v6  ;;  %v207_v13 = vld [vmem:[#allocation5 + $0x2c0] sm:$0xff]  ;;  %v5773_v16 = vcombine.low %v199_v5, %v203_v6  ;;  %v5776_v34 = vcombine.high %v200_v28, %v204_v29  ;;  %v208_v36 = vld [vmem:[#allocation5 + $0x2c8] sm:$0xff]  ;;  %v137_v6 = vld [vmem:[#allocation5 + $0x90] sm:$0xff] }
  0x96   :  { %v211_v14 = vld [vmem:[#allocation5 + $0x2e0] sm:$0xff]  ;;  %v212_v37 = vld [vmem:[#allocation5 + $0x2e8] sm:$0xff]  ;;  %v5698_v62 = vcombine.high %v121_v54, %v125_v55  ;;  %v5697_v5 = vcombine.low %v121_v54, %v125_v55  ;;  %v134_v19 = vld [vmem:[#allocation5 + $0x78] sm:$0xff] }
  0x97   :  { %v5782_v18 = vcombine.high %v207_v13, %v211_v14  ;;  %v215_v21 = vld [vmem:[#allocation5 + $0x300] sm:$0xff]  ;;  %v5781_v25 = vcombine.low %v207_v13, %v211_v14  ;;  %v216_v44 = vld [vmem:[#allocation5 + $0x308] sm:$0xff]  ;;  %v145_v13 = vld [vmem:[#allocation5 + $0xd0] sm:$0xff] }
  0x98   :  { %950 = vmatpush1.bf16.msra.mxu0 %v5733_v40  ;;  %993 = vmatpush1.bf16.msra.mxu1 %v5735_v63  ;;  %v219_v23 = vld [vmem:[#allocation5 + $0x320] sm:$0xff]  ;;  %v5775_v40 = vcombine.low %v200_v28, %v204_v29  ;;  %v220_v45 = vld [vmem:[#allocation5 + $0x328] sm:$0xff]  ;;  %v133_v63 = vld [vmem:[#allocation5 + $0x70] sm:$0xff] }
  0x99   :  { %951 = vmatprep.subr.bf16.mxu0 %v5742_v42  ;;  %994 = vmatprep.subr.bf16.mxu1 %v5744_v1  ;;  %v5790_v27 = vcombine.high %v215_v21, %v219_v23  ;;  %v223_v30 = vld [vmem:[#allocation5 + $0x340] sm:$0xff]  ;;  %v5789_v33 = vcombine.low %v215_v21, %v219_v23  ;;  %v5784_v42 = vcombine.high %v208_v36, %v212_v37  ;;  %v224_v52 = vld [vmem:[#allocation5 + $0x348] sm:$0xff]  ;;  %v149_v14 = vld [vmem:[#allocation5 + $0xf0] sm:$0xff] }
  0x9a   :  { %v227_v31 = vld [vmem:[#allocation5 + $0x360] sm:$0xff]  ;;  %v228_v53 = vld [vmem:[#allocation5 + $0x368] sm:$0xff]  ;;  %v5705_v12 = vcombine.low %v129_v61, %v133_v63  ;;  %v153_v21 = vld [vmem:[#allocation5 + $0x110] sm:$0xff]  ;;  %v5721_v29 = vcombine.low %v145_v13, %v149_v14 }
  0x9b   :  { %v5798_v35 = vcombine.high %v223_v30, %v227_v31  ;;  %v231_v38 = vld [vmem:[#allocation5 + $0x380] sm:$0xff]  ;;  %v5797_v41 = vcombine.low %v223_v30, %v227_v31  ;;  %v232_v59 = vld [vmem:[#allocation5 + $0x388] sm:$0xff]  ;;  %v5799_v1 = vcombine.low %v224_v52, %v228_v53  ;;  %v157_v23 = vld [vmem:[#allocation5 + $0x130] sm:$0xff] }
  0x9c   :  { %952 = vmatpush1.bf16.msra.mxu0 %v5741_v48  ;;  %995 = vmatpush1.bf16.msra.mxu1 %v5743_v7  ;;  %v235_v39 = vld [vmem:[#allocation5 + $0x3a0] sm:$0xff]  ;;  %v5783_v48 = vcombine.low %v208_v36, %v212_v37  ;;  %v236_v60 = vld [vmem:[#allocation5 + $0x3a8] sm:$0xff]  ;;  %v141_v7 = vld [vmem:[#allocation5 + $0xb0] sm:$0xff]  ;;  %v5729_v37 = vcombine.low %v153_v21, %v157_v23 }
  0x9d   :  { %953 = vmatprep.subr.bf16.mxu0 %v5750_v50  ;;  %996 = vmatprep.subr.bf16.mxu1 %v5752_v9  ;;  %v5806_v43 = vcombine.high %v231_v38, %v235_v39  ;;  %v239_v46 = vld [vmem:[#allocation5 + $0x3c0] sm:$0xff]  ;;  %v5805_v49 = vcombine.low %v231_v38, %v235_v39  ;;  %v5792_v50 = vcombine.high %v216_v44, %v220_v45  ;;  %v244_v3 = vld [vmem:[#allocation5 + $0x3e8] sm:$0xff]  ;;  %v142_v28 = vld [vmem:[#allocation5 + $0xb8] sm:$0xff] }
  0x9e   :  { %v243_v47 = vld [vmem:[#allocation5 + $0x3e0] sm:$0xff]  ;;  %v5808_v4 = vcombine.high %v232_v59, %v236_v60  ;;  %v5807_v9 = vcombine.low %v232_v59, %v236_v60  ;;  %v5713_v20 = vcombine.low %v137_v6, %v141_v7  ;;  %v161_v30 = vld [vmem:[#allocation5 + $0x150] sm:$0xff]  ;;  %v150_v36 = vld [vmem:[#allocation5 + $0xf8] sm:$0xff] }
  0x9f   :  { %v5814_v51 = vcombine.high %v239_v46, %v243_v47  ;;  %v5813_v57 = vcombine.low %v239_v46, %v243_v47  ;;  %v165_v31 = vld [vmem:[#allocation5 + $0x170] sm:$0xff]  ;;  %v174_v59 = vld [vmem:[#allocation5 + $0x1b8] sm:$0xff] }
  0xa0   :  { %954 = vmatpush1.bf16.msra.mxu0 %v5749_v56  ;;  %997 = vmatpush1.bf16.msra.mxu1 %v5751_v15  ;;  %v5791_v56 = vcombine.low %v216_v44, %v220_v45  ;;  %v5714_v15 = vcombine.high %v137_v6, %v141_v7  ;;  %v169_v38 = vld [vmem:[#allocation5 + $0x190] sm:$0xff]  ;;  %v158_v44 = vld [vmem:[#allocation5 + $0x138] sm:$0xff]  ;;  %v5737_v45 = vcombine.low %v161_v30, %v165_v31 }
  0xa1   :  { %955 = vmatprep.subr.bf16.mxu0 %v5758_v58  ;;  %998 = vmatprep.subr.bf16.mxu1 %v5760_v17  ;;  %v5800_v58 = vcombine.high %v224_v52, %v228_v53  ;;  %v173_v39 = vld [vmem:[#allocation5 + $0x1b0] sm:$0xff] }
  0xa2   :  { %v177_v46 = vld [vmem:[#allocation5 + $0x1d0] sm:$0xff]  ;;  %v5745_v52 = vcombine.low %v169_v38, %v173_v39 }
  0xa3   :  { %v181_v47 = vld [vmem:[#allocation5 + $0x1f0] sm:$0xff] }
  0xa4   :  { %956 = vmatpush1.bf16.msra.mxu0 %v5757_v0  ;;  %999 = vmatpush1.bf16.msra.mxu1 %v5759_v24  ;;  %v6970_v0 = vld [vmem:[#allocation2] ss:$8 sps:$4 sm:$0xff]   ;;  %v5753_v60 = vcombine.low %v177_v46, %v181_v47 }
  0xa5   :  { %957 = vmatprep.subr.bf16.mxu0 %v5766_v2  ;;  %1000 = vmatprep.subr.bf16.mxu1 %v5768_v26  ;;  %v240_v2 = vld [vmem:[#allocation5 + $0x3c8] sm:$0xff]  ;;  %v185_v53 = vld [vmem:[#allocation5 + $0x210] sm:$0xff] }
  0xa6   :  { %v5816_v11 = vcombine.high %v240_v2, %v244_v3  ;;  %v5815_v17 = vcombine.low %v240_v2, %v244_v3  ;;  %v189_v54 = vld [vmem:[#allocation5 + $0x230] sm:$0xff]  ;;  %v178_v3 = vld [vmem:[#allocation5 + $0x1d8] sm:$0xff] }
  0xa7   :  { %v201_v6 = vld [vmem:[#allocation5 + $0x290] sm:$0xff] }
  0xa8   :  { %958 = vmatpush1.bf16.msra.mxu0 %v5765_v8  ;;  %1001 = vmatpush1.bf16.msra.mxu1 %v5767_v32  ;;  %v5706_v8 = vcombine.high %v129_v61, %v133_v63  ;;  %v193_v61 = vld [vmem:[#allocation5 + $0x250] sm:$0xff] }
  0xa9   :  { %959 = vmatprep.subr.bf16.mxu0 %v5774_v10  ;;  %1002 = vmatprep.subr.bf16.mxu1 %v5776_v34  ;;  %v122_v10 = vld [vmem:[#allocation5 + $0x18] sm:$0xff]  ;;  %v205_v7 = vld [vmem:[#allocation5 + $0x2b0] sm:$0xff] }
  0xac   :  { %960 = vmatpush1.bf16.msra.mxu0 %v5773_v16  ;;  %1003 = vmatpush1.bf16.msra.mxu1 %v5775_v40  ;;  %v126_v16 = vld [vmem:[#allocation5 + $0x38] sm:$0xff] }
  0xad   :  { %961 = vmatprep.subr.bf16.mxu0 %v5782_v18  ;;  %1004 = vmatprep.subr.bf16.mxu1 %v5784_v42  ;;  %v130_v18 = vld [vmem:[#allocation5 + $0x58] sm:$0xff]  ;;  %v5700_v24 = vcombine.high %v122_v10, %v126_v16  ;;  %v5699_v26 = vcombine.low %v122_v10, %v126_v16 }
  0xae   :  { %v5708_v32 = vcombine.high %v130_v18, %v134_v19  ;;  %v5707_v34 = vcombine.low %v130_v18, %v134_v19  ;;  %v194_v19 = vld [vmem:[#allocation5 + $0x258] sm:$0xff] }
  0xb0   :  { %962 = vmatpush1.bf16.msra.mxu0 %v5781_v25  ;;  %1005 = vmatpush1.bf16.msra.mxu1 %v5783_v48  ;;  %v5722_v25 = vcombine.high %v145_v13, %v149_v14  ;;  %v209_v14 = vld [vmem:[#allocation5 + $0x2d0] sm:$0xff] }
  0xb1   :  { %963 = vmatprep.subr.bf16.mxu0 %v5790_v27  ;;  %1006 = vmatprep.subr.bf16.mxu1 %v5792_v50  ;;  %v138_v27 = vld [vmem:[#allocation5 + $0x98] sm:$0xff] }
  0xb2   :  { %v5716_v40 = vcombine.high %v138_v27, %v142_v28  ;;  %v5715_v42 = vcombine.low %v138_v27, %v142_v28  ;;  %v162_v50 = vld [vmem:[#allocation5 + $0x158] sm:$0xff] }
  0xb4   :  { %964 = vmatpush1.bf16.msra.mxu0 %v5789_v33  ;;  %1007 = vmatpush1.bf16.msra.mxu1 %v5791_v56  ;;  %v5730_v33 = vcombine.high %v153_v21, %v157_v23  ;;  %v5754_v56 = vcombine.high %v177_v46, %v181_v47  ;;  %v5777_v21 = vcombine.low %v201_v6, %v205_v7  ;;  %v218_v47 = vld [vmem:[#allocation5 + $0x318] sm:$0xff] }
  0xb5   :  { %965 = vmatprep.subr.bf16.mxu0 %v5798_v35  ;;  %1008 = vmatprep.subr.bf16.mxu1 %v5800_v58  ;;  %v146_v35 = vld [vmem:[#allocation5 + $0xd8] sm:$0xff] }
  0xb6   :  { %v5724_v48 = vcombine.high %v146_v35, %v150_v36  ;;  %v170_v58 = vld [vmem:[#allocation5 + $0x198] sm:$0xff] }
  0xb7   :  { %v5747_v10 = vcombine.low %v170_v58, %v174_v59 }
  0xb8   :  { %966 = vmatpush1.bf16.msra.mxu0 %v5797_v41  ;;  %1009 = vmatpush1.bf16.msra.mxu1 %v5799_v1  ;;  %v5738_v41 = vcombine.high %v161_v30, %v165_v31  ;;  %v5762_v1 = vcombine.high %v185_v53, %v189_v54  ;;  %v202_v31 = vld [vmem:[#allocation5 + $0x298] sm:$0xff] }
  0xb9   :  { %967 = vmatprep.subr.bf16.mxu0 %v5806_v43  ;;  %1010 = vmatprep.subr.bf16.mxu1 %v5808_v4  ;;  %v154_v43 = vld [vmem:[#allocation5 + $0x118] sm:$0xff] }
  0xba   :  { %v5732_v55 = vcombine.high %v154_v43, %v158_v44  ;;  %v182_v4 = vld [vmem:[#allocation5 + $0x1f8] sm:$0xff] }
  0xbb   :  { %v5756_v16 = vcombine.high %v178_v3, %v182_v4  ;;  %v5755_v18 = vcombine.low %v178_v3, %v182_v4 }
  0xbc   :  { %968 = vmatpush1.bf16.msra.mxu0 %v5805_v49  ;;  %1011 = vmatpush1.bf16.msra.mxu1 %v5807_v9  ;;  %v5723_v49 = vcombine.low %v146_v35, %v150_v36 }
  0xbd   :  { %969 = vmatprep.subr.bf16.mxu0 %v5814_v51  ;;  %1012 = vmatprep.subr.bf16.mxu1 %v5816_v11  ;;  %v166_v51 = vld [vmem:[#allocation5 + $0x178] sm:$0xff] }
  0xbe   :  { %v5740_v63 = vcombine.high %v162_v50, %v166_v51  ;;  %v5739_v2 = vcombine.low %v162_v50, %v166_v51  ;;  %v186_v11 = vld [vmem:[#allocation5 + $0x218] sm:$0xff] }
  0xc0   :  { %970 = vmatpush1.bf16.msra.mxu0 %v5813_v57  ;;  %1013 = vmatpush1.bf16.msra.mxu1 %v5815_v17  ;;  %v5731_v57 = vcombine.low %v154_v43, %v158_v44  ;;  %v5778_v17 = vcombine.high %v201_v6, %v205_v7  ;;  %v242_v6 = vld [vmem:[#allocation5 + $0x3d8] sm:$0xff] }
  0xc1   :  { %1025 = vmatprep.subr.bf16.mxu0 %v5698_v62  ;;  %1068 = vmatprep.subr.bf16.mxu1 %v5700_v24  ;;  %v197_v62 = vld [vmem:[#allocation5 + $0x270] sm:$0xff]  ;;  %v246_v7 = vld [vmem:[#allocation5 + $0x3f8] sm:$0xff] }
  0xc2   :  { %v5770_v9 = vcombine.high %v193_v61, %v197_v62  ;;  %v5769_v13 = vcombine.low %v193_v61, %v197_v62  ;;  %v234_v61 = vld [vmem:[#allocation5 + $0x398] sm:$0xff] }
  0xc3   :  { %972 = vmatmul.mubr.bf16.vlgmr.msra.gmra.mrb[0].mxu0 %v6970_v0  ;;  %1015 = vmatmul.mubr.bf16.vlgmr.msra.gmra.mrb[0].mxu1 %v6970_v0  ;;  %v238_v62 = vld [vmem:[#allocation5 + $0x3b8] sm:$0xff] }
  0xc4   :  { %1026 = vmatpush1.bf16.msra.mxu0 %v5697_v5  ;;  %1057 = vmatprep.mubr.bf16.mxu0 %v6966_v22  ;;  %v5761_v5 = vcombine.low %v185_v53, %v189_v54  ;;  %v226_v54 = vld [vmem:[#allocation5 + $0x358] sm:$0xff]  ;;  %v5812_v4 = vcombine.high %v234_v61, %v238_v62 }
  0xc5   :  { %1027 = vmatprep.subr.bf16.mxu0 %v5706_v8  ;;  %1069 = vmatpush1.bf16.msra.mxu1 %v5699_v26  ;;  %v5748_v8 = vcombine.high %v170_v58, %v174_v59  ;;  %v221_v26 = vld [vmem:[#allocation5 + $0x330] sm:$0xff] }
  0xc6   :  { %1100 = vmatprep.mubr.bf16.mxu1 %v6966_v22  ;;  %1070 = vmatprep.subr.bf16.mxu1 %v5708_v32  ;;  %v5746_v22 = vcombine.high %v169_v38, %v173_v39  ;;  %v206_v32 = vld [vmem:[#allocation5 + $0x2b8] sm:$0xff] }
  0xc7   :  { %v210_v39 = vld [vmem:[#allocation5 + $0x2d8] sm:$0xff]  ;;  %v5779_v43 = vcombine.low %v202_v31, %v206_v32 }
  0xc8   :  { %1028 = vmatpush1.bf16.msra.mxu0 %v5705_v12  ;;  %v190_v12 = vld [vmem:[#allocation5 + $0x238] sm:$0xff] }
  0xc9   :  { %1029 = vmatprep.subr.bf16.mxu0 %v5714_v15  ;;  %1071 = vmatpush1.bf16.msra.mxu1 %v5707_v34  ;;  %v213_v15 = vld [vmem:[#allocation5 + $0x2f0] sm:$0xff]  ;;  %v5764_v23 = vcombine.high %v186_v11, %v190_v12  ;;  %v5763_v27 = vcombine.low %v186_v11, %v190_v12  ;;  %v5811_v11 = vcombine.low %v234_v61, %v238_v62 }
  0xca   :  { %1072 = vmatprep.subr.bf16.mxu1 %v5716_v40  ;;  %v5786_v24 = vcombine.high %v209_v14, %v213_v15  ;;  %v5785_v28 = vcombine.low %v209_v14, %v213_v15  ;;  %v229_v34 = vld [vmem:[#allocation5 + $0x370] sm:$0xff]  ;;  %v214_v40 = vld [vmem:[#allocation5 + $0x2f8] sm:$0xff]  ;;  %v5820_v12 = vcombine.high %v242_v6, %v246_v7 }
  0xcb   :  { %v5787_v50 = vcombine.low %v210_v39, %v214_v40  ;;  %v1136_v14 = vld [vmem:[#allocation8 + $0x8] sm:$0xff] }
  0xcc   :  { %1030 = vmatpush1.bf16.msra.mxu0 %v5713_v20  ;;  %v198_v20 = vld [vmem:[#allocation5 + $0x278] sm:$0xff]  ;;  %v1140_v15 = vld [vmem:[#allocation8 + $0x28] sm:$0xff] }
  0xcd   :  { %1031 = vmatprep.subr.bf16.mxu0 %v5722_v25  ;;  %1073 = vmatpush1.bf16.msra.mxu1 %v5715_v42  ;;  %v217_v25 = vld [vmem:[#allocation5 + $0x310] sm:$0xff]  ;;  %v5771_v35 = vcombine.low %v194_v19, %v198_v20 }
  0xce   :  { %1074 = vmatprep.subr.bf16.mxu1 %v5724_v48  ;;  %v5794_v30 = vcombine.high %v217_v25, %v221_v26  ;;  %v5793_v36 = vcombine.low %v217_v25, %v221_v26  ;;  %v237_v42 = vld [vmem:[#allocation5 + $0x3b0] sm:$0xff]  ;;  %v222_v48 = vld [vmem:[#allocation5 + $0x338] sm:$0xff]  ;;  %v1167_v26 = vld [vmem:[#allocation8 + $0x100] sm:$0xff] }
  0xcf   :  { %v5795_v58 = vcombine.low %v218_v47, %v222_v48  ;;  %v1188_v61 = vld [vmem:[#allocation8 + $0x1a8] sm:$0xff] }
  0xd0   :  { %1032 = vmatpush1.bf16.msra.mxu0 %v5721_v29  ;;  %v5772_v29 = vcombine.high %v194_v19, %v198_v20  ;;  %v5819_v19 = vcombine.low %v242_v6, %v246_v7  ;;  %v5824_v20 = vcombine.high %v1136_v14, %v1140_v15  ;;  %v6984_v6 = vld [vmem:[#allocation8 + $0x428] sm:$0xff] }
  0xd1   :  { %1033 = vmatprep.subr.bf16.mxu0 %v5730_v33  ;;  %1075 = vmatpush1.bf16.msra.mxu1 %v5723_v49  ;;  %v225_v33 = vld [vmem:[#allocation5 + $0x350] sm:$0xff] }
  0xd2   :  { %1076 = vmatprep.subr.bf16.mxu1 %v5732_v55  ;;  %v5802_v38 = vcombine.high %v225_v33, %v229_v34  ;;  %v5801_v44 = vcombine.low %v225_v33, %v229_v34  ;;  %v245_v49 = vld [vmem:[#allocation5 + $0x3f0] sm:$0xff]  ;;  %v230_v55 = vld [vmem:[#allocation5 + $0x378] sm:$0xff]  ;;  %v1175_v34 = vld [vmem:[#allocation8 + $0x140] sm:$0xff] }
  0xd3   :  { %v5803_v3 = vcombine.low %v226_v54, %v230_v55 }
  0xd4   :  { %1034 = vmatpush1.bf16.msra.mxu0 %v5729_v37  ;;  %v5780_v37 = vcombine.high %v202_v31, %v206_v32  ;;  %v1152_v31 = vld [vmem:[#allocation8 + $0x88] sm:$0xff] }
  0xd5   :  { %1035 = vmatprep.subr.bf16.mxu0 %v5738_v41  ;;  %1077 = vmatpush1.bf16.msra.mxu1 %v5731_v57  ;;  %v233_v41 = vld [vmem:[#allocation5 + $0x390] sm:$0xff]  ;;  %v1139_v57 = vld [vmem:[#allocation8 + $0x20] sm:$0xff] }
  0xd6   :  { %1078 = vmatprep.subr.bf16.mxu1 %v5740_v63  ;;  %v5810_v46 = vcombine.high %v233_v41, %v237_v42  ;;  %v5809_v51 = vcombine.low %v233_v41, %v237_v42  ;;  %v1156_v32 = vld [vmem:[#allocation8 + $0xa8] sm:$0xff]  ;;  %v1183_v42 = vld [vmem:[#allocation8 + $0x180] sm:$0xff] }
  0xd8   :  { %1036 = vmatpush1.bf16.msra.mxu0 %v5737_v45  ;;  %v5788_v45 = vcombine.high %v210_v39, %v214_v40  ;;  %v1160_v39 = vld [vmem:[#allocation8 + $0xc8] sm:$0xff] }
  0xd9   :  { %1037 = vmatprep.subr.bf16.mxu0 %v5746_v22  ;;  %1079 = vmatpush1.bf16.msra.mxu1 %v5739_v2  ;;  %v241_v22 = vld [vmem:[#allocation5 + $0x3d0] sm:$0xff]  ;;  %v1147_v2 = vld [vmem:[#allocation8 + $0x60] sm:$0xff] }
  0xda   :  { %1080 = vmatprep.subr.bf16.mxu1 %v5748_v8  ;;  %v5818_v53 = vcombine.high %v241_v22, %v245_v49  ;;  %v5817_v59 = vcombine.low %v241_v22, %v245_v49  ;;  %v1164_v40 = vld [vmem:[#allocation8 + $0xe8] sm:$0xff]  ;;  %v1191_v22 = vld [vmem:[#allocation8 + $0x1c0] sm:$0xff] }
  0xdb   :  { %v1195_v49 = vld [vmem:[#allocation8 + $0x1e0] sm:$0xff] }
  0xdc   :  { %1038 = vmatpush1.bf16.msra.mxu0 %v5745_v52  ;;  %v5796_v52 = vcombine.high %v218_v47, %v222_v48  ;;  %v1172_v47 = vld [vmem:[#allocation8 + $0x128] sm:$0xff]  ;;  %v5877_v62 = vcombine.low %v1191_v22, %v1195_v49 }
  0xdd   :  { %1039 = vmatprep.subr.bf16.mxu0 %v5754_v56  ;;  %1081 = vmatpush1.bf16.msra.mxu1 %v5747_v10  ;;  %v1135_v56 = vld [vmem:[#allocation8] sm:$0xff] }
  0xde   :  { %1082 = vmatprep.subr.bf16.mxu1 %v5756_v16  ;;  %v5822_v63 = vcombine.high %v1135_v56, %v1139_v57  ;;  %v1155_v10 = vld [vmem:[#allocation8 + $0xa0] sm:$0xff] }
  0xe0   :  { %1040 = vmatpush1.bf16.msra.mxu0 %v5753_v60  ;;  %v5804_v60 = vcombine.high %v226_v54, %v230_v55  ;;  %v1180_v54 = vld [vmem:[#allocation8 + $0x168] sm:$0xff]  ;;  %v5878_v55 = vcombine.high %v1191_v22, %v1195_v49 }
  0xe1   :  { %1041 = vmatprep.subr.bf16.mxu0 %v5762_v1  ;;  %1083 = vmatpush1.bf16.msra.mxu1 %v5755_v18  ;;  %v1143_v1 = vld [vmem:[#allocation8 + $0x40] sm:$0xff] }
  0xe2   :  { %1084 = vmatprep.subr.bf16.mxu1 %v5764_v23  ;;  %v5830_v8 = vcombine.high %v1143_v1, %v1147_v2  ;;  %v1163_v18 = vld [vmem:[#allocation8 + $0xe0] sm:$0xff]  ;;  %v1144_v23 = vld [vmem:[#allocation8 + $0x48] sm:$0xff] }
  0xe4   :  { %1042 = vmatpush1.bf16.msra.mxu0 %v5761_v5  ;;  %v5821_v5 = vcombine.low %v1135_v56, %v1139_v57  ;;  %v1199_v56 = vld [vmem:[#allocation8 + $0x200] sm:$0xff] }
  0xe5   :  { %1043 = vmatprep.subr.bf16.mxu0 %v5770_v9  ;;  %1085 = vmatpush1.bf16.msra.mxu1 %v5763_v27  ;;  %v1151_v9 = vld [vmem:[#allocation8 + $0x80] sm:$0xff] }
  0xe6   :  { %1086 = vmatprep.subr.bf16.mxu1 %v5772_v29  ;;  %v5838_v16 = vcombine.high %v1151_v9, %v1155_v10  ;;  %v1171_v27 = vld [vmem:[#allocation8 + $0x120] sm:$0xff] }
  0xe7   :  { %v5854_v33 = vcombine.high %v1167_v26, %v1171_v27  ;;  %v1203_v57 = vld [vmem:[#allocation8 + $0x220] sm:$0xff] }
  0xe8   :  { %1044 = vmatpush1.bf16.msra.mxu0 %v5769_v13  ;;  %v5829_v13 = vcombine.low %v1143_v1, %v1147_v2  ;;  %v6978_v1 = vld [vmem:[#allocation8 + $0x400] sm:$0xff] }
  0xe9   :  { %1045 = vmatprep.subr.bf16.mxu0 %v5778_v17  ;;  %1087 = vmatpush1.bf16.msra.mxu1 %v5771_v35  ;;  %v1159_v17 = vld [vmem:[#allocation8 + $0xc0] sm:$0xff] }
  0xea   :  { %1088 = vmatprep.subr.bf16.mxu1 %v5780_v37  ;;  %v5846_v25 = vcombine.high %v1159_v17, %v1163_v18  ;;  %v1179_v35 = vld [vmem:[#allocation8 + $0x160] sm:$0xff]  ;;  %v5840_v37 = vcombine.high %v1152_v31, %v1156_v32 }
  0xeb   :  { %v5862_v41 = vcombine.high %v1175_v34, %v1179_v35  ;;  %v6980_v2 = vld [vmem:[#allocation8 + $0x420] sm:$0xff] }
  0xec   :  { %1046 = vmatpush1.bf16.msra.mxu0 %v5777_v21  ;;  %v5837_v21 = vcombine.low %v1151_v9, %v1155_v10 }
  0xed   :  { %1047 = vmatprep.subr.bf16.mxu0 %v5786_v24  ;;  %1089 = vmatpush1.bf16.msra.mxu1 %v5779_v43  ;;  %v1148_v24 = vld [vmem:[#allocation8 + $0x68] sm:$0xff]  ;;  %v1187_v43 = vld [vmem:[#allocation8 + $0x1a0] sm:$0xff] }
  0xee   :  { %1090 = vmatprep.subr.bf16.mxu1 %v5788_v45  ;;  %v5832_v29 = vcombine.high %v1144_v23, %v1148_v24  ;;  %v5848_v45 = vcombine.high %v1160_v39, %v1164_v40  ;;  %v5870_v48 = vcombine.high %v1183_v42, %v1187_v43 }
  0xf0   :  { %1048 = vmatpush1.bf16.msra.mxu0 %v5785_v28  ;;  %v5823_v28 = vcombine.low %v1136_v14, %v1140_v15  ;;  %v1215_v15 = vld [vmem:[#allocation8 + $0x280] sm:$0xff] }
  0xf1   :  { %1049 = vmatprep.subr.bf16.mxu0 %v5794_v30  ;;  %1091 = vmatpush1.bf16.msra.mxu1 %v5787_v50  ;;  %v5845_v30 = vcombine.low %v1159_v17, %v1163_v18  ;;  %v5847_v50 = vcombine.low %v1160_v39, %v1164_v40  ;;  %v1239_v40 = vld [vmem:[#allocation8 + $0x340] sm:$0xff] }
  0xf2   :  { %1092 = vmatprep.subr.bf16.mxu1 %v5796_v52  ;;  %v5869_v52 = vcombine.low %v1183_v42, %v1187_v43 }
  0xf4   :  { %1050 = vmatpush1.bf16.msra.mxu0 %v5793_v36  ;;  %v5831_v36 = vcombine.low %v1144_v23, %v1148_v24  ;;  %v1223_v24 = vld [vmem:[#allocation8 + $0x2c0] sm:$0xff] }
  0xf5   :  { %1051 = vmatprep.subr.bf16.mxu0 %v5802_v38  ;;  %1093 = vmatpush1.bf16.msra.mxu1 %v5795_v58  ;;  %v5853_v38 = vcombine.low %v1167_v26, %v1171_v27 }
  0xf6   :  { %1094 = vmatprep.subr.bf16.mxu1 %v5804_v60  ;;  %v1184_v60 = vld [vmem:[#allocation8 + $0x188] sm:$0xff] }
  0xf7   :  { %v5872_v10 = vcombine.high %v1184_v60, %v1188_v61  ;;  %v5871_v17 = vcombine.low %v1184_v60, %v1188_v61  ;;  %v1244_v60 = vld [vmem:[#allocation8 + $0x368] sm:$0xff] }
  0xf8   :  { %1052 = vmatpush1.bf16.msra.mxu0 %v5801_v44  ;;  %v5839_v44 = vcombine.low %v1152_v31, %v1156_v32  ;;  %v1231_v32 = vld [vmem:[#allocation8 + $0x300] sm:$0xff] }
  0xf9   :  { %1053 = vmatprep.subr.bf16.mxu0 %v5810_v46  ;;  %1095 = vmatpush1.bf16.msra.mxu1 %v5803_v3  ;;  %v1168_v46 = vld [vmem:[#allocation8 + $0x108] sm:$0xff] }
  0xfa   :  { %1096 = vmatprep.subr.bf16.mxu1 %v5812_v4  ;;  %v5855_v58 = vcombine.low %v1168_v46, %v1172_v47  ;;  %v6982_v3 = vld [vmem:[#allocation8 + $0x408] sm:$0xff]  ;;  %v1207_v4 = vld [vmem:[#allocation8 + $0x240] sm:$0xff] }
  0xfb   :  { %v5951_v9 = vcombine.low %v6982_v3, %v6984_v6 }
  0xfc   :  { %1054 = vmatpush1.bf16.msra.mxu0 %v5809_v51  ;;  %v5856_v51 = vcombine.high %v1168_v46, %v1172_v47  ;;  %v1247_v47 = vld [vmem:[#allocation8 + $0x380] sm:$0xff] }
  0xfd   :  { %1055 = vmatprep.subr.bf16.mxu0 %v5818_v53  ;;  %1097 = vmatpush1.bf16.msra.mxu1 %v5811_v11  ;;  %v1176_v53 = vld [vmem:[#allocation8 + $0x148] sm:$0xff]  ;;  %v5885_v11 = vcombine.low %v1199_v56, %v1203_v57 }
  0xfe   :  { %1098 = vmatprep.subr.bf16.mxu1 %v5820_v12  ;;  %v5863_v7 = vcombine.low %v1176_v53, %v1180_v54  ;;  %v1192_v12 = vld [vmem:[#allocation8 + $0x1c8] sm:$0xff] }
 0x100   :  { %1056 = vmatpush1.bf16.msra.mxu0 %v5817_v59  ;;  %v5864_v59 = vcombine.high %v1176_v53, %v1180_v54  ;;  %v1255_v54 = vld [vmem:[#allocation8 + $0x3c0] sm:$0xff] }
 0x101   :  { %4249 = vmatprep.subr.bf16.mxu0 %v5822_v63  ;;  %1099 = vmatpush1.bf16.msra.mxu1 %v5819_v19  ;;  %v5886_v63 = vcombine.high %v1199_v56, %v1203_v57 }
 0x102   :  { %4421 = vmatprep.subr.bf16.mxu1 %v5824_v20  ;;  %v1200_v20 = vld [vmem:[#allocation8 + $0x208] sm:$0xff] }
 0x103   :  { %1058 = vmatmul.mubr.bf16.vlgmr.msra.gmra.mrb[4].mxu0 %v6970_v0 }
 0x104   :  { %4250 = vmatpush1.bf16.msra.mxu0 %v5821_v5  ;;  %1101 = vmatmul.mubr.bf16.vlgmr.msra.gmra.mrb[4].mxu1 %v6970_v0  ;;  %v5861_v0 = vcombine.low %v1175_v34, %v1179_v35  ;;  %v1211_v5 = vld [vmem:[#allocation8 + $0x260] sm:$0xff] }
 0x105   :  { %4251 = vmatprep.subr.bf16.mxu0 %v5830_v8  ;;  %4422 = vmatpush1.bf16.msra.mxu1 %v5823_v28  ;;  %v5949_v8 = vcombine.low %v6978_v1, %v6980_v2  ;;  %v5894_v14 = vcombine.high %v1207_v4, %v1211_v5  ;;  %v5893_v19 = vcombine.low %v1207_v4, %v1211_v5  ;;  %v1248_v5 = vld [vmem:[#allocation8 + $0x388] sm:$0xff] }
 0x106   :  { %4423 = vmatprep.subr.bf16.mxu1 %v5832_v29  ;;  %v1208_v29 = vld [vmem:[#allocation8 + $0x248] sm:$0xff] }
 0x108   :  { %4252 = vmatpush1.bf16.msra.mxu0 %v5829_v13  ;;  %v1196_v13 = vld [vmem:[#allocation8 + $0x1e8] sm:$0xff] }
 0x109   :  { %4253 = vmatprep.subr.bf16.mxu0 %v5838_v16  ;;  %4424 = vmatpush1.bf16.msra.mxu1 %v5831_v36  ;;  %v1219_v16 = vld [vmem:[#allocation8 + $0x2a0] sm:$0xff]  ;;  %v5880_v18 = vcombine.high %v1192_v12, %v1196_v13  ;;  %v5879_v26 = vcombine.low %v1192_v12, %v1196_v13  ;;  %v1256_v13 = vld [vmem:[#allocation8 + $0x3c8] sm:$0xff] }
 0x10a   :  { %4425 = vmatprep.subr.bf16.mxu1 %v5840_v37  ;;  %v5902_v23 = vcombine.high %v1215_v15, %v1219_v16  ;;  %v5901_v28 = vcombine.low %v1215_v15, %v1219_v16  ;;  %v1216_v37 = vld [vmem:[#allocation8 + $0x288] sm:$0xff] }
 0x10c   :  { %4254 = vmatpush1.bf16.msra.mxu0 %v5837_v21  ;;  %v1204_v21 = vld [vmem:[#allocation8 + $0x228] sm:$0xff] }
 0x10d   :  { %4255 = vmatprep.subr.bf16.mxu0 %v5846_v25  ;;  %4426 = vmatpush1.bf16.msra.mxu1 %v5839_v44  ;;  %v1227_v25 = vld [vmem:[#allocation8 + $0x2e0] sm:$0xff]  ;;  %v5888_v27 = vcombine.high %v1200_v20, %v1204_v21  ;;  %v5887_v34 = vcombine.low %v1200_v20, %v1204_v21 }
 0x10e   :  { %4427 = vmatprep.subr.bf16.mxu1 %v5848_v45  ;;  %v5910_v31 = vcombine.high %v1223_v24, %v1227_v25  ;;  %v5909_v36 = vcombine.low %v1223_v24, %v1227_v25  ;;  %v1224_v45 = vld [vmem:[#allocation8 + $0x2c8] sm:$0xff] }
 0x110   :  { %4256 = vmatpush1.bf16.msra.mxu0 %v5845_v30  ;;  %v1212_v30 = vld [vmem:[#allocation8 + $0x268] sm:$0xff] }
 0x111   :  { %4257 = vmatprep.subr.bf16.mxu0 %v5854_v33  ;;  %4428 = vmatpush1.bf16.msra.mxu1 %v5847_v50  ;;  %v1235_v33 = vld [vmem:[#allocation8 + $0x320] sm:$0xff]  ;;  %v5896_v35 = vcombine.high %v1208_v29, %v1212_v30  ;;  %v5895_v42 = vcombine.low %v1208_v29, %v1212_v30 }
 0x112   :  { %4429 = vmatprep.subr.bf16.mxu1 %v5856_v51  ;;  %v5918_v39 = vcombine.high %v1231_v32, %v1235_v33  ;;  %v5917_v44 = vcombine.low %v1231_v32, %v1235_v33  ;;  %v1232_v51 = vld [vmem:[#allocation8 + $0x308] sm:$0xff] }
 0x114   :  { %4258 = vmatpush1.bf16.msra.mxu0 %v5853_v38  ;;  %v1220_v38 = vld [vmem:[#allocation8 + $0x2a8] sm:$0xff] }
 0x115   :  { %4259 = vmatprep.subr.bf16.mxu0 %v5862_v41  ;;  %4430 = vmatpush1.bf16.msra.mxu1 %v5855_v58  ;;  %v1243_v41 = vld [vmem:[#allocation8 + $0x360] sm:$0xff]  ;;  %v5904_v43 = vcombine.high %v1216_v37, %v1220_v38  ;;  %v5903_v22 = vcombine.low %v1216_v37, %v1220_v38 }
 0x116   :  { %4431 = vmatprep.subr.bf16.mxu1 %v5864_v59  ;;  %v5926_v46 = vcombine.high %v1239_v40, %v1243_v41  ;;  %v5925_v50 = vcombine.low %v1239_v40, %v1243_v41  ;;  %v1240_v59 = vld [vmem:[#allocation8 + $0x348] sm:$0xff]  ;;  %v1271_v38 = vld [vmem:[#allocation8 + $0x440] sm:$0xff] }
 0x118   :  { %4260 = vmatpush1.bf16.msra.mxu0 %v5861_v0  ;;  %v1228_v0 = vld [vmem:[#allocation8 + $0x2e8] sm:$0xff] }
 0x119   :  { %4261 = vmatprep.subr.bf16.mxu0 %v5870_v48  ;;  %4432 = vmatpush1.bf16.msra.mxu1 %v5863_v7  ;;  %v1251_v48 = vld [vmem:[#allocation8 + $0x3a0] sm:$0xff]  ;;  %v5912_v49 = vcombine.high %v1224_v45, %v1228_v0  ;;  %v5911_v56 = vcombine.low %v1224_v45, %v1228_v0  ;;  %v1252_v7 = vld [vmem:[#allocation8 + $0x3a8] sm:$0xff] }
 0x11a   :  { %4433 = vmatprep.subr.bf16.mxu1 %v5872_v10  ;;  %v5934_v53 = vcombine.high %v1247_v47, %v1251_v48  ;;  %v5933_v58 = vcombine.low %v1247_v47, %v1251_v48  ;;  %v5950_v10 = vcombine.high %v6978_v1, %v6980_v2  ;;  %v5936_v12 = vcombine.high %v1248_v5, %v1252_v7 }
 0x11b   :  { %v5935_v15 = vcombine.low %v1248_v5, %v1252_v7  ;;  %v1292_v5 = vld [vmem:[#allocation8 + $0x4e8] sm:$0xff] }
 0x11c   :  { %4262 = vmatpush1.bf16.msra.mxu0 %v5869_v52  ;;  %v1236_v52 = vld [vmem:[#allocation8 + $0x328] sm:$0xff] }
 0x11d   :  { %4263 = vmatprep.subr.bf16.mxu0 %v5878_v55  ;;  %4434 = vmatpush1.bf16.msra.mxu1 %v5871_v17  ;;  %v1259_v55 = vld [vmem:[#allocation8 + $0x3e0] sm:$0xff]  ;;  %v5920_v57 = vcombine.high %v1232_v51, %v1236_v52 }
 0x11e   :  { %4435 = vmatprep.subr.bf16.mxu1 %v5880_v18  ;;  %v5942_v61 = vcombine.high %v1255_v54, %v1259_v55  ;;  %v5941_v4 = vcombine.low %v1255_v54, %v1259_v55  ;;  %v5952_v18 = vcombine.high %v6982_v3, %v6984_v6 }
 0x120   :  { %4264 = vmatpush1.bf16.msra.mxu0 %v5877_v62  ;;  %v5919_v62 = vcombine.low %v1232_v51, %v1236_v52  ;;  %v1280_v51 = vld [vmem:[#allocation8 + $0x488] sm:$0xff] }
 0x121   :  { %4265 = vmatprep.subr.bf16.mxu0 %v5886_v63  ;;  %4436 = vmatpush1.bf16.msra.mxu1 %v5879_v26  ;;  %v5928_v63 = vcombine.high %v1240_v59, %v1244_v60  ;;  %v1284_v52 = vld [vmem:[#allocation8 + $0x4a8] sm:$0xff] }
 0x122   :  { %4437 = vmatprep.subr.bf16.mxu1 %v5888_v27 }
 0x124   :  { %4266 = vmatpush1.bf16.msra.mxu0 %v5885_v11  ;;  %v5927_v11 = vcombine.low %v1240_v59, %v1244_v60  ;;  %v5968_v59 = vcombine.high %v1280_v51, %v1284_v52  ;;  %v1287_v60 = vld [vmem:[#allocation8 + $0x4c0] sm:$0xff] }
 0x125   :  { %4267 = vmatprep.subr.bf16.mxu0 %v5894_v14  ;;  %4438 = vmatpush1.bf16.msra.mxu1 %v5887_v34  ;;  %v1260_v14 = vld [vmem:[#allocation8 + $0x3e8] sm:$0xff] }
 0x126   :  { %4439 = vmatprep.subr.bf16.mxu1 %v5896_v35  ;;  %v5944_v16 = vcombine.high %v1256_v13, %v1260_v14  ;;  %v5943_v17 = vcombine.low %v1256_v13, %v1260_v14  ;;  %v1295_v13 = vld [vmem:[#allocation8 + $0x500] sm:$0xff] }
 0x128   :  { %4268 = vmatpush1.bf16.msra.mxu0 %v5893_v19  ;;  %v249_v19 = vlaneseq }
 0x129   :  { %4269 = vmatprep.subr.bf16.mxu0 %v5902_v23  ;;  %4440 = vmatpush1.bf16.msra.mxu1 %v5895_v42  ;;  %v6998_v23 = vld [vmem:[#allocation7] sm:$0xff]  ;;  %v1275_v42 = vld [vmem:[#allocation8 + $0x460] sm:$0xff] }
 0x12a   :  { %4441 = vmatprep.subr.bf16.mxu1 %v5904_v43  ;;  %v6995_v20 = vshrl.u32 %v249_v19, 7  ;;  %v1272_v43 = vld [vmem:[#allocation8 + $0x448] sm:$0xff]  ;;  %v5958_v47 = vcombine.high %v1271_v38, %v1275_v42  ;;  %v5957_v54 = vcombine.low %v1271_v38, %v1275_v42 }
 0x12b   :  { %v1312_v42 = vld [vmem:[#allocation8 + $0x588] sm:$0xff] }
 0x12c   :  { %4270 = vmatpush1.bf16.msra.mxu0 %v5901_v28  ;;  %v251_v21 = vsub.s32 0, %v6995_v20  ;;  %v255_v24 = vsub.s32 1, %v6995_v20  ;;  %v259_v35 = vsub.s32 2, %v6995_v20 }
 0x12d   :  { %4271 = vmatprep.subr.bf16.mxu0 %v5910_v31  ;;  %4442 = vmatpush1.bf16.msra.mxu1 %v5903_v22  ;;  %v1279_v22 = vld [vmem:[#allocation8 + $0x480] sm:$0xff] }
 0x12e   :  { %4443 = vmatprep.subr.bf16.mxu1 %v5912_v49  ;;  %v252_v25 = vrot.slane %v6998_v23, %v251_v21  ;;  %v256_v26 = vrot.slane %v6998_v23, %v255_v24 }
 0x130   :  { %4272 = vmatpush1.bf16.msra.mxu0 %v5909_v36 }
 0x131   :  { %4273 = vmatprep.subr.bf16.mxu0 %v5918_v39  ;;  %4444 = vmatpush1.bf16.msra.mxu1 %v5911_v56  ;;  %v263_v39 = vsub.s32 3, %v6995_v20 }
 0x132   :  { %4445 = vmatprep.subr.bf16.mxu1 %v5920_v57 }
 0x133   :  { %v264_v49 = vrot.slane %v6998_v23, %v263_v39 }
 0x134   :  { %4274 = vmatpush1.bf16.msra.mxu0 %v5917_v44  ;;  %v1276_v44 = vld [vmem:[#allocation8 + $0x468] sm:$0xff] }
 0x135   :  { %4275 = vmatprep.subr.bf16.mxu0 %v5926_v46  ;;  %4446 = vmatpush1.bf16.msra.mxu1 %v5919_v62  ;;  %v260_v46 = vrot.slane %v6998_v23, %v259_v35  ;;  %v5960_v48 = vcombine.high %v1272_v43, %v1276_v44  ;;  %v5959_v55 = vcombine.low %v1272_v43, %v1276_v44  ;;  %v1316_v43 = vld [vmem:[#allocation8 + $0x5a8] sm:$0xff] }
 0x136   :  { %4447 = vmatprep.subr.bf16.mxu1 %v5928_v63  ;;  %v1291_v63 = vld [vmem:[#allocation8 + $0x4e0] sm:$0xff] }
 0x138   :  { %4276 = vmatpush1.bf16.msra.mxu0 %v5925_v50  ;;  %v1283_v50 = vld [vmem:[#allocation8 + $0x4a0] sm:$0xff] }
 0x139   :  { %4277 = vmatprep.subr.bf16.mxu0 %v5934_v53  ;;  %4448 = vmatpush1.bf16.msra.mxu1 %v5927_v11  ;;  %v5965_v6 = vcombine.low %v1279_v22, %v1283_v50  ;;  %v5974_v11 = vcombine.high %v1287_v60, %v1291_v63 }
 0x13a   :  { %4449 = vmatprep.subr.bf16.mxu1 %v5936_v12 }
 0x13c   :  { %4278 = vmatpush1.bf16.msra.mxu0 %v5933_v58  ;;  %v5966_v58 = vcombine.high %v1279_v22, %v1283_v50  ;;  %v1319_v22 = vld [vmem:[#allocation8 + $0x5c0] sm:$0xff]  ;;  %v1320_v50 = vld [vmem:[#allocation8 + $0x5c8] sm:$0xff] }
 0x13d   :  { %4279 = vmatprep.subr.bf16.mxu0 %v5942_v61  ;;  %4450 = vmatpush1.bf16.msra.mxu1 %v5935_v15  ;;  %v1299_v15 = vld [vmem:[#allocation8 + $0x520] sm:$0xff] }
 0x13e   :  { %4451 = vmatprep.subr.bf16.mxu1 %v5944_v16  ;;  %v1296_v16 = vld [vmem:[#allocation8 + $0x508] sm:$0xff] }
 0x140   :  { %4280 = vmatpush1.bf16.msra.mxu0 %v5941_v4  ;;  %v1288_v4 = vld [vmem:[#allocation8 + $0x4c8] sm:$0xff] }
 0x141   :  { %4292 = vmatprep.subr.bf16.mxu0 %v5950_v10  ;;  %4452 = vmatpush1.bf16.msra.mxu1 %v5943_v17  ;;  %v5976_v12 = vcombine.high %v1288_v4, %v1292_v5  ;;  %v1300_v17 = vld [vmem:[#allocation8 + $0x528] sm:$0xff] }
 0x142   :  { %4464 = vmatprep.subr.bf16.mxu1 %v5952_v18 }
 0x196   :  { %v973_v27 = vpop.f32.mrb[0].mxu0  ;;  %v1016_v53 = vpop.f32.mrb[0].mxu1 }
 0x197   :  { %v974_v28 = vadd.f32 %v973_v27, %v252_v25  ;;  %v975_v29 = vpop.f32.mrb[1].mxu0  ;;  %v1017_v56 = vadd.f32 %v1016_v53, %v260_v46  ;;  %v1018_v57 = vpop.f32.mrb[1].mxu1  ;;  %v5975_v27 = vcombine.low %v1288_v4, %v1292_v5  ;;  %v5999_v53 = vcombine.low %v1312_v42, %v1316_v43  ;;  %v1335_v4 = vld [vmem:[#allocation8 + $0x640] sm:$0xff] }
 0x198   :  { %v976_v30 = vadd.f32 %v975_v29, %v256_v26  ;;  %v977_v31 = vpop.f32.mrb[2].mxu0  ;;  %v1019_v61 = vadd.f32 %v1018_v57, %v264_v49  ;;  %v1020_v62 = vpop.f32.mrb[2].mxu1  ;;  %v5984_v29 = vcombine.high %v1296_v16, %v1300_v17  ;;  %v1331_v57 = vld [vmem:[#allocation8 + $0x620] sm:$0xff] }
 0x199   :  { %v978_v32 = vadd.f32 %v977_v31, %v252_v25  ;;  %v979_v33 = vpop.f32.mrb[3].mxu0  ;;  %v1111_v36 = vmax.f32 %v974_v28, 0.0  ;;  %v1113_v1 = vmax.f32 %v1017_v56, 0.0  ;;  %v1021_v2 = vadd.f32 %v1020_v62, %v260_v46  ;;  %v1307_v31 = vld [vmem:[#allocation8 + $0x560] sm:$0xff] }
 0x19a   :  { %v980_v34 = vadd.f32 %v979_v33, %v256_v26  ;;  %v1112_v40 = vmax.f32 %v976_v30, 0.0  ;;  %v1114_v7 = vmax.f32 %v1019_v61, 0.0  ;;  %v5973_v26 = vcombine.low %v1287_v60, %v1291_v63  ;;  %v1303_v30 = vld [vmem:[#allocation8 + $0x540] sm:$0xff]  ;;  %v1308_v33 = vld [vmem:[#allocation8 + $0x568] sm:$0xff] }
 0x19b   :  { %v1119_v37 = vmax.f32 %v978_v32, 0.0  ;;  %v1121_v10 = vmax.f32 %v1021_v2, 0.0  ;;  %v5982_v28 = vcombine.high %v1295_v13, %v1299_v15  ;;  %v1304_v32 = vld [vmem:[#allocation8 + $0x548] sm:$0xff]  ;;  %v5989_v44 = vcombine.low %v1303_v30, %v1307_v31  ;;  %v1327_v56 = vld [vmem:[#allocation8 + $0x600] sm:$0xff] }
 0x19c   :  { %v1120_v41 = vmax.f32 %v980_v34, 0.0  ;;  %v5981_v34 = vcombine.low %v1295_v13, %v1299_v15  ;;  %v5992_v38 = vcombine.high %v1304_v32, %v1308_v33  ;;  %v5991_v46 = vcombine.low %v1304_v32, %v1308_v33  ;;  %v1339_v5 = vld [vmem:[#allocation8 + $0x660] sm:$0xff]  ;;  %v1340_v2 = vld [vmem:[#allocation8 + $0x668] sm:$0xff] }
 0x19d   :  { %v7009_v45 = vpack.c.bf16 %v1119_v37, %v1111_v36  ;;  %v7029_v18 = vpack.c.bf16 %v1121_v10, %v1113_v1  ;;  %v5983_v36 = vcombine.low %v1296_v16, %v1300_v17  ;;  %v5990_v37 = vcombine.high %v1303_v30, %v1307_v31  ;;  %v1336_v1 = vld [vmem:[#allocation8 + $0x648] sm:$0xff]  ;;  %v1347_v10 = vld [vmem:[#allocation8 + $0x6a0] sm:$0xff] }
 0x19e   :  { %v7011_v0 = vpack.c.bf16 %v1120_v41, %v1112_v40  ;;  %v1311_v40 = vld [vmem:[#allocation8 + $0x580] sm:$0xff]  ;;  %v6014_v62 = vcombine.high %v1327_v56, %v1331_v57  ;;  %v6021_v13 = vcombine.low %v1335_v4, %v1339_v5 }
 0x19f   :  { %v1315_v41 = vld [vmem:[#allocation8 + $0x5a0] sm:$0xff] }
 0x1a0   :  { %4281 = vmatprep.mubr.bf16.mxu0 %v7011_v0  ;;  %4453 = vmatprep.mubr.bf16.mxu1 %v7011_v0  ;;  %v1351_v17 = vld [vmem:[#allocation8 + $0x6c0] sm:$0xff] }
 0x1a1   :  { %4282 = vmatmul.mubr.bf16.vlgmr.msra.gmra.mrb[8].mxu0 %v7009_v45  ;;  %4454 = vmatmul.mubr.bf16.vlgmr.msra.gmra.mrb[8].mxu1 %v7009_v45  ;;  %v1359_v33 = vld [vmem:[#allocation8 + $0x700] sm:$0xff] }
 0x1a2   :  { %4293 = vmatpush1.bf16.msra.mxu0 %v5949_v8  ;;  %4465 = vmatpush1.bf16.msra.mxu1 %v5951_v9  ;;  %v1022_v8 = vpop.f32.mrb[3].mxu1  ;;  %v5967_v9 = vcombine.low %v1280_v51, %v1284_v52  ;;  %v1324_v51 = vld [vmem:[#allocation8 + $0x5e8] sm:$0xff]  ;;  %v5997_v52 = vcombine.low %v1311_v40, %v1315_v41 }
 0x1a3   :  { %4294 = vmatprep.subr.bf16.mxu0 %v5958_v47  ;;  %4466 = vmatprep.subr.bf16.mxu1 %v5960_v48  ;;  %v1023_v3 = vadd.f32 %v1022_v8, %v264_v49  ;;  %v5998_v47 = vcombine.high %v1311_v40, %v1315_v41  ;;  %v6000_v48 = vcombine.high %v1312_v42, %v1316_v43  ;;  %v1323_v49 = vld [vmem:[#allocation8 + $0x5e0] sm:$0xff] }
 0x1a4   :  { %v6005_v60 = vcombine.low %v1319_v22, %v1323_v49  ;;  %v6007_v61 = vcombine.low %v1320_v50, %v1324_v51  ;;  %v6013_v8 = vcombine.low %v1327_v56, %v1331_v57  ;;  %v1367_v43 = vld [vmem:[#allocation8 + $0x740] sm:$0xff]  ;;  %v271_v56 = vsub.s32 5, %v6995_v20 }
 0x1a5   :  { %v1122_v14 = vmax.f32 %v1023_v3, 0.0  ;;  %v6022_v3 = vcombine.high %v1335_v4, %v1339_v5  ;;  %v1384_v4 = vld [vmem:[#allocation8 + $0x7c8] sm:$0xff] }
 0x1a6   :  { %4295 = vmatpush1.bf16.msra.mxu0 %v5957_v54  ;;  %4467 = vmatpush1.bf16.msra.mxu1 %v5959_v55  ;;  %v6006_v54 = vcombine.high %v1319_v22, %v1323_v49  ;;  %v6008_v55 = vcombine.high %v1320_v50, %v1324_v51  ;;  %v1375_v51 = vld [vmem:[#allocation8 + $0x780] sm:$0xff]  ;;  %v1388_v5 = vld [vmem:[#allocation8 + $0x7e8] sm:$0xff] }
 0x1a7   :  { %4296 = vmatprep.subr.bf16.mxu0 %v5966_v58  ;;  %4468 = vmatprep.subr.bf16.mxu1 %v5968_v59  ;;  %v7031_v25 = vpack.c.bf16 %v1122_v14, %v1114_v7  ;;  %v1328_v58 = vld [vmem:[#allocation8 + $0x608] sm:$0xff]  ;;  %v6023_v14 = vcombine.low %v1336_v1, %v1340_v2 }
 0x1a8   :  { %v1332_v59 = vld [vmem:[#allocation8 + $0x628] sm:$0xff] }
 0x1a9   :  { %4324 = vmatprep.mubr.bf16.mxu0 %v7031_v25  ;;  %4496 = vmatprep.mubr.bf16.mxu1 %v7031_v25  ;;  %v6016_v63 = vcombine.high %v1328_v58, %v1332_v59  ;;  %v6015_v7 = vcombine.low %v1328_v58, %v1332_v59 }
 0x1aa   :  { %4297 = vmatpush1.bf16.msra.mxu0 %v5965_v6  ;;  %4469 = vmatpush1.bf16.msra.mxu1 %v5967_v9  ;;  %v6024_v6 = vcombine.high %v1336_v1, %v1340_v2  ;;  %v1343_v9 = vld [vmem:[#allocation8 + $0x680] sm:$0xff]  ;;  %v272_v1 = vrot.slane %v6998_v23, %v271_v56 }
 0x1ab   :  { %4298 = vmatprep.subr.bf16.mxu0 %v5974_v11  ;;  %4470 = vmatprep.subr.bf16.mxu1 %v5976_v12  ;;  %v1344_v11 = vld [vmem:[#allocation8 + $0x688] sm:$0xff]  ;;  %v6030_v15 = vcombine.high %v1343_v9, %v1347_v10 }
 0x1ac   :  { %v1348_v12 = vld [vmem:[#allocation8 + $0x6a8] sm:$0xff] }
 0x1ad   :  { %v6032_v16 = vcombine.high %v1344_v11, %v1348_v12  ;;  %v6031_v30 = vcombine.low %v1344_v11, %v1348_v12  ;;  %v1395_v12 = vld [vmem:[#allocation8 + $0x820] sm:$0xff] }
 0x1ae   :  { %4299 = vmatpush1.bf16.msra.mxu0 %v5973_v26  ;;  %4471 = vmatpush1.bf16.msra.mxu1 %v5975_v27  ;;  %v1355_v26 = vld [vmem:[#allocation8 + $0x6e0] sm:$0xff]  ;;  %v1352_v27 = vld [vmem:[#allocation8 + $0x6c8] sm:$0xff] }
 0x1af   :  { %4300 = vmatprep.subr.bf16.mxu0 %v5982_v28  ;;  %4472 = vmatprep.subr.bf16.mxu1 %v5984_v29  ;;  %v1356_v28 = vld [vmem:[#allocation8 + $0x6e8] sm:$0xff]  ;;  %v6029_v29 = vcombine.low %v1343_v9, %v1347_v10  ;;  %v6038_v31 = vcombine.high %v1351_v17, %v1355_v26  ;;  %v1391_v9 = vld [vmem:[#allocation8 + $0x800] sm:$0xff] }
 0x1b0   :  { %v6040_v32 = vcombine.high %v1352_v27, %v1356_v28  ;;  %v6039_v40 = vcombine.low %v1352_v27, %v1356_v28 }
 0x1b2   :  { %4301 = vmatpush1.bf16.msra.mxu0 %v5981_v34  ;;  %4473 = vmatpush1.bf16.msra.mxu1 %v5983_v36  ;;  %v1363_v34 = vld [vmem:[#allocation8 + $0x720] sm:$0xff]  ;;  %v1360_v36 = vld [vmem:[#allocation8 + $0x708] sm:$0xff] }
 0x1b3   :  { %4302 = vmatprep.subr.bf16.mxu0 %v5990_v37  ;;  %4474 = vmatprep.subr.bf16.mxu1 %v5992_v38  ;;  %v1364_v37 = vld [vmem:[#allocation8 + $0x728] sm:$0xff]  ;;  %v6037_v38 = vcombine.low %v1351_v17, %v1355_v26  ;;  %v6046_v41 = vcombine.high %v1359_v33, %v1363_v34 }
 0x1b4   :  { %v6048_v42 = vcombine.high %v1360_v36, %v1364_v37  ;;  %v6047_v22 = vcombine.low %v1360_v36, %v1364_v37  ;;  %v1399_v36 = vld [vmem:[#allocation8 + $0x840] sm:$0xff] }
 0x1b6   :  { %4303 = vmatpush1.bf16.msra.mxu0 %v5989_v44  ;;  %4475 = vmatpush1.bf16.msra.mxu1 %v5991_v46  ;;  %v1371_v44 = vld [vmem:[#allocation8 + $0x760] sm:$0xff]  ;;  %v1368_v46 = vld [vmem:[#allocation8 + $0x748] sm:$0xff] }
 0x1b7   :  { %4304 = vmatprep.subr.bf16.mxu0 %v5998_v47  ;;  %4476 = vmatprep.subr.bf16.mxu1 %v6000_v48  ;;  %v1372_v47 = vld [vmem:[#allocation8 + $0x768] sm:$0xff]  ;;  %v6045_v48 = vcombine.low %v1359_v33, %v1363_v34  ;;  %v6054_v49 = vcombine.high %v1367_v43, %v1371_v44  ;;  %v6053_v57 = vcombine.low %v1367_v43, %v1371_v44 }
 0x1b8   :  { %v6056_v50 = vcombine.high %v1368_v46, %v1372_v47  ;;  %v6055_v58 = vcombine.low %v1368_v46, %v1372_v47  ;;  %v6078_v33 = vcombine.high %v1391_v9, %v1395_v12  ;;  %v6077_v44 = vcombine.low %v1391_v9, %v1395_v12 }
 0x1ba   :  { %4305 = vmatpush1.bf16.msra.mxu0 %v5997_v52  ;;  %4477 = vmatpush1.bf16.msra.mxu1 %v5999_v53  ;;  %v267_v52 = vsub.s32 4, %v6995_v20  ;;  %v1379_v53 = vld [vmem:[#allocation8 + $0x7a0] sm:$0xff] }
 0x1bb   :  { %4306 = vmatprep.subr.bf16.mxu0 %v6006_v54  ;;  %4478 = vmatprep.subr.bf16.mxu1 %v6008_v55  ;;  %v1376_v54 = vld [vmem:[#allocation8 + $0x788] sm:$0xff]  ;;  %v6062_v59 = vcombine.high %v1375_v51, %v1379_v53  ;;  %v6061_v2 = vcombine.low %v1375_v51, %v1379_v53  ;;  %v1407_v51 = vld [vmem:[#allocation8 + $0x880] sm:$0xff] }
 0x1bc   :  { %v1380_v55 = vld [vmem:[#allocation8 + $0x7a8] sm:$0xff] }
 0x1be   :  { %4307 = vmatpush1.bf16.msra.mxu0 %v6005_v60  ;;  %4479 = vmatpush1.bf16.msra.mxu1 %v6007_v61  ;;  %v6064_v60 = vcombine.high %v1376_v54, %v1380_v55  ;;  %v1383_v61 = vld [vmem:[#allocation8 + $0x7c0] sm:$0xff] }
 0x1bf   :  { %4308 = vmatprep.subr.bf16.mxu0 %v6014_v62  ;;  %4480 = vmatprep.subr.bf16.mxu1 %v6016_v63  ;;  %v268_v62 = vrot.slane %v6998_v23, %v267_v52  ;;  %v1387_v63 = vld [vmem:[#allocation8 + $0x7e0] sm:$0xff] }
 0x1c0   :  { %v6069_v17 = vcombine.low %v1383_v61, %v1387_v63 }
 0x1c2   :  { %4309 = vmatpush1.bf16.msra.mxu0 %v6013_v8  ;;  %4481 = vmatpush1.bf16.msra.mxu1 %v6015_v7  ;;  %v6063_v8 = vcombine.low %v1376_v54, %v1380_v55  ;;  %v1411_v54 = vld [vmem:[#allocation8 + $0x8a0] sm:$0xff]  ;;  %v1408_v55 = vld [vmem:[#allocation8 + $0x888] sm:$0xff] }
 0x1c3   :  { %4310 = vmatprep.subr.bf16.mxu0 %v6022_v3  ;;  %4482 = vmatprep.subr.bf16.mxu1 %v6024_v6  ;;  %v6070_v3 = vcombine.high %v1383_v61, %v1387_v63  ;;  %v6072_v6 = vcombine.high %v1384_v4, %v1388_v5  ;;  %v6094_v63 = vcombine.high %v1407_v51, %v1411_v54 }
 0x1c4   :  { %v6093_v12 = vcombine.low %v1407_v51, %v1411_v54  ;;  %v1443_v51 = vld [vmem:[#allocation8 + $0x9a0] sm:$0xff]  ;;  %v1444_v54 = vld [vmem:[#allocation8 + $0x9a8] sm:$0xff] }
 0x1c6   :  { %4311 = vmatpush1.bf16.msra.mxu0 %v6021_v13  ;;  %4483 = vmatpush1.bf16.msra.mxu1 %v6023_v14  ;;  %v1392_v13 = vld [vmem:[#allocation8 + $0x808] sm:$0xff] }
 0x1c7   :  { %4312 = vmatprep.subr.bf16.mxu0 %v6030_v15  ;;  %4484 = vmatprep.subr.bf16.mxu1 %v6032_v16  ;;  %v1396_v14 = vld [vmem:[#allocation8 + $0x828] sm:$0xff] }
 0x1c8   :  { %v6080_v34 = vcombine.high %v1392_v13, %v1396_v14  ;;  %v6079_v47 = vcombine.low %v1392_v13, %v1396_v14 }
 0x1ca   :  { %4313 = vmatpush1.bf16.msra.mxu0 %v6029_v29  ;;  %4485 = vmatpush1.bf16.msra.mxu1 %v6031_v30  ;;  %v6071_v29 = vcombine.low %v1384_v4, %v1388_v5  ;;  %v1415_v5 = vld [vmem:[#allocation8 + $0x8c0] sm:$0xff] }
 0x1cb   :  { %4314 = vmatprep.subr.bf16.mxu0 %v6038_v31  ;;  %4486 = vmatprep.subr.bf16.mxu1 %v6040_v32  ;;  %v275_v32 = vsub.s32 6, %v6995_v20 }
 0x1ce   :  { %4315 = vmatpush1.bf16.msra.mxu0 %v6037_v38  ;;  %4487 = vmatpush1.bf16.msra.mxu1 %v6039_v40  ;;  %v279_v38 = vsub.s32 7, %v6995_v20  ;;  %v1403_v40 = vld [vmem:[#allocation8 + $0x860] sm:$0xff] }
 0x1cf   :  { %4316 = vmatprep.subr.bf16.mxu0 %v6046_v41  ;;  %4488 = vmatprep.subr.bf16.mxu1 %v6048_v42  ;;  %v1400_v41 = vld [vmem:[#allocation8 + $0x848] sm:$0xff] }
 0x1d0   :  { %v1404_v42 = vld [vmem:[#allocation8 + $0x868] sm:$0xff]  ;;  %v280_v53 = vrot.slane %v6998_v23, %v279_v38 }
 0x1d2   :  { %4317 = vmatpush1.bf16.msra.mxu0 %v6045_v48  ;;  %4489 = vmatpush1.bf16.msra.mxu1 %v6047_v22  ;;  %v276_v22 = vrot.slane %v6998_v23, %v275_v32 }
 0x1d3   :  { %4318 = vmatprep.subr.bf16.mxu0 %v6054_v49  ;;  %4490 = vmatprep.subr.bf16.mxu1 %v6056_v50  ;;  %v6086_v49 = vcombine.high %v1399_v36, %v1403_v40  ;;  %v6088_v50 = vcombine.high %v1400_v41, %v1404_v42 }
 0x1d6   :  { %4319 = vmatpush1.bf16.msra.mxu0 %v6053_v57  ;;  %4491 = vmatpush1.bf16.msra.mxu1 %v6055_v58  ;;  %v1059_v7 = vpop.f32.mrb[4].mxu0  ;;  %v1412_v57 = vld [vmem:[#allocation8 + $0x8a8] sm:$0xff] }
 0x1d7   :  { %4320 = vmatprep.subr.bf16.mxu0 %v6062_v59  ;;  %4492 = vmatprep.subr.bf16.mxu1 %v6064_v60  ;;  %v1060_v10 = vadd.f32 %v1059_v7, %v268_v62  ;;  %v1061_v11 = vpop.f32.mrb[5].mxu0  ;;  %v1102_v58 = vpop.f32.mrb[4].mxu1  ;;  %v6085_v59 = vcombine.low %v1399_v36, %v1403_v40  ;;  %v6087_v60 = vcombine.low %v1400_v41, %v1404_v42  ;;  %v1420_v7 = vld [vmem:[#allocation8 + $0x8e8] sm:$0xff]  ;;  %v1431_v40 = vld [vmem:[#allocation8 + $0x940] sm:$0xff] }
 0x1d8   :  { %v1062_v15 = vadd.f32 %v1061_v11, %v272_v1  ;;  %v1063_v16 = vpop.f32.mrb[6].mxu0  ;;  %v1103_v61 = vadd.f32 %v1102_v58, %v276_v22  ;;  %v6096_v4 = vcombine.high %v1408_v55, %v1412_v57  ;;  %v6095_v13 = vcombine.low %v1408_v55, %v1412_v57  ;;  %v1435_v41 = vld [vmem:[#allocation8 + $0x960] sm:$0xff]  ;;  %v1432_v42 = vld [vmem:[#allocation8 + $0x948] sm:$0xff] }
 0x1d9   :  { %v1115_v26 = vmax.f32 %v1060_v10, 0.0  ;;  %v1064_v27 = vadd.f32 %v1063_v16, %v268_v62  ;;  %v1065_v28 = vpop.f32.mrb[7].mxu0  ;;  %v1104_v62 = vpop.f32.mrb[5].mxu1  ;;  %v6117_v55 = vcombine.low %v1431_v40, %v1435_v41 }
 0x1da   :  { %4321 = vmatpush1.bf16.msra.mxu0 %v6061_v2  ;;  %4493 = vmatpush1.bf16.msra.mxu1 %v6063_v8  ;;  %v1116_v30 = vmax.f32 %v1062_v15, 0.0  ;;  %v1066_v31 = vadd.f32 %v1065_v28, %v272_v1  ;;  %v1105_v23 = vadd.f32 %v1104_v62, %v280_v53  ;;  %v1106_v1 = vpop.f32.mrb[6].mxu1  ;;  %v1419_v2 = vld [vmem:[#allocation8 + $0x8e0] sm:$0xff]  ;;  %v1416_v8 = vld [vmem:[#allocation8 + $0x8c8] sm:$0xff] }
 0x1db   :  { %4322 = vmatprep.subr.bf16.mxu0 %v6070_v3  ;;  %4494 = vmatprep.subr.bf16.mxu1 %v6072_v6  ;;  %v1123_v37 = vmax.f32 %v1064_v27, 0.0  ;;  %v1117_v3 = vmax.f32 %v1103_v61, 0.0  ;;  %v1107_v6 = vadd.f32 %v1106_v1, %v276_v22  ;;  %v1108_v9 = vpop.f32.mrb[7].mxu1  ;;  %v6102_v15 = vcombine.high %v1415_v5, %v1419_v2  ;;  %v1427_v27 = vld [vmem:[#allocation8 + $0x920] sm:$0xff]  ;;  %v1424_v28 = vld [vmem:[#allocation8 + $0x908] sm:$0xff] }
 0x1dc   :  { %v1124_v43 = vmax.f32 %v1066_v31, 0.0  ;;  %v1118_v10 = vmax.f32 %v1105_v23, 0.0  ;;  %v1109_v11 = vadd.f32 %v1108_v9, %v280_v53  ;;  %v6104_v16 = vcombine.high %v1416_v8, %v1420_v7  ;;  %v1440_v53 = vld [vmem:[#allocation8 + $0x988] sm:$0xff]  ;;  %v1451_v61 = vld [vmem:[#allocation8 + $0x9e0] sm:$0xff] }
 0x1dd   :  { %v7045_v46 = vpack.c.bf16 %v1123_v37, %v1115_v26  ;;  %v1125_v14 = vmax.f32 %v1107_v6, 0.0  ;;  %v6118_v22 = vcombine.high %v1431_v40, %v1435_v41  ;;  %v1448_v62 = vld [vmem:[#allocation8 + $0x9c8] sm:$0xff] }
 0x1de   :  { %4323 = vmatpush1.bf16.msra.mxu0 %v6069_v17  ;;  %4495 = vmatpush1.bf16.msra.mxu1 %v6071_v29  ;;  %v7047_v48 = vpack.c.bf16 %v1124_v43, %v1116_v30  ;;  %v1423_v17 = vld [vmem:[#allocation8 + $0x900] sm:$0xff]  ;;  %v1126_v26 = vmax.f32 %v1109_v11, 0.0  ;;  %v1428_v29 = vld [vmem:[#allocation8 + $0x928] sm:$0xff] }
 0x1df   :  { %4335 = vmatprep.subr.bf16.mxu0 %v6078_v33  ;;  %4507 = vmatprep.subr.bf16.mxu1 %v6080_v34  ;;  %v7059_v30 = vpack.c.bf16 %v1125_v14, %v1117_v3  ;;  %v6101_v33 = vcombine.low %v1415_v5, %v1419_v2  ;;  %v6103_v34 = vcombine.low %v1416_v8, %v1420_v7  ;;  %v1436_v43 = vld [vmem:[#allocation8 + $0x968] sm:$0xff]  ;;  %v1455_v2 = vld [vmem:[#allocation8 + $0xa00] sm:$0xff] }
 0x1e0   :  { %v7061_v31 = vpack.c.bf16 %v1126_v26, %v1118_v10  ;;  %v6110_v36 = vcombine.high %v1423_v17, %v1427_v27  ;;  %v6112_v37 = vcombine.high %v1424_v28, %v1428_v29  ;;  %v6119_v57 = vcombine.low %v1432_v42, %v1436_v43  ;;  %v1459_v8 = vld [vmem:[#allocation8 + $0xa20] sm:$0xff]  ;;  %v1456_v7 = vld [vmem:[#allocation8 + $0xa08] sm:$0xff] }
 0x1e1   :  { %4325 = vmatmul.mubr.bf16.vlgmr.msra.gmra.mrb[8].mxu0 %v7029_v18  ;;  %4497 = vmatmul.mubr.bf16.vlgmr.msra.gmra.mrb[8].mxu1 %v7029_v18  ;;  %v6127_v5 = vcombine.low %v1440_v53, %v1444_v54  ;;  %v1460_v3 = vld [vmem:[#allocation8 + $0xa28] sm:$0xff]  ;;  %v6142_v10 = vcombine.high %v1455_v2, %v1459_v8 }
 0x1e2   :  { %4336 = vmatpush1.bf16.msra.mxu0 %v6077_v44  ;;  %4508 = vmatpush1.bf16.msra.mxu1 %v6079_v47  ;;  %v6109_v44 = vcombine.low %v1423_v17, %v1427_v27  ;;  %v6111_v47 = vcombine.low %v1424_v28, %v1428_v29  ;;  %v6144_v11 = vcombine.high %v1456_v7, %v1460_v3  ;;  %v1464_v14 = vld [vmem:[#allocation8 + $0xa48] sm:$0xff]  ;;  %v1471_v28 = vld [vmem:[#allocation8 + $0xa80] sm:$0xff] }
 0x1e3   :  { %4337 = vmatprep.subr.bf16.mxu0 %v6086_v49  ;;  %4509 = vmatprep.subr.bf16.mxu1 %v6088_v50  ;;  %v6120_v49 = vcombine.high %v1432_v42, %v1436_v43  ;;  %v1439_v50 = vld [vmem:[#allocation8 + $0x980] sm:$0xff]  ;;  %v6143_v17 = vcombine.low %v1456_v7, %v1460_v3 }
 0x1e4   :  { %4367 = vmatprep.mubr.bf16.mxu0 %v7047_v48  ;;  %4539 = vmatprep.mubr.bf16.mxu1 %v7047_v48  ;;  %v6126_v58 = vcombine.high %v1439_v50, %v1443_v51  ;;  %v1475_v29 = vld [vmem:[#allocation8 + $0xaa0] sm:$0xff] }
 0x1e5   :  { %v6158_v40 = vcombine.high %v1471_v28, %v1475_v29  ;;  %v1479_v42 = vld [vmem:[#allocation8 + $0xac0] sm:$0xff] }
 0x1e6   :  { %4338 = vmatpush1.bf16.msra.mxu0 %v6085_v59  ;;  %4510 = vmatpush1.bf16.msra.mxu1 %v6087_v60  ;;  %v6128_v59 = vcombine.high %v1440_v53, %v1444_v54  ;;  %v1447_v60 = vld [vmem:[#allocation8 + $0x9c0] sm:$0xff] }
 0x1e7   :  { %4339 = vmatprep.subr.bf16.mxu0 %v6094_v63  ;;  %4511 = vmatprep.subr.bf16.mxu1 %v6096_v4  ;;  %v1452_v63 = vld [vmem:[#allocation8 + $0x9e8] sm:$0xff]  ;;  %v6125_v4 = vcombine.low %v1439_v50, %v1443_v51  ;;  %v6134_v23 = vcombine.high %v1447_v60, %v1451_v61  ;;  %v6133_v6 = vcombine.low %v1447_v60, %v1451_v61  ;;  %v1483_v43 = vld [vmem:[#allocation8 + $0xae0] sm:$0xff] }
 0x1e8   :  { %v6136_v1 = vcombine.high %v1448_v62, %v1452_v63  ;;  %v6135_v9 = vcombine.low %v1448_v62, %v1452_v63  ;;  %v6166_v50 = vcombine.high %v1479_v42, %v1483_v43  ;;  %v1487_v53 = vld [vmem:[#allocation8 + $0xb00] sm:$0xff] }
 0x1e9   :  { %v1491_v54 = vld [vmem:[#allocation8 + $0xb20] sm:$0xff] }
 0x1ea   :  { %4340 = vmatpush1.bf16.msra.mxu0 %v6093_v12  ;;  %4512 = vmatpush1.bf16.msra.mxu1 %v6095_v13  ;;  %v1463_v12 = vld [vmem:[#allocation8 + $0xa40] sm:$0xff]  ;;  %v6174_v60 = vcombine.high %v1487_v53, %v1491_v54 }
 0x1eb   :  { %4341 = vmatprep.subr.bf16.mxu0 %v6102_v15  ;;  %4513 = vmatprep.subr.bf16.mxu1 %v6104_v16  ;;  %v1467_v13 = vld [vmem:[#allocation8 + $0xa60] sm:$0xff]  ;;  %v1468_v15 = vld [vmem:[#allocation8 + $0xa68] sm:$0xff]  ;;  %v6141_v16 = vcombine.low %v1455_v2, %v1459_v8 }
 0x1ec   :  { %v6150_v26 = vcombine.high %v1463_v12, %v1467_v13  ;;  %v6152_v27 = vcombine.high %v1464_v14, %v1468_v15  ;;  %v1495_v62 = vld [vmem:[#allocation8 + $0xb40] sm:$0xff] }
 0x1ed   :  { %v1499_v63 = vld [vmem:[#allocation8 + $0xb60] sm:$0xff] }
 0x1ee   :  { %4342 = vmatpush1.bf16.msra.mxu0 %v6101_v33  ;;  %4514 = vmatpush1.bf16.msra.mxu1 %v6103_v34  ;;  %v1472_v33 = vld [vmem:[#allocation8 + $0xa88] sm:$0xff]  ;;  %v6182_v2 = vcombine.high %v1495_v62, %v1499_v63  ;;  %v1503_v7 = vld [vmem:[#allocation8 + $0xb80] sm:$0xff] }
 0x1ef   :  { %4343 = vmatprep.subr.bf16.mxu0 %v6110_v36  ;;  %4515 = vmatprep.subr.bf16.mxu1 %v6112_v37  ;;  %v1476_v34 = vld [vmem:[#allocation8 + $0xaa8] sm:$0xff]  ;;  %v6149_v36 = vcombine.low %v1463_v12, %v1467_v13  ;;  %v6151_v37 = vcombine.low %v1464_v14, %v1468_v15  ;;  %v1507_v3 = vld [vmem:[#allocation8 + $0xba0] sm:$0xff] }
 0x1f0   :  { %v6160_v41 = vcombine.high %v1472_v33, %v1476_v34  ;;  %v6190_v12 = vcombine.high %v1503_v7, %v1507_v3  ;;  %v1511_v14 = vld [vmem:[#allocation8 + $0xbc0] sm:$0xff] }
 0x1f1   :  { %v1515_v15 = vld [vmem:[#allocation8 + $0xbe0] sm:$0xff] }
 0x1f2   :  { %4344 = vmatpush1.bf16.msra.mxu0 %v6109_v44  ;;  %4516 = vmatpush1.bf16.msra.mxu1 %v6111_v47  ;;  %v1480_v44 = vld [vmem:[#allocation8 + $0xac8] sm:$0xff] }
 0x1f3   :  { %4345 = vmatprep.subr.bf16.mxu0 %v6118_v22  ;;  %4517 = vmatprep.subr.bf16.mxu1 %v6120_v49  ;;  %v1484_v47 = vld [vmem:[#allocation8 + $0xae8] sm:$0xff]  ;;  %v6157_v22 = vcombine.low %v1471_v28, %v1475_v29  ;;  %v6159_v49 = vcombine.low %v1472_v33, %v1476_v34  ;;  %v6198_v28 = vcombine.high %v1511_v14, %v1515_v15  ;;  %v1519_v33 = vld [vmem:[#allocation8 + $0xc00] sm:$0xff] }
 0x1f4   :  { %v6168_v51 = vcombine.high %v1480_v44, %v1484_v47  ;;  %v1523_v34 = vld [vmem:[#allocation8 + $0xc20] sm:$0xff] }
 0x1f6   :  { %4346 = vmatpush1.bf16.msra.mxu0 %v6117_v55  ;;  %4518 = vmatpush1.bf16.msra.mxu1 %v6119_v57  ;;  %v1488_v55 = vld [vmem:[#allocation8 + $0xb08] sm:$0xff] }
 0x1f7   :  { %4347 = vmatprep.subr.bf16.mxu0 %v6126_v58  ;;  %4519 = vmatprep.subr.bf16.mxu1 %v6128_v59  ;;  %v1492_v57 = vld [vmem:[#allocation8 + $0xb28] sm:$0xff]  ;;  %v6165_v58 = vcombine.low %v1479_v42, %v1483_v43  ;;  %v6167_v59 = vcombine.low %v1480_v44, %v1484_v47  ;;  %v6206_v42 = vcombine.high %v1519_v33, %v1523_v34  ;;  %v1527_v44 = vld [vmem:[#allocation8 + $0xc40] sm:$0xff] }
 0x1f8   :  { %v6176_v61 = vcombine.high %v1488_v55, %v1492_v57  ;;  %v1531_v47 = vld [vmem:[#allocation8 + $0xc60] sm:$0xff] }
 0x1fa   :  { %4348 = vmatpush1.bf16.msra.mxu0 %v6125_v4  ;;  %4520 = vmatpush1.bf16.msra.mxu1 %v6127_v5  ;;  %v1496_v4 = vld [vmem:[#allocation8 + $0xb48] sm:$0xff] }
 0x1fb   :  { %4349 = vmatprep.subr.bf16.mxu0 %v6134_v23  ;;  %4521 = vmatprep.subr.bf16.mxu1 %v6136_v1  ;;  %v1500_v5 = vld [vmem:[#allocation8 + $0xb68] sm:$0xff]  ;;  %v6173_v23 = vcombine.low %v1487_v53, %v1491_v54  ;;  %v6175_v1 = vcombine.low %v1488_v55, %v1492_v57  ;;  %v6214_v53 = vcombine.high %v1527_v44, %v1531_v47  ;;  %v1535_v55 = vld [vmem:[#allocation8 + $0xc80] sm:$0xff] }
 0x1fc   :  { %v6184_v8 = vcombine.high %v1496_v4, %v1500_v5  ;;  %v1539_v57 = vld [vmem:[#allocation8 + $0xca0] sm:$0xff] }
 0x1fe   :  { %4350 = vmatpush1.bf16.msra.mxu0 %v6133_v6  ;;  %4522 = vmatpush1.bf16.msra.mxu1 %v6135_v9  ;;  %v1504_v6 = vld [vmem:[#allocation8 + $0xb88] sm:$0xff] }
 0x1ff   :  { %4351 = vmatprep.subr.bf16.mxu0 %v6142_v10  ;;  %4523 = vmatprep.subr.bf16.mxu1 %v6144_v11  ;;  %v1508_v9 = vld [vmem:[#allocation8 + $0xba8] sm:$0xff]  ;;  %v6181_v10 = vcombine.low %v1495_v62, %v1499_v63  ;;  %v6183_v11 = vcombine.low %v1496_v4, %v1500_v5  ;;  %v6222_v62 = vcombine.high %v1535_v55, %v1539_v57  ;;  %v1543_v4 = vld [vmem:[#allocation8 + $0xcc0] sm:$0xff] }
 0x200   :  { %v6192_v13 = vcombine.high %v1504_v6, %v1508_v9  ;;  %v1547_v5 = vld [vmem:[#allocation8 + $0xce0] sm:$0xff] }
 0x202   :  { %4352 = vmatpush1.bf16.msra.mxu0 %v6141_v16  ;;  %4524 = vmatpush1.bf16.msra.mxu1 %v6143_v17  ;;  %v1512_v16 = vld [vmem:[#allocation8 + $0xbc8] sm:$0xff] }
 0x203   :  { %4353 = vmatprep.subr.bf16.mxu0 %v6150_v26  ;;  %4525 = vmatprep.subr.bf16.mxu1 %v6152_v27  ;;  %v1516_v17 = vld [vmem:[#allocation8 + $0xbe8] sm:$0xff]  ;;  %v6189_v26 = vcombine.low %v1503_v7, %v1507_v3  ;;  %v6191_v27 = vcombine.low %v1504_v6, %v1508_v9  ;;  %v6230_v7 = vcombine.high %v1543_v4, %v1547_v5  ;;  %v1551_v6 = vld [vmem:[#allocation8 + $0xd00] sm:$0xff] }
 0x204   :  { %v6200_v29 = vcombine.high %v1512_v16, %v1516_v17  ;;  %v1555_v9 = vld [vmem:[#allocation8 + $0xd20] sm:$0xff] }
 0x206   :  { %4354 = vmatpush1.bf16.msra.mxu0 %v6149_v36  ;;  %4526 = vmatpush1.bf16.msra.mxu1 %v6151_v37  ;;  %v1520_v36 = vld [vmem:[#allocation8 + $0xc08] sm:$0xff] }
 0x207   :  { %4355 = vmatprep.subr.bf16.mxu0 %v6158_v40  ;;  %4527 = vmatprep.subr.bf16.mxu1 %v6160_v41  ;;  %v1524_v37 = vld [vmem:[#allocation8 + $0xc28] sm:$0xff]  ;;  %v6197_v40 = vcombine.low %v1511_v14, %v1515_v15  ;;  %v6199_v41 = vcombine.low %v1512_v16, %v1516_v17  ;;  %v6238_v14 = vcombine.high %v1551_v6, %v1555_v9  ;;  %v1559_v16 = vld [vmem:[#allocation8 + $0xd40] sm:$0xff] }
 0x208   :  { %v6208_v43 = vcombine.high %v1520_v36, %v1524_v37  ;;  %v1563_v17 = vld [vmem:[#allocation8 + $0xd60] sm:$0xff] }
 0x20a   :  { %4356 = vmatpush1.bf16.msra.mxu0 %v6157_v22  ;;  %4528 = vmatpush1.bf16.msra.mxu1 %v6159_v49  ;;  %v1528_v22 = vld [vmem:[#allocation8 + $0xc48] sm:$0xff] }
 0x20b   :  { %4357 = vmatprep.subr.bf16.mxu0 %v6166_v50  ;;  %4529 = vmatprep.subr.bf16.mxu1 %v6168_v51  ;;  %v1532_v49 = vld [vmem:[#allocation8 + $0xc68] sm:$0xff]  ;;  %v6205_v50 = vcombine.low %v1519_v33, %v1523_v34  ;;  %v6207_v51 = vcombine.low %v1520_v36, %v1524_v37  ;;  %v6246_v33 = vcombine.high %v1559_v16, %v1563_v17  ;;  %v1567_v36 = vld [vmem:[#allocation8 + $0xd80] sm:$0xff] }
 0x20c   :  { %v6216_v54 = vcombine.high %v1528_v22, %v1532_v49  ;;  %v1571_v37 = vld [vmem:[#allocation8 + $0xda0] sm:$0xff] }
 0x20e   :  { %4358 = vmatpush1.bf16.msra.mxu0 %v6165_v58  ;;  %4530 = vmatpush1.bf16.msra.mxu1 %v6167_v59  ;;  %v1536_v58 = vld [vmem:[#allocation8 + $0xc88] sm:$0xff] }
 0x20f   :  { %4359 = vmatprep.subr.bf16.mxu0 %v6174_v60  ;;  %4531 = vmatprep.subr.bf16.mxu1 %v6176_v61  ;;  %v1540_v59 = vld [vmem:[#allocation8 + $0xca8] sm:$0xff]  ;;  %v6213_v60 = vcombine.low %v1527_v44, %v1531_v47  ;;  %v6215_v61 = vcombine.low %v1528_v22, %v1532_v49  ;;  %v6254_v44 = vcombine.high %v1567_v36, %v1571_v37  ;;  %v1575_v22 = vld [vmem:[#allocation8 + $0xdc0] sm:$0xff] }
 0x210   :  { %v6224_v63 = vcombine.high %v1536_v58, %v1540_v59  ;;  %v1579_v49 = vld [vmem:[#allocation8 + $0xde0] sm:$0xff] }
 0x212   :  { %4360 = vmatpush1.bf16.msra.mxu0 %v6173_v23  ;;  %4532 = vmatpush1.bf16.msra.mxu1 %v6175_v1  ;;  %v1544_v23 = vld [vmem:[#allocation8 + $0xcc8] sm:$0xff] }
 0x213   :  { %4361 = vmatprep.subr.bf16.mxu0 %v6182_v2  ;;  %4533 = vmatprep.subr.bf16.mxu1 %v6184_v8  ;;  %v1548_v1 = vld [vmem:[#allocation8 + $0xce8] sm:$0xff]  ;;  %v6221_v2 = vcombine.low %v1535_v55, %v1539_v57  ;;  %v6223_v8 = vcombine.low %v1536_v58, %v1540_v59  ;;  %v6262_v55 = vcombine.high %v1575_v22, %v1579_v49  ;;  %v1583_v58 = vld [vmem:[#allocation8 + $0xe00] sm:$0xff] }
 0x214   :  { %v6232_v3 = vcombine.high %v1544_v23, %v1548_v1  ;;  %v1587_v59 = vld [vmem:[#allocation8 + $0xe20] sm:$0xff] }
 0x216   :  { %4362 = vmatpush1.bf16.msra.mxu0 %v6181_v10  ;;  %4534 = vmatpush1.bf16.msra.mxu1 %v6183_v11  ;;  %v1552_v10 = vld [vmem:[#allocation8 + $0xd08] sm:$0xff] }
 0x217   :  { %4363 = vmatprep.subr.bf16.mxu0 %v6190_v12  ;;  %4535 = vmatprep.subr.bf16.mxu1 %v6192_v13  ;;  %v1556_v11 = vld [vmem:[#allocation8 + $0xd28] sm:$0xff]  ;;  %v6229_v12 = vcombine.low %v1543_v4, %v1547_v5  ;;  %v6231_v13 = vcombine.low %v1544_v23, %v1548_v1  ;;  %v6270_v4 = vcombine.high %v1583_v58, %v1587_v59  ;;  %v1591_v23 = vld [vmem:[#allocation8 + $0xe40] sm:$0xff] }
 0x218   :  { %v6240_v15 = vcombine.high %v1552_v10, %v1556_v11  ;;  %v1595_v1 = vld [vmem:[#allocation8 + $0xe60] sm:$0xff] }
 0x21a   :  { %4364 = vmatpush1.bf16.msra.mxu0 %v6189_v26  ;;  %4536 = vmatpush1.bf16.msra.mxu1 %v6191_v27  ;;  %v1560_v26 = vld [vmem:[#allocation8 + $0xd48] sm:$0xff] }
 0x21b   :  { %4365 = vmatprep.subr.bf16.mxu0 %v6198_v28  ;;  %4537 = vmatprep.subr.bf16.mxu1 %v6200_v29  ;;  %v1564_v27 = vld [vmem:[#allocation8 + $0xd68] sm:$0xff]  ;;  %v6237_v28 = vcombine.low %v1551_v6, %v1555_v9  ;;  %v6239_v29 = vcombine.low %v1552_v10, %v1556_v11  ;;  %v6278_v6 = vcombine.high %v1591_v23, %v1595_v1  ;;  %v1599_v10 = vld [vmem:[#allocation8 + $0xe80] sm:$0xff] }
 0x21c   :  { %v6248_v34 = vcombine.high %v1560_v26, %v1564_v27  ;;  %v1603_v11 = vld [vmem:[#allocation8 + $0xea0] sm:$0xff] }
 0x21e   :  { %4366 = vmatpush1.bf16.msra.mxu0 %v6197_v40  ;;  %4538 = vmatpush1.bf16.msra.mxu1 %v6199_v41  ;;  %v1568_v40 = vld [vmem:[#allocation8 + $0xd88] sm:$0xff] }
 0x21f   :  { %4378 = vmatprep.subr.bf16.mxu0 %v6206_v42  ;;  %4550 = vmatprep.subr.bf16.mxu1 %v6208_v43  ;;  %v1572_v41 = vld [vmem:[#allocation8 + $0xda8] sm:$0xff]  ;;  %v6245_v42 = vcombine.low %v1559_v16, %v1563_v17  ;;  %v6247_v43 = vcombine.low %v1560_v26, %v1564_v27  ;;  %v6286_v16 = vcombine.high %v1599_v10, %v1603_v11  ;;  %v1607_v26 = vld [vmem:[#allocation8 + $0xec0] sm:$0xff] }
 0x220   :  { %v6256_v47 = vcombine.high %v1568_v40, %v1572_v41  ;;  %v1611_v27 = vld [vmem:[#allocation8 + $0xee0] sm:$0xff] }
 0x221   :  { %4368 = vmatmul.mubr.bf16.vlgmr.msra.gmra.mrb[8].mxu0 %v7045_v46  ;;  %4540 = vmatmul.mubr.bf16.vlgmr.msra.gmra.mrb[8].mxu1 %v7045_v46 }
 0x222   :  { %4379 = vmatpush1.bf16.msra.mxu0 %v6205_v50  ;;  %4551 = vmatpush1.bf16.msra.mxu1 %v6207_v51  ;;  %v1576_v50 = vld [vmem:[#allocation8 + $0xdc8] sm:$0xff] }
 0x223   :  { %4380 = vmatprep.subr.bf16.mxu0 %v6214_v53  ;;  %4552 = vmatprep.subr.bf16.mxu1 %v6216_v54  ;;  %v1580_v51 = vld [vmem:[#allocation8 + $0xde8] sm:$0xff]  ;;  %v6253_v53 = vcombine.low %v1567_v36, %v1571_v37  ;;  %v6255_v54 = vcombine.low %v1568_v40, %v1572_v41  ;;  %v6294_v36 = vcombine.high %v1607_v26, %v1611_v27  ;;  %v1615_v40 = vld [vmem:[#allocation8 + $0xf00] sm:$0xff] }
 0x224   :  { %4410 = vmatprep.mubr.bf16.mxu0 %v7061_v31  ;;  %4582 = vmatprep.mubr.bf16.mxu1 %v7061_v31  ;;  %v6264_v57 = vcombine.high %v1576_v50, %v1580_v51  ;;  %v1619_v41 = vld [vmem:[#allocation8 + $0xf20] sm:$0xff] }
 0x226   :  { %4381 = vmatpush1.bf16.msra.mxu0 %v6213_v60  ;;  %4553 = vmatpush1.bf16.msra.mxu1 %v6215_v61  ;;  %v1584_v60 = vld [vmem:[#allocation8 + $0xe08] sm:$0xff] }
 0x227   :  { %4382 = vmatprep.subr.bf16.mxu0 %v6222_v62  ;;  %4554 = vmatprep.subr.bf16.mxu1 %v6224_v63  ;;  %v1588_v61 = vld [vmem:[#allocation8 + $0xe28] sm:$0xff]  ;;  %v6261_v62 = vcombine.low %v1575_v22, %v1579_v49  ;;  %v6263_v63 = vcombine.low %v1576_v50, %v1580_v51  ;;  %v6302_v22 = vcombine.high %v1615_v40, %v1619_v41  ;;  %v1623_v50 = vld [vmem:[#allocation8 + $0xf40] sm:$0xff] }
 0x228   :  { %v6272_v5 = vcombine.high %v1584_v60, %v1588_v61  ;;  %v1627_v51 = vld [vmem:[#allocation8 + $0xf60] sm:$0xff] }
 0x22a   :  { %4383 = vmatpush1.bf16.msra.mxu0 %v6221_v2  ;;  %4555 = vmatpush1.bf16.msra.mxu1 %v6223_v8  ;;  %v1592_v2 = vld [vmem:[#allocation8 + $0xe48] sm:$0xff] }
 0x22b   :  { %4384 = vmatprep.subr.bf16.mxu0 %v6230_v7  ;;  %4556 = vmatprep.subr.bf16.mxu1 %v6232_v3  ;;  %v1596_v8 = vld [vmem:[#allocation8 + $0xe68] sm:$0xff]  ;;  %v6269_v7 = vcombine.low %v1583_v58, %v1587_v59  ;;  %v6271_v3 = vcombine.low %v1584_v60, %v1588_v61  ;;  %v6310_v58 = vcombine.high %v1623_v50, %v1627_v51  ;;  %v1631_v60 = vld [vmem:[#allocation8 + $0xf80] sm:$0xff] }
 0x22c   :  { %v6280_v9 = vcombine.high %v1592_v2, %v1596_v8  ;;  %v1635_v61 = vld [vmem:[#allocation8 + $0xfa0] sm:$0xff] }
 0x22e   :  { %4385 = vmatpush1.bf16.msra.mxu0 %v6229_v12  ;;  %4557 = vmatpush1.bf16.msra.mxu1 %v6231_v13  ;;  %v1600_v12 = vld [vmem:[#allocation8 + $0xe88] sm:$0xff] }
 0x22f   :  { %4386 = vmatprep.subr.bf16.mxu0 %v6238_v14  ;;  %4558 = vmatprep.subr.bf16.mxu1 %v6240_v15  ;;  %v1604_v13 = vld [vmem:[#allocation8 + $0xea8] sm:$0xff]  ;;  %v6277_v14 = vcombine.low %v1591_v23, %v1595_v1  ;;  %v6279_v15 = vcombine.low %v1592_v2, %v1596_v8  ;;  %v6318_v23 = vcombine.high %v1631_v60, %v1635_v61  ;;  %v1639_v2 = vld [vmem:[#allocation8 + $0xfc0] sm:$0xff] }
 0x230   :  { %v6288_v17 = vcombine.high %v1600_v12, %v1604_v13  ;;  %v1643_v8 = vld [vmem:[#allocation8 + $0xfe0] sm:$0xff] }
 0x232   :  { %4387 = vmatpush1.bf16.msra.mxu0 %v6237_v28  ;;  %4559 = vmatpush1.bf16.msra.mxu1 %v6239_v29  ;;  %v1608_v28 = vld [vmem:[#allocation8 + $0xec8] sm:$0xff] }
 0x233   :  { %4388 = vmatprep.subr.bf16.mxu0 %v6246_v33  ;;  %4560 = vmatprep.subr.bf16.mxu1 %v6248_v34  ;;  %v1612_v29 = vld [vmem:[#allocation8 + $0xee8] sm:$0xff]  ;;  %v6285_v33 = vcombine.low %v1599_v10, %v1603_v11  ;;  %v6287_v34 = vcombine.low %v1600_v12, %v1604_v13  ;;  %v6326_v10 = vcombine.high %v1639_v2, %v1643_v8  ;;  %v1137_v12 = vld [vmem:[#allocation8 + $0x10] sm:$0xff] }
 0x234   :  { %v6296_v37 = vcombine.high %v1608_v28, %v1612_v29  ;;  %v1141_v13 = vld [vmem:[#allocation8 + $0x30] sm:$0xff] }
 0x236   :  { %4389 = vmatpush1.bf16.msra.mxu0 %v6245_v42  ;;  %4561 = vmatpush1.bf16.msra.mxu1 %v6247_v43  ;;  %v1616_v42 = vld [vmem:[#allocation8 + $0xf08] sm:$0xff] }
 0x237   :  { %4390 = vmatprep.subr.bf16.mxu0 %v6254_v44  ;;  %4562 = vmatprep.subr.bf16.mxu1 %v6256_v47  ;;  %v1620_v43 = vld [vmem:[#allocation8 + $0xf28] sm:$0xff]  ;;  %v6293_v44 = vcombine.low %v1607_v26, %v1611_v27  ;;  %v6295_v47 = vcombine.low %v1608_v28, %v1612_v29  ;;  %v5826_v26 = vcombine.high %v1137_v12, %v1141_v13  ;;  %v1145_v28 = vld [vmem:[#allocation8 + $0x50] sm:$0xff] }
 0x238   :  { %v6304_v49 = vcombine.high %v1616_v42, %v1620_v43  ;;  %v1149_v29 = vld [vmem:[#allocation8 + $0x70] sm:$0xff] }
 0x23a   :  { %4391 = vmatpush1.bf16.msra.mxu0 %v6253_v53  ;;  %4563 = vmatpush1.bf16.msra.mxu1 %v6255_v54  ;;  %v1624_v53 = vld [vmem:[#allocation8 + $0xf48] sm:$0xff] }
 0x23b   :  { %4392 = vmatprep.subr.bf16.mxu0 %v6262_v55  ;;  %4564 = vmatprep.subr.bf16.mxu1 %v6264_v57  ;;  %v1628_v54 = vld [vmem:[#allocation8 + $0xf68] sm:$0xff]  ;;  %v6301_v55 = vcombine.low %v1615_v40, %v1619_v41  ;;  %v6303_v57 = vcombine.low %v1616_v42, %v1620_v43  ;;  %v5834_v40 = vcombine.high %v1145_v28, %v1149_v29  ;;  %v1153_v42 = vld [vmem:[#allocation8 + $0x90] sm:$0xff] }
 0x23c   :  { %v6312_v59 = vcombine.high %v1624_v53, %v1628_v54  ;;  %v1157_v43 = vld [vmem:[#allocation8 + $0xb0] sm:$0xff] }
 0x23e   :  { %4393 = vmatpush1.bf16.msra.mxu0 %v6261_v62  ;;  %4565 = vmatpush1.bf16.msra.mxu1 %v6263_v63  ;;  %v1632_v62 = vld [vmem:[#allocation8 + $0xf88] sm:$0xff] }
 0x23f   :  { %4394 = vmatprep.subr.bf16.mxu0 %v6270_v4  ;;  %4566 = vmatprep.subr.bf16.mxu1 %v6272_v5  ;;  %v1636_v63 = vld [vmem:[#allocation8 + $0xfa8] sm:$0xff]  ;;  %v6309_v4 = vcombine.low %v1623_v50, %v1627_v51  ;;  %v6311_v5 = vcombine.low %v1624_v53, %v1628_v54  ;;  %v5842_v50 = vcombine.high %v1153_v42, %v1157_v43  ;;  %v1161_v53 = vld [vmem:[#allocation8 + $0xd0] sm:$0xff] }
 0x240   :  { %v6320_v1 = vcombine.high %v1632_v62, %v1636_v63  ;;  %v1165_v54 = vld [vmem:[#allocation8 + $0xf0] sm:$0xff] }
 0x242   :  { %4395 = vmatpush1.bf16.msra.mxu0 %v6269_v7  ;;  %4567 = vmatpush1.bf16.msra.mxu1 %v6271_v3  ;;  %v1640_v7 = vld [vmem:[#allocation8 + $0xfc8] sm:$0xff] }
 0x243   :  { %4396 = vmatprep.subr.bf16.mxu0 %v6278_v6  ;;  %4568 = vmatprep.subr.bf16.mxu1 %v6280_v9  ;;  %v1644_v3 = vld [vmem:[#allocation8 + $0xfe8] sm:$0xff]  ;;  %v6317_v6 = vcombine.low %v1631_v60, %v1635_v61  ;;  %v6319_v9 = vcombine.low %v1632_v62, %v1636_v63  ;;  %v5850_v60 = vcombine.high %v1161_v53, %v1165_v54  ;;  %v1169_v62 = vld [vmem:[#allocation8 + $0x110] sm:$0xff] }
 0x244   :  { %v6328_v11 = vcombine.high %v1640_v7, %v1644_v3  ;;  %v1173_v63 = vld [vmem:[#allocation8 + $0x130] sm:$0xff] }
 0x246   :  { %4397 = vmatpush1.bf16.msra.mxu0 %v6277_v14  ;;  %4569 = vmatpush1.bf16.msra.mxu1 %v6279_v15  ;;  %v1138_v14 = vld [vmem:[#allocation8 + $0x18] sm:$0xff] }
 0x247   :  { %4398 = vmatprep.subr.bf16.mxu0 %v6286_v16  ;;  %4570 = vmatprep.subr.bf16.mxu1 %v6288_v17  ;;  %v1142_v15 = vld [vmem:[#allocation8 + $0x38] sm:$0xff]  ;;  %v6325_v16 = vcombine.low %v1639_v2, %v1643_v8  ;;  %v6327_v17 = vcombine.low %v1640_v7, %v1644_v3  ;;  %v1177_v8 = vld [vmem:[#allocation8 + $0x150] sm:$0xff] }
 0x248   :  { %v5828_v27 = vcombine.high %v1138_v14, %v1142_v15  ;;  %v1181_v7 = vld [vmem:[#allocation8 + $0x170] sm:$0xff]  ;;  %v1178_v3 = vld [vmem:[#allocation8 + $0x158] sm:$0xff] }
 0x24a   :  { %4399 = vmatpush1.bf16.msra.mxu0 %v6285_v33  ;;  %4571 = vmatpush1.bf16.msra.mxu1 %v6287_v34  ;;  %v1146_v33 = vld [vmem:[#allocation8 + $0x58] sm:$0xff] }
 0x24b   :  { %4400 = vmatprep.subr.bf16.mxu0 %v6294_v36  ;;  %4572 = vmatprep.subr.bf16.mxu1 %v6296_v37  ;;  %v1150_v34 = vld [vmem:[#allocation8 + $0x78] sm:$0xff]  ;;  %v5825_v36 = vcombine.low %v1137_v12, %v1141_v13  ;;  %v5827_v37 = vcombine.low %v1138_v14, %v1142_v15  ;;  %v1185_v13 = vld [vmem:[#allocation8 + $0x190] sm:$0xff] }
 0x24c   :  { %v5836_v41 = vcombine.high %v1146_v33, %v1150_v34  ;;  %v1189_v14 = vld [vmem:[#allocation8 + $0x1b0] sm:$0xff]  ;;  %v1186_v15 = vld [vmem:[#allocation8 + $0x198] sm:$0xff] }
 0x24e   :  { %4401 = vmatpush1.bf16.msra.mxu0 %v6293_v44  ;;  %4573 = vmatpush1.bf16.msra.mxu1 %v6295_v47  ;;  %v1154_v44 = vld [vmem:[#allocation8 + $0x98] sm:$0xff] }
 0x24f   :  { %4402 = vmatprep.subr.bf16.mxu0 %v6302_v22  ;;  %4574 = vmatprep.subr.bf16.mxu1 %v6304_v49  ;;  %v1158_v47 = vld [vmem:[#allocation8 + $0xb8] sm:$0xff]  ;;  %v5833_v22 = vcombine.low %v1145_v28, %v1149_v29  ;;  %v5835_v49 = vcombine.low %v1146_v33, %v1150_v34  ;;  %v1193_v29 = vld [vmem:[#allocation8 + $0x1d0] sm:$0xff] }
 0x250   :  { %v5844_v51 = vcombine.high %v1154_v44, %v1158_v47  ;;  %v1197_v33 = vld [vmem:[#allocation8 + $0x1f0] sm:$0xff]  ;;  %v1194_v34 = vld [vmem:[#allocation8 + $0x1d8] sm:$0xff] }
 0x252   :  { %4403 = vmatpush1.bf16.msra.mxu0 %v6301_v55  ;;  %4575 = vmatpush1.bf16.msra.mxu1 %v6303_v57  ;;  %v1162_v55 = vld [vmem:[#allocation8 + $0xd8] sm:$0xff] }
 0x253   :  { %4404 = vmatprep.subr.bf16.mxu0 %v6310_v58  ;;  %4576 = vmatprep.subr.bf16.mxu1 %v6312_v59  ;;  %v1166_v57 = vld [vmem:[#allocation8 + $0xf8] sm:$0xff]  ;;  %v5841_v58 = vcombine.low %v1153_v42, %v1157_v43  ;;  %v5843_v59 = vcombine.low %v1154_v44, %v1158_v47  ;;  %v1201_v43 = vld [vmem:[#allocation8 + $0x210] sm:$0xff] }
 0x254   :  { %v5852_v61 = vcombine.high %v1162_v55, %v1166_v57  ;;  %v1205_v44 = vld [vmem:[#allocation8 + $0x230] sm:$0xff]  ;;  %v1202_v47 = vld [vmem:[#allocation8 + $0x218] sm:$0xff] }
 0x256   :  { %4405 = vmatpush1.bf16.msra.mxu0 %v6309_v4  ;;  %4577 = vmatpush1.bf16.msra.mxu1 %v6311_v5  ;;  %v1174_v4 = vld [vmem:[#allocation8 + $0x138] sm:$0xff]  ;;  %v5849_v5 = vcombine.low %v1161_v53, %v1165_v54  ;;  %v1209_v54 = vld [vmem:[#allocation8 + $0x250] sm:$0xff] }
 0x257   :  { %4406 = vmatprep.subr.bf16.mxu0 %v6318_v23  ;;  %4578 = vmatprep.subr.bf16.mxu1 %v6320_v1  ;;  %v5851_v23 = vcombine.low %v1162_v55, %v1166_v57  ;;  %v5858_v1 = vcombine.high %v1169_v62, %v1173_v63  ;;  %v1213_v55 = vld [vmem:[#allocation8 + $0x270] sm:$0xff]  ;;  %v1210_v57 = vld [vmem:[#allocation8 + $0x258] sm:$0xff] }
 0x25a   :  { %4407 = vmatpush1.bf16.msra.mxu0 %v6317_v6  ;;  %4579 = vmatpush1.bf16.msra.mxu1 %v6319_v9  ;;  %v1182_v6 = vld [vmem:[#allocation8 + $0x178] sm:$0xff]  ;;  %v5857_v9 = vcombine.low %v1169_v62, %v1173_v63  ;;  %v1217_v63 = vld [vmem:[#allocation8 + $0x290] sm:$0xff] }
 0x25b   :  { %4408 = vmatprep.subr.bf16.mxu0 %v6326_v10  ;;  %4580 = vmatprep.subr.bf16.mxu1 %v6328_v11  ;;  %v5866_v11 = vcombine.high %v1177_v8, %v1181_v7  ;;  %v5868_v12 = vcombine.high %v1178_v3, %v1182_v6 }
 0x25e   :  { %4409 = vmatpush1.bf16.msra.mxu0 %v6325_v16  ;;  %4581 = vmatpush1.bf16.msra.mxu1 %v6327_v17  ;;  %v1190_v16 = vld [vmem:[#allocation8 + $0x1b8] sm:$0xff]  ;;  %v5865_v17 = vcombine.low %v1177_v8, %v1181_v7  ;;  %v1225_v7 = vld [vmem:[#allocation8 + $0x2d0] sm:$0xff] }
 0x25f   :  { %4593 = vmatprep.subr.bf16.mxu0 %v5826_v26  ;;  %4765 = vmatprep.subr.bf16.mxu1 %v5828_v27  ;;  %v5867_v26 = vcombine.low %v1178_v3, %v1182_v6  ;;  %v5874_v27 = vcombine.high %v1185_v13, %v1189_v14  ;;  %v5876_v28 = vcombine.high %v1186_v15, %v1190_v16  ;;  %v1229_v3 = vld [vmem:[#allocation8 + $0x2f0] sm:$0xff]  ;;  %v1226_v6 = vld [vmem:[#allocation8 + $0x2d8] sm:$0xff] }
 0x261   :  { %4411 = vmatmul.mubr.bf16.vlgmr.msra.gmra.mrb[8].mxu0 %v7059_v30  ;;  %4583 = vmatmul.mubr.bf16.vlgmr.msra.gmra.mrb[8].mxu1 %v7059_v30 }
 0x262   :  { %4594 = vmatpush1.bf16.msra.mxu0 %v5825_v36  ;;  %4625 = vmatprep.mubr.bf16.mxu0 %v7011_v0  ;;  %v1198_v36 = vld [vmem:[#allocation8 + $0x1f8] sm:$0xff] }
 0x263   :  { %4766 = vmatpush1.bf16.msra.mxu1 %v5827_v37  ;;  %4797 = vmatprep.mubr.bf16.mxu1 %v7011_v0  ;;  %v1170_v0 = vld [vmem:[#allocation8 + $0x118] sm:$0xff]  ;;  %v5873_v37 = vcombine.low %v1185_v13, %v1189_v14  ;;  %v5884_v42 = vcombine.high %v1194_v34, %v1198_v36  ;;  %v1233_v14 = vld [vmem:[#allocation8 + $0x310] sm:$0xff] }
 0x264   :  { %4595 = vmatprep.subr.bf16.mxu0 %v5834_v40  ;;  %4767 = vmatprep.subr.bf16.mxu1 %v5836_v41  ;;  %v5860_v2 = vcombine.high %v1170_v0, %v1174_v4  ;;  %v5859_v10 = vcombine.low %v1170_v0, %v1174_v4  ;;  %v5875_v40 = vcombine.low %v1186_v15, %v1190_v16  ;;  %v1221_v0 = vld [vmem:[#allocation8 + $0x2b0] sm:$0xff]  ;;  %v1218_v4 = vld [vmem:[#allocation8 + $0x298] sm:$0xff] }
 0x265   :  { %v5882_v41 = vcombine.high %v1193_v29, %v1197_v33  ;;  %v1237_v15 = vld [vmem:[#allocation8 + $0x330] sm:$0xff]  ;;  %v1234_v16 = vld [vmem:[#allocation8 + $0x318] sm:$0xff] }
 0x266   :  { %4596 = vmatpush1.bf16.msra.mxu0 %v5833_v22  ;;  %v1206_v22 = vld [vmem:[#allocation8 + $0x238] sm:$0xff] }
 0x267   :  { %4768 = vmatpush1.bf16.msra.mxu1 %v5835_v49  ;;  %4597 = vmatprep.subr.bf16.mxu0 %v5842_v50  ;;  %v5881_v49 = vcombine.low %v1193_v29, %v1197_v33  ;;  %v5883_v50 = vcombine.low %v1194_v34, %v1198_v36  ;;  %v5892_v53 = vcombine.high %v1202_v47, %v1206_v22  ;;  %v1241_v33 = vld [vmem:[#allocation8 + $0x350] sm:$0xff]  ;;  %v1242_v36 = vld [vmem:[#allocation8 + $0x358] sm:$0xff] }
 0x268   :  { %4769 = vmatprep.subr.bf16.mxu1 %v5844_v51  ;;  %v5890_v51 = vcombine.high %v1201_v43, %v1205_v44  ;;  %v1245_v34 = vld [vmem:[#allocation8 + $0x370] sm:$0xff] }
 0x26a   :  { %4598 = vmatpush1.bf16.msra.mxu0 %v5841_v58  ;;  %v1214_v58 = vld [vmem:[#allocation8 + $0x278] sm:$0xff] }
 0x26b   :  { %4770 = vmatpush1.bf16.msra.mxu1 %v5843_v59  ;;  %4599 = vmatprep.subr.bf16.mxu0 %v5850_v60  ;;  %v5889_v59 = vcombine.low %v1201_v43, %v1205_v44  ;;  %v5891_v60 = vcombine.low %v1202_v47, %v1206_v22  ;;  %v5900_v62 = vcombine.high %v1210_v57, %v1214_v58  ;;  %v1249_v44 = vld [vmem:[#allocation8 + $0x390] sm:$0xff]  ;;  %v1250_v22 = vld [vmem:[#allocation8 + $0x398] sm:$0xff] }
 0x26c   :  { %4771 = vmatprep.subr.bf16.mxu1 %v5852_v61  ;;  %v5898_v61 = vcombine.high %v1209_v54, %v1213_v55  ;;  %v1253_v47 = vld [vmem:[#allocation8 + $0x3b0] sm:$0xff] }
 0x26e   :  { %4600 = vmatpush1.bf16.msra.mxu0 %v5849_v5  ;;  %v1222_v5 = vld [vmem:[#allocation8 + $0x2b8] sm:$0xff] }
 0x26f   :  { %4772 = vmatpush1.bf16.msra.mxu1 %v5851_v23  ;;  %4601 = vmatprep.subr.bf16.mxu0 %v5858_v1  ;;  %v5897_v23 = vcombine.low %v1209_v54, %v1213_v55  ;;  %v5899_v1 = vcombine.low %v1210_v57, %v1214_v58  ;;  %v5908_v8 = vcombine.high %v1218_v4, %v1222_v5  ;;  %v1257_v55 = vld [vmem:[#allocation8 + $0x3d0] sm:$0xff]  ;;  %v1258_v58 = vld [vmem:[#allocation8 + $0x3d8] sm:$0xff] }
 0x270   :  { %4773 = vmatprep.subr.bf16.mxu1 %v5860_v2  ;;  %v5906_v2 = vcombine.high %v1217_v63, %v1221_v0  ;;  %v1261_v57 = vld [vmem:[#allocation8 + $0x3f0] sm:$0xff] }
 0x272   :  { %4602 = vmatpush1.bf16.msra.mxu0 %v5857_v9  ;;  %v1230_v9 = vld [vmem:[#allocation8 + $0x2f8] sm:$0xff] }
 0x273   :  { %4774 = vmatpush1.bf16.msra.mxu1 %v5859_v10  ;;  %4603 = vmatprep.subr.bf16.mxu0 %v5866_v11  ;;  %v5905_v10 = vcombine.low %v1217_v63, %v1221_v0  ;;  %v5907_v11 = vcombine.low %v1218_v4, %v1222_v5  ;;  %v5916_v13 = vcombine.high %v1226_v6, %v1230_v9  ;;  %v1265_v0 = vld [vmem:[#allocation8 + $0x410] sm:$0xff]  ;;  %v1266_v5 = vld [vmem:[#allocation8 + $0x418] sm:$0xff] }
 0x274   :  { %4775 = vmatprep.subr.bf16.mxu1 %v5868_v12  ;;  %v5914_v12 = vcombine.high %v1225_v7, %v1229_v3  ;;  %v1269_v4 = vld [vmem:[#allocation8 + $0x430] sm:$0xff] }
 0x276   :  { %4604 = vmatpush1.bf16.msra.mxu0 %v5865_v17  ;;  %v1238_v17 = vld [vmem:[#allocation8 + $0x338] sm:$0xff] }
 0x277   :  { %4776 = vmatpush1.bf16.msra.mxu1 %v5867_v26  ;;  %4605 = vmatprep.subr.bf16.mxu0 %v5874_v27  ;;  %v5913_v26 = vcombine.low %v1225_v7, %v1229_v3  ;;  %v5915_v27 = vcombine.low %v1226_v6, %v1230_v9  ;;  %v5924_v29 = vcombine.high %v1234_v16, %v1238_v17  ;;  %v1273_v3 = vld [vmem:[#allocation8 + $0x450] sm:$0xff] }
 0x278   :  { %4777 = vmatprep.subr.bf16.mxu1 %v5876_v28  ;;  %v5922_v28 = vcombine.high %v1233_v14, %v1237_v15  ;;  %v1277_v6 = vld [vmem:[#allocation8 + $0x470] sm:$0xff]  ;;  %v5953_v9 = vcombine.low %v1265_v0, %v1269_v4 }
 0x27a   :  { %4606 = vmatpush1.bf16.msra.mxu0 %v5873_v37  ;;  %v1246_v37 = vld [vmem:[#allocation8 + $0x378] sm:$0xff] }
 0x27b   :  { %4778 = vmatpush1.bf16.msra.mxu1 %v5875_v40  ;;  %4607 = vmatprep.subr.bf16.mxu0 %v5882_v41  ;;  %v5921_v40 = vcombine.low %v1233_v14, %v1237_v15  ;;  %v5923_v41 = vcombine.low %v1234_v16, %v1238_v17  ;;  %v5932_v43 = vcombine.high %v1242_v36, %v1246_v37  ;;  %v1281_v14 = vld [vmem:[#allocation8 + $0x490] sm:$0xff]  ;;  %v1282_v17 = vld [vmem:[#allocation8 + $0x498] sm:$0xff] }
 0x27c   :  { %4779 = vmatprep.subr.bf16.mxu1 %v5884_v42  ;;  %v5930_v42 = vcombine.high %v1241_v33, %v1245_v34  ;;  %v1285_v15 = vld [vmem:[#allocation8 + $0x4b0] sm:$0xff] }
 0x27e   :  { %4608 = vmatpush1.bf16.msra.mxu0 %v5881_v49  ;;  %v1254_v49 = vld [vmem:[#allocation8 + $0x3b8] sm:$0xff] }
 0x27f   :  { %4780 = vmatpush1.bf16.msra.mxu1 %v5883_v50  ;;  %4609 = vmatprep.subr.bf16.mxu0 %v5890_v51  ;;  %v5929_v50 = vcombine.low %v1241_v33, %v1245_v34  ;;  %v5931_v51 = vcombine.low %v1242_v36, %v1246_v37  ;;  %v5940_v54 = vcombine.high %v1250_v22, %v1254_v49  ;;  %v1289_v34 = vld [vmem:[#allocation8 + $0x4d0] sm:$0xff]  ;;  %v1290_v37 = vld [vmem:[#allocation8 + $0x4d8] sm:$0xff] }
 0x280   :  { %4781 = vmatprep.subr.bf16.mxu1 %v5892_v53  ;;  %v5938_v53 = vcombine.high %v1249_v44, %v1253_v47  ;;  %v1293_v36 = vld [vmem:[#allocation8 + $0x4f0] sm:$0xff] }
 0x282   :  { %4610 = vmatpush1.bf16.msra.mxu0 %v5889_v59  ;;  %v1262_v59 = vld [vmem:[#allocation8 + $0x3f8] sm:$0xff] }
 0x283   :  { %4782 = vmatpush1.bf16.msra.mxu1 %v5891_v60  ;;  %4611 = vmatprep.subr.bf16.mxu0 %v5898_v61  ;;  %v5937_v60 = vcombine.low %v1249_v44, %v1253_v47  ;;  %v5939_v61 = vcombine.low %v1250_v22, %v1254_v49  ;;  %v5948_v63 = vcombine.high %v1258_v58, %v1262_v59  ;;  %v1297_v44 = vld [vmem:[#allocation8 + $0x510] sm:$0xff]  ;;  %v1298_v22 = vld [vmem:[#allocation8 + $0x518] sm:$0xff] }
 0x284   :  { %4783 = vmatprep.subr.bf16.mxu1 %v5900_v62  ;;  %v5946_v62 = vcombine.high %v1257_v55, %v1261_v57  ;;  %v1301_v47 = vld [vmem:[#allocation8 + $0x530] sm:$0xff]  ;;  %v1302_v49 = vld [vmem:[#allocation8 + $0x538] sm:$0xff] }
 0x286   :  { %4612 = vmatpush1.bf16.msra.mxu0 %v5897_v23  ;;  %v1270_v23 = vld [vmem:[#allocation8 + $0x438] sm:$0xff] }
 0x287   :  { %4784 = vmatpush1.bf16.msra.mxu1 %v5899_v1  ;;  %4613 = vmatprep.subr.bf16.mxu0 %v5906_v2  ;;  %v5945_v1 = vcombine.low %v1257_v55, %v1261_v57  ;;  %v5947_v2 = vcombine.low %v1258_v58, %v1262_v59  ;;  %v5956_v7 = vcombine.high %v1266_v5, %v1270_v23  ;;  %v1309_v55 = vld [vmem:[#allocation8 + $0x570] sm:$0xff]  ;;  %v1306_v57 = vld [vmem:[#allocation8 + $0x558] sm:$0xff] }
 0x288   :  { %4785 = vmatprep.subr.bf16.mxu1 %v5908_v8  ;;  %v5954_v8 = vcombine.high %v1265_v0, %v1269_v4  ;;  %v1310_v58 = vld [vmem:[#allocation8 + $0x578] sm:$0xff]  ;;  %v5985_v59 = vcombine.low %v1297_v44, %v1301_v47  ;;  %v1317_v0 = vld [vmem:[#allocation8 + $0x5b0] sm:$0xff] }
 0x289   :  { %v1314_v4 = vld [vmem:[#allocation8 + $0x598] sm:$0xff] }
 0x28a   :  { %4614 = vmatpush1.bf16.msra.mxu0 %v5905_v10  ;;  %v1274_v10 = vld [vmem:[#allocation8 + $0x458] sm:$0xff] }
 0x28b   :  { %4786 = vmatpush1.bf16.msra.mxu1 %v5907_v11  ;;  %4615 = vmatprep.subr.bf16.mxu0 %v5914_v12  ;;  %v1278_v11 = vld [vmem:[#allocation8 + $0x478] sm:$0xff]  ;;  %v5955_v12 = vcombine.low %v1266_v5, %v1270_v23 }
 0x28c   :  { %4787 = vmatprep.subr.bf16.mxu1 %v5916_v13  ;;  %v5962_v13 = vcombine.high %v1273_v3, %v1277_v6  ;;  %v5964_v16 = vcombine.high %v1274_v10, %v1278_v11  ;;  %v1318_v5 = vld [vmem:[#allocation8 + $0x5b8] sm:$0xff] }
 0x28e   :  { %4616 = vmatpush1.bf16.msra.mxu0 %v5913_v26  ;;  %v1286_v26 = vld [vmem:[#allocation8 + $0x4b8] sm:$0xff] }
 0x28f   :  { %4788 = vmatpush1.bf16.msra.mxu1 %v5915_v27  ;;  %4617 = vmatprep.subr.bf16.mxu0 %v5922_v28  ;;  %v5961_v27 = vcombine.low %v1273_v3, %v1277_v6  ;;  %v5963_v28 = vcombine.low %v1274_v10, %v1278_v11  ;;  %v5972_v33 = vcombine.high %v1282_v17, %v1286_v26  ;;  %v1325_v3 = vld [vmem:[#allocation8 + $0x5f0] sm:$0xff]  ;;  %v1322_v6 = vld [vmem:[#allocation8 + $0x5d8] sm:$0xff] }
 0x290   :  { %4789 = vmatprep.subr.bf16.mxu1 %v5924_v29  ;;  %v5970_v29 = vcombine.high %v1281_v14, %v1285_v15  ;;  %v6003_v11 = vcombine.low %v1314_v4, %v1318_v5 }
 0x292   :  { %4618 = vmatpush1.bf16.msra.mxu0 %v5921_v40  ;;  %v1294_v40 = vld [vmem:[#allocation8 + $0x4f8] sm:$0xff] }
 0x293   :  { %4790 = vmatpush1.bf16.msra.mxu1 %v5923_v41  ;;  %4619 = vmatprep.subr.bf16.mxu0 %v5930_v42  ;;  %v5969_v41 = vcombine.low %v1281_v14, %v1285_v15  ;;  %v5978_v42 = vcombine.high %v1289_v34, %v1293_v36  ;;  %v1329_v14 = vld [vmem:[#allocation8 + $0x610] sm:$0xff] }
 0x294   :  { %4791 = vmatprep.subr.bf16.mxu1 %v5932_v43  ;;  %v5980_v43 = vcombine.high %v1290_v37, %v1294_v40  ;;  %v1333_v15 = vld [vmem:[#allocation8 + $0x630] sm:$0xff] }
 0x296   :  { %4620 = vmatpush1.bf16.msra.mxu0 %v5929_v50  ;;  %v5979_v50 = vcombine.low %v1290_v37, %v1294_v40  ;;  %v1342_v37 = vld [vmem:[#allocation8 + $0x678] sm:$0xff]  ;;  %v6017_v40 = vcombine.low %v1329_v14, %v1333_v15 }
 0x297   :  { %4792 = vmatpush1.bf16.msra.mxu1 %v5931_v51  ;;  %4621 = vmatprep.subr.bf16.mxu0 %v5938_v53  ;;  %v5986_v51 = vcombine.high %v1297_v44, %v1301_v47  ;;  %v5988_v53 = vcombine.high %v1298_v22, %v1302_v49  ;;  %v1349_v44 = vld [vmem:[#allocation8 + $0x6b0] sm:$0xff]  ;;  %v1346_v47 = vld [vmem:[#allocation8 + $0x698] sm:$0xff] }
 0x298   :  { %4793 = vmatprep.subr.bf16.mxu1 %v5940_v54  ;;  %v1305_v54 = vld [vmem:[#allocation8 + $0x550] sm:$0xff] }
 0x299   :  { %v5993_v23 = vcombine.low %v1305_v54, %v1309_v55 }
 0x29a   :  { %4622 = vmatpush1.bf16.msra.mxu0 %v5937_v60  ;;  %v5987_v60 = vcombine.low %v1298_v22, %v1302_v49  ;;  %v1350_v22 = vld [vmem:[#allocation8 + $0x6b8] sm:$0xff] }
 0x29b   :  { %4794 = vmatpush1.bf16.msra.mxu1 %v5939_v61  ;;  %4623 = vmatprep.subr.bf16.mxu0 %v5946_v62  ;;  %v5994_v61 = vcombine.high %v1305_v54, %v1309_v55  ;;  %v5996_v62 = vcombine.high %v1306_v57, %v1310_v58  ;;  %v1357_v54 = vld [vmem:[#allocation8 + $0x6f0] sm:$0xff]  ;;  %v1354_v55 = vld [vmem:[#allocation8 + $0x6d8] sm:$0xff] }
 0x29c   :  { %4795 = vmatprep.subr.bf16.mxu1 %v5948_v63  ;;  %v1313_v63 = vld [vmem:[#allocation8 + $0x590] sm:$0xff] }
 0x29d   :  { %v6001_v10 = vcombine.low %v1313_v63, %v1317_v0 }
 0x29e   :  { %4624 = vmatpush1.bf16.msra.mxu0 %v5945_v1  ;;  %v5995_v1 = vcombine.low %v1306_v57, %v1310_v58  ;;  %v1358_v57 = vld [vmem:[#allocation8 + $0x6f8] sm:$0xff] }
 0x29f   :  { %4796 = vmatpush1.bf16.msra.mxu1 %v5947_v2  ;;  %4636 = vmatprep.subr.bf16.mxu0 %v5954_v8  ;;  %v6002_v2 = vcombine.high %v1313_v63, %v1317_v0  ;;  %v6004_v8 = vcombine.high %v1314_v4, %v1318_v5  ;;  %v1365_v63 = vld [vmem:[#allocation8 + $0x730] sm:$0xff]  ;;  %v1362_v0 = vld [vmem:[#allocation8 + $0x718] sm:$0xff] }
 0x2a0   :  { %4808 = vmatprep.subr.bf16.mxu1 %v5956_v7  ;;  %v1321_v7 = vld [vmem:[#allocation8 + $0x5d0] sm:$0xff]  ;;  %v1366_v4 = vld [vmem:[#allocation8 + $0x738] sm:$0xff] }
 0x2a1   :  { %4626 = vmatmul.mubr.bf16.vlgmr.msra.gmra.mrb[12].mxu0 %v7009_v45 }
 0x2a2   :  { %4798 = vmatmul.mubr.bf16.vlgmr.msra.gmra.mrb[12].mxu1 %v7009_v45  ;;  %4637 = vmatpush1.bf16.msra.mxu0 %v5953_v9  ;;  %v5971_v45 = vcombine.low %v1282_v17, %v1286_v26  ;;  %v1326_v9 = vld [vmem:[#allocation8 + $0x5f8] sm:$0xff]  ;;  %v6009_v26 = vcombine.low %v1321_v7, %v1325_v3 }
 0x2a3   :  { %4668 = vmatprep.mubr.bf16.mxu0 %v7031_v25  ;;  %4809 = vmatpush1.bf16.msra.mxu1 %v5955_v12  ;;  %v6010_v12 = vcombine.high %v1321_v7, %v1325_v3  ;;  %v1334_v17 = vld [vmem:[#allocation8 + $0x638] sm:$0xff]  ;;  %v1373_v7 = vld [vmem:[#allocation8 + $0x770] sm:$0xff] }
 0x2a4   :  { %4840 = vmatprep.mubr.bf16.mxu1 %v7031_v25  ;;  %4638 = vmatprep.subr.bf16.mxu0 %v5962_v13  ;;  %v5977_v25 = vcombine.low %v1289_v34, %v1293_v36  ;;  %v6012_v13 = vcombine.high %v1322_v6, %v1326_v9  ;;  %v1341_v34 = vld [vmem:[#allocation8 + $0x670] sm:$0xff]  ;;  %v1338_v36 = vld [vmem:[#allocation8 + $0x658] sm:$0xff] }
 0x2a5   :  { %4810 = vmatprep.subr.bf16.mxu1 %v5964_v16  ;;  %v1330_v16 = vld [vmem:[#allocation8 + $0x618] sm:$0xff] }
 0x2a6   :  { %4639 = vmatpush1.bf16.msra.mxu0 %v5961_v27  ;;  %v6011_v27 = vcombine.low %v1322_v6, %v1326_v9  ;;  %v1370_v3 = vld [vmem:[#allocation8 + $0x758] sm:$0xff] }
 0x2a7   :  { %4811 = vmatpush1.bf16.msra.mxu1 %v5963_v28  ;;  %4640 = vmatprep.subr.bf16.mxu0 %v5970_v29  ;;  %v6018_v28 = vcombine.high %v1329_v14, %v1333_v15  ;;  %v6020_v29 = vcombine.high %v1330_v16, %v1334_v17  ;;  %v1374_v6 = vld [vmem:[#allocation8 + $0x778] sm:$0xff]  ;;  %v1381_v14 = vld [vmem:[#allocation8 + $0x7b0] sm:$0xff] }
 0x2a8   :  { %4812 = vmatprep.subr.bf16.mxu1 %v5972_v33  ;;  %v1337_v33 = vld [vmem:[#allocation8 + $0x650] sm:$0xff]  ;;  %v1378_v15 = vld [vmem:[#allocation8 + $0x798] sm:$0xff] }
 0x2a9   :  { %v6025_v49 = vcombine.low %v1337_v33, %v1341_v34 }
 0x2aa   :  { %4641 = vmatpush1.bf16.msra.mxu0 %v5969_v41  ;;  %v6019_v41 = vcombine.low %v1330_v16, %v1334_v17  ;;  %v1382_v16 = vld [vmem:[#allocation8 + $0x7b8] sm:$0xff] }
 0x2ab   :  { %4813 = vmatpush1.bf16.msra.mxu1 %v5971_v45  ;;  %4642 = vmatprep.subr.bf16.mxu0 %v5978_v42  ;;  %v6026_v45 = vcombine.high %v1337_v33, %v1341_v34  ;;  %v6028_v42 = vcombine.high %v1338_v36, %v1342_v37  ;;  %v1389_v33 = vld [vmem:[#allocation8 + $0x7f0] sm:$0xff]  ;;  %v1386_v34 = vld [vmem:[#allocation8 + $0x7d8] sm:$0xff] }
 0x2ac   :  { %4814 = vmatprep.subr.bf16.mxu1 %v5980_v43  ;;  %v1345_v43 = vld [vmem:[#allocation8 + $0x690] sm:$0xff] }
 0x2ad   :  { %v6033_v58 = vcombine.low %v1345_v43, %v1349_v44 }
 0x2ae   :  { %4643 = vmatpush1.bf16.msra.mxu0 %v5977_v25  ;;  %v6027_v25 = vcombine.low %v1338_v36, %v1342_v37  ;;  %v1390_v36 = vld [vmem:[#allocation8 + $0x7f8] sm:$0xff] }
 0x2af   :  { %4815 = vmatpush1.bf16.msra.mxu1 %v5979_v50  ;;  %4644 = vmatprep.subr.bf16.mxu0 %v5986_v51  ;;  %v6034_v50 = vcombine.high %v1345_v43, %v1349_v44  ;;  %v6036_v51 = vcombine.high %v1346_v47, %v1350_v22  ;;  %v1397_v43 = vld [vmem:[#allocation8 + $0x830] sm:$0xff]  ;;  %v1394_v44 = vld [vmem:[#allocation8 + $0x818] sm:$0xff] }
 0x2b0   :  { %4816 = vmatprep.subr.bf16.mxu1 %v5988_v53  ;;  %v1353_v53 = vld [vmem:[#allocation8 + $0x6d0] sm:$0xff] }
 0x2b1   :  { %v6041_v5 = vcombine.low %v1353_v53, %v1357_v54 }
 0x2b2   :  { %4645 = vmatpush1.bf16.msra.mxu0 %v5985_v59  ;;  %v6035_v59 = vcombine.low %v1346_v47, %v1350_v22  ;;  %v1398_v47 = vld [vmem:[#allocation8 + $0x838] sm:$0xff] }
 0x2b3   :  { %4817 = vmatpush1.bf16.msra.mxu1 %v5987_v60  ;;  %4646 = vmatprep.subr.bf16.mxu0 %v5994_v61  ;;  %v6042_v60 = vcombine.high %v1353_v53, %v1357_v54  ;;  %v6044_v61 = vcombine.high %v1354_v55, %v1358_v57  ;;  %v1405_v53 = vld [vmem:[#allocation8 + $0x870] sm:$0xff] }
 0x2b4   :  { %4818 = vmatprep.subr.bf16.mxu1 %v5996_v62  ;;  %v1361_v62 = vld [vmem:[#allocation8 + $0x710] sm:$0xff] }
 0x2b5   :  { %v6049_v9 = vcombine.low %v1361_v62, %v1365_v63 }
 0x2b6   :  { %4647 = vmatpush1.bf16.msra.mxu0 %v5993_v23  ;;  %v6043_v23 = vcombine.low %v1354_v55, %v1358_v57  ;;  %v1402_v55 = vld [vmem:[#allocation8 + $0x858] sm:$0xff] }
 0x2b7   :  { %4819 = vmatpush1.bf16.msra.mxu1 %v5995_v1  ;;  %4648 = vmatprep.subr.bf16.mxu0 %v6002_v2  ;;  %v6050_v1 = vcombine.high %v1361_v62, %v1365_v63  ;;  %v6052_v2 = vcombine.high %v1362_v0, %v1366_v4  ;;  %v1406_v57 = vld [vmem:[#allocation8 + $0x878] sm:$0xff] }
 0x2b8   :  { %4820 = vmatprep.subr.bf16.mxu1 %v6004_v8  ;;  %v1369_v8 = vld [vmem:[#allocation8 + $0x750] sm:$0xff]  ;;  %v6092_v62 = vcombine.high %v1402_v55, %v1406_v57  ;;  %v1410_v63 = vld [vmem:[#allocation8 + $0x898] sm:$0xff] }
 0x2b9   :  { %v6057_v17 = vcombine.low %v1369_v8, %v1373_v7 }
 0x2ba   :  { %4649 = vmatpush1.bf16.msra.mxu0 %v6001_v10  ;;  %v6051_v10 = vcombine.low %v1362_v0, %v1366_v4  ;;  %v1414_v0 = vld [vmem:[#allocation8 + $0x8b8] sm:$0xff] }
 0x2bb   :  { %4821 = vmatpush1.bf16.msra.mxu1 %v6003_v11  ;;  %4650 = vmatprep.subr.bf16.mxu0 %v6010_v12  ;;  %v6058_v11 = vcombine.high %v1369_v8, %v1373_v7  ;;  %v6060_v12 = vcombine.high %v1370_v3, %v1374_v6  ;;  %v1421_v8 = vld [vmem:[#allocation8 + $0x8f0] sm:$0xff]  ;;  %v1418_v7 = vld [vmem:[#allocation8 + $0x8d8] sm:$0xff] }
 0x2bc   :  { %4822 = vmatprep.subr.bf16.mxu1 %v6012_v13  ;;  %v1377_v13 = vld [vmem:[#allocation8 + $0x790] sm:$0xff] }
 0x2bd   :  { %v6065_v37 = vcombine.low %v1377_v13, %v1381_v14 }
 0x2be   :  { %4651 = vmatpush1.bf16.msra.mxu0 %v6009_v26  ;;  %v6059_v26 = vcombine.low %v1370_v3, %v1374_v6  ;;  %v1422_v3 = vld [vmem:[#allocation8 + $0x8f8] sm:$0xff] }
 0x2bf   :  { %4823 = vmatpush1.bf16.msra.mxu1 %v6011_v27  ;;  %4652 = vmatprep.subr.bf16.mxu0 %v6018_v28  ;;  %v6066_v27 = vcombine.high %v1377_v13, %v1381_v14  ;;  %v6068_v28 = vcombine.high %v1378_v15, %v1382_v16  ;;  %v1426_v13 = vld [vmem:[#allocation8 + $0x918] sm:$0xff] }
 0x2c0   :  { %4824 = vmatprep.subr.bf16.mxu1 %v6020_v29  ;;  %v1385_v29 = vld [vmem:[#allocation8 + $0x7d0] sm:$0xff]  ;;  %v1430_v14 = vld [vmem:[#allocation8 + $0x938] sm:$0xff] }
 0x2c1   :  { %v6073_v22 = vcombine.low %v1385_v29, %v1389_v33 }
 0x2c2   :  { %4653 = vmatpush1.bf16.msra.mxu0 %v6017_v40  ;;  %v6067_v40 = vcombine.low %v1378_v15, %v1382_v16  ;;  %v6107_v15 = vcombine.low %v1418_v7, %v1422_v3 }
 0x2c3   :  { %4825 = vmatpush1.bf16.msra.mxu1 %v6019_v41  ;;  %4654 = vmatprep.subr.bf16.mxu0 %v6026_v45  ;;  %v6074_v41 = vcombine.high %v1385_v29, %v1389_v33  ;;  %v6076_v45 = vcombine.high %v1386_v34, %v1390_v36  ;;  %v1438_v29 = vld [vmem:[#allocation8 + $0x978] sm:$0xff] }
 0x2c4   :  { %4826 = vmatprep.subr.bf16.mxu1 %v6028_v42  ;;  %v1393_v42 = vld [vmem:[#allocation8 + $0x810] sm:$0xff] }
 0x2c5   :  { %v6081_v54 = vcombine.low %v1393_v42, %v1397_v43 }
 0x2c6   :  { %4655 = vmatpush1.bf16.msra.mxu0 %v6025_v49  ;;  %v6075_v49 = vcombine.low %v1386_v34, %v1390_v36  ;;  %v6115_v34 = vcombine.low %v1426_v13, %v1430_v14 }
 0x2c7   :  { %4827 = vmatpush1.bf16.msra.mxu1 %v6027_v25  ;;  %4656 = vmatprep.subr.bf16.mxu0 %v6034_v50  ;;  %v6082_v25 = vcombine.high %v1393_v42, %v1397_v43  ;;  %v6084_v50 = vcombine.high %v1394_v44, %v1398_v47  ;;  %v1446_v42 = vld [vmem:[#allocation8 + $0x9b8] sm:$0xff] }
 0x2c8   :  { %4828 = vmatprep.subr.bf16.mxu1 %v6036_v51  ;;  %v1401_v51 = vld [vmem:[#allocation8 + $0x850] sm:$0xff] }
 0x2c9   :  { %v6089_v4 = vcombine.low %v1401_v51, %v1405_v53 }
 0x2ca   :  { %4657 = vmatpush1.bf16.msra.mxu0 %v6033_v58  ;;  %v6083_v58 = vcombine.low %v1394_v44, %v1398_v47 }
 0x2cb   :  { %4829 = vmatpush1.bf16.msra.mxu1 %v6035_v59  ;;  %4658 = vmatprep.subr.bf16.mxu0 %v6042_v60  ;;  %v6090_v59 = vcombine.high %v1401_v51, %v1405_v53  ;;  %v1409_v60 = vld [vmem:[#allocation8 + $0x890] sm:$0xff]  ;;  %v1454_v51 = vld [vmem:[#allocation8 + $0x9f8] sm:$0xff] }
 0x2cc   :  { %4830 = vmatprep.subr.bf16.mxu1 %v6044_v61  ;;  %v1413_v61 = vld [vmem:[#allocation8 + $0x8b0] sm:$0xff] }
 0x2cd   :  { %v6097_v6 = vcombine.low %v1409_v60, %v1413_v61 }
 0x2ce   :  { %4659 = vmatpush1.bf16.msra.mxu0 %v6041_v5  ;;  %v6091_v5 = vcombine.low %v1402_v55, %v1406_v57 }
 0x2cf   :  { %4831 = vmatpush1.bf16.msra.mxu1 %v6043_v23  ;;  %4660 = vmatprep.subr.bf16.mxu0 %v6050_v1  ;;  %v6098_v23 = vcombine.high %v1409_v60, %v1413_v61  ;;  %v6100_v1 = vcombine.high %v1410_v63, %v1414_v0  ;;  %v1458_v60 = vld [vmem:[#allocation8 + $0xa18] sm:$0xff] }
 0x2d0   :  { %4832 = vmatprep.subr.bf16.mxu1 %v6052_v2  ;;  %v1417_v2 = vld [vmem:[#allocation8 + $0x8d0] sm:$0xff]  ;;  %v1462_v61 = vld [vmem:[#allocation8 + $0xa38] sm:$0xff] }
 0x2d2   :  { %4661 = vmatpush1.bf16.msra.mxu0 %v6049_v9  ;;  %v6106_v9 = vcombine.high %v1417_v2, %v1421_v8 }
 0x2d3   :  { %4833 = vmatpush1.bf16.msra.mxu1 %v6051_v10  ;;  %4662 = vmatprep.subr.bf16.mxu0 %v6058_v11  ;;  %v6108_v10 = vcombine.high %v1418_v7, %v1422_v3  ;;  %v1425_v11 = vld [vmem:[#allocation8 + $0x910] sm:$0xff]  ;;  %v6147_v7 = vcombine.low %v1458_v60, %v1462_v61 }
 0x2d4   :  { %4834 = vmatprep.subr.bf16.mxu1 %v6060_v12  ;;  %v1429_v12 = vld [vmem:[#allocation8 + $0x930] sm:$0xff] }
 0x2d5   :  { %v6114_v16 = vcombine.high %v1425_v11, %v1429_v12  ;;  %v6113_v33 = vcombine.low %v1425_v11, %v1429_v12  ;;  %v1478_v11 = vld [vmem:[#allocation8 + $0xab8] sm:$0xff] }
 0x2d6   :  { %4663 = vmatpush1.bf16.msra.mxu0 %v6057_v17  ;;  %v6116_v17 = vcombine.high %v1426_v13, %v1430_v14 }
 0x2d7   :  { %4835 = vmatpush1.bf16.msra.mxu1 %v6059_v26  ;;  %4664 = vmatprep.subr.bf16.mxu0 %v6066_v27  ;;  %v1433_v26 = vld [vmem:[#allocation8 + $0x950] sm:$0xff] }
 0x2d8   :  { %4836 = vmatprep.subr.bf16.mxu1 %v6068_v28  ;;  %v1437_v27 = vld [vmem:[#allocation8 + $0x970] sm:$0xff]  ;;  %v1434_v28 = vld [vmem:[#allocation8 + $0x958] sm:$0xff] }
 0x2d9   :  { %v6122_v36 = vcombine.high %v1433_v26, %v1437_v27  ;;  %v6121_v43 = vcombine.low %v1433_v26, %v1437_v27  ;;  %v6123_v44 = vcombine.low %v1434_v28, %v1438_v29  ;;  %v1486_v26 = vld [vmem:[#allocation8 + $0xaf8] sm:$0xff] }
 0x2da   :  { %4665 = vmatpush1.bf16.msra.mxu0 %v6065_v37  ;;  %v6124_v37 = vcombine.high %v1434_v28, %v1438_v29 }
 0x2db   :  { %4837 = vmatpush1.bf16.msra.mxu1 %v6067_v40  ;;  %4666 = vmatprep.subr.bf16.mxu0 %v6074_v41  ;;  %v1441_v40 = vld [vmem:[#allocation8 + $0x990] sm:$0xff] }
 0x2dc   :  { %4838 = vmatprep.subr.bf16.mxu1 %v6076_v45  ;;  %v1445_v41 = vld [vmem:[#allocation8 + $0x9b0] sm:$0xff]  ;;  %v1442_v45 = vld [vmem:[#allocation8 + $0x998] sm:$0xff] }
 0x2dd   :  { %v6130_v47 = vcombine.high %v1441_v40, %v1445_v41  ;;  %v6129_v53 = vcombine.low %v1441_v40, %v1445_v41  ;;  %v1494_v40 = vld [vmem:[#allocation8 + $0xb38] sm:$0xff] }
 0x2de   :  { %4667 = vmatpush1.bf16.msra.mxu0 %v6073_v22  ;;  %v6132_v22 = vcombine.high %v1442_v45, %v1446_v42 }
 0x2df   :  { %4839 = vmatpush1.bf16.msra.mxu1 %v6075_v49  ;;  %4679 = vmatprep.subr.bf16.mxu0 %v6082_v25  ;;  %v1449_v49 = vld [vmem:[#allocation8 + $0x9d0] sm:$0xff] }
 0x2e0   :  { %4851 = vmatprep.subr.bf16.mxu1 %v6084_v50  ;;  %v1453_v25 = vld [vmem:[#allocation8 + $0x9f0] sm:$0xff]  ;;  %v1450_v50 = vld [vmem:[#allocation8 + $0x9d8] sm:$0xff] }
 0x2e1   :  { %4669 = vmatmul.mubr.bf16.vlgmr.msra.gmra.mrb[12].mxu0 %v7029_v18  ;;  %v6138_v55 = vcombine.high %v1449_v49, %v1453_v25  ;;  %v6140_v57 = vcombine.high %v1450_v50, %v1454_v51 }
 0x2e2   :  { %4841 = vmatmul.mubr.bf16.vlgmr.msra.gmra.mrb[12].mxu1 %v7029_v18  ;;  %4680 = vmatpush1.bf16.msra.mxu0 %v6081_v54  ;;  %v6099_v18 = vcombine.low %v1410_v63, %v1414_v0  ;;  %v6131_v54 = vcombine.low %v1442_v45, %v1446_v42  ;;  %v6139_v63 = vcombine.low %v1450_v50, %v1454_v51 }
 0x2e3   :  { %4711 = vmatprep.mubr.bf16.mxu0 %v7047_v48  ;;  %4852 = vmatpush1.bf16.msra.mxu1 %v6083_v58  ;;  %v1457_v58 = vld [vmem:[#allocation8 + $0xa10] sm:$0xff] }
 0x2e4   :  { %4883 = vmatprep.mubr.bf16.mxu1 %v7047_v48  ;;  %4681 = vmatprep.subr.bf16.mxu0 %v6090_v59  ;;  %v6105_v48 = vcombine.low %v1417_v2, %v1421_v8  ;;  %v1461_v59 = vld [vmem:[#allocation8 + $0xa30] sm:$0xff]  ;;  %v1470_v2 = vld [vmem:[#allocation8 + $0xa78] sm:$0xff] }
 0x2e5   :  { %4853 = vmatprep.subr.bf16.mxu1 %v6092_v62  ;;  %v6137_v62 = vcombine.low %v1449_v49, %v1453_v25  ;;  %v6146_v0 = vcombine.high %v1457_v58, %v1461_v59  ;;  %v6145_v8 = vcombine.low %v1457_v58, %v1461_v59  ;;  %v1502_v49 = vld [vmem:[#allocation8 + $0xb78] sm:$0xff] }
 0x2e6   :  { %4682 = vmatpush1.bf16.msra.mxu0 %v6089_v4  ;;  %v6148_v4 = vcombine.high %v1458_v60, %v1462_v61  ;;  %v1510_v58 = vld [vmem:[#allocation8 + $0xbb8] sm:$0xff] }
 0x2e7   :  { %4854 = vmatpush1.bf16.msra.mxu1 %v6091_v5  ;;  %4683 = vmatprep.subr.bf16.mxu0 %v6098_v23  ;;  %v1465_v5 = vld [vmem:[#allocation8 + $0xa50] sm:$0xff] }
 0x2e8   :  { %4855 = vmatprep.subr.bf16.mxu1 %v6100_v1  ;;  %v1469_v23 = vld [vmem:[#allocation8 + $0xa70] sm:$0xff]  ;;  %v1466_v1 = vld [vmem:[#allocation8 + $0xa58] sm:$0xff] }
 0x2e9   :  { %v6154_v3 = vcombine.high %v1465_v5, %v1469_v23  ;;  %v6153_v12 = vcombine.low %v1465_v5, %v1469_v23  ;;  %v6155_v13 = vcombine.low %v1466_v1, %v1470_v2  ;;  %v1518_v5 = vld [vmem:[#allocation8 + $0xbf8] sm:$0xff] }
 0x2ea   :  { %4684 = vmatpush1.bf16.msra.mxu0 %v6097_v6  ;;  %v6156_v6 = vcombine.high %v1466_v1, %v1470_v2 }
 0x2eb   :  { %4856 = vmatpush1.bf16.msra.mxu1 %v6099_v18  ;;  %4685 = vmatprep.subr.bf16.mxu0 %v6106_v9  ;;  %v1473_v18 = vld [vmem:[#allocation8 + $0xa90] sm:$0xff] }
 0x2ec   :  { %4857 = vmatprep.subr.bf16.mxu1 %v6108_v10  ;;  %v1477_v9 = vld [vmem:[#allocation8 + $0xab0] sm:$0xff]  ;;  %v1474_v10 = vld [vmem:[#allocation8 + $0xa98] sm:$0xff] }
 0x2ed   :  { %v6162_v14 = vcombine.high %v1473_v18, %v1477_v9  ;;  %v6161_v27 = vcombine.low %v1473_v18, %v1477_v9  ;;  %v6163_v28 = vcombine.low %v1474_v10, %v1478_v11  ;;  %v1526_v18 = vld [vmem:[#allocation8 + $0xc38] sm:$0xff] }
 0x2ee   :  { %4686 = vmatpush1.bf16.msra.mxu0 %v6105_v48  ;;  %v6164_v48 = vcombine.high %v1474_v10, %v1478_v11 }
 0x2ef   :  { %4858 = vmatpush1.bf16.msra.mxu1 %v6107_v15  ;;  %4687 = vmatprep.subr.bf16.mxu0 %v6114_v16  ;;  %v1481_v15 = vld [vmem:[#allocation8 + $0xad0] sm:$0xff] }
 0x2f0   :  { %4859 = vmatprep.subr.bf16.mxu1 %v6116_v17  ;;  %v1485_v16 = vld [vmem:[#allocation8 + $0xaf0] sm:$0xff]  ;;  %v1482_v17 = vld [vmem:[#allocation8 + $0xad8] sm:$0xff] }
 0x2f1   :  { %v6170_v29 = vcombine.high %v1481_v15, %v1485_v16  ;;  %v6169_v41 = vcombine.low %v1481_v15, %v1485_v16  ;;  %v6171_v45 = vcombine.low %v1482_v17, %v1486_v26  ;;  %v1530_v15 = vld [vmem:[#allocation8 + $0xc58] sm:$0xff] }
 0x2f2   :  { %4688 = vmatpush1.bf16.msra.mxu0 %v6113_v33  ;;  %v6172_v33 = vcombine.high %v1482_v17, %v1486_v26  ;;  %v1534_v16 = vld [vmem:[#allocation8 + $0xc78] sm:$0xff] }
 0x2f3   :  { %4860 = vmatpush1.bf16.msra.mxu1 %v6115_v34  ;;  %4689 = vmatprep.subr.bf16.mxu0 %v6122_v36  ;;  %v1489_v34 = vld [vmem:[#allocation8 + $0xb10] sm:$0xff] }
 0x2f4   :  { %4861 = vmatprep.subr.bf16.mxu1 %v6124_v37  ;;  %v1493_v36 = vld [vmem:[#allocation8 + $0xb30] sm:$0xff]  ;;  %v1490_v37 = vld [vmem:[#allocation8 + $0xb18] sm:$0xff] }
 0x2f5   :  { %v6178_v42 = vcombine.high %v1489_v34, %v1493_v36  ;;  %v6177_v25 = vcombine.low %v1489_v34, %v1493_v36  ;;  %v6179_v50 = vcombine.low %v1490_v37, %v1494_v40  ;;  %v1542_v34 = vld [vmem:[#allocation8 + $0xcb8] sm:$0xff] }
 0x2f6   :  { %4690 = vmatpush1.bf16.msra.mxu0 %v6121_v43  ;;  %v6180_v43 = vcombine.high %v1490_v37, %v1494_v40  ;;  %v6219_v37 = vcombine.low %v1530_v15, %v1534_v16 }
 0x2f7   :  { %4862 = vmatpush1.bf16.msra.mxu1 %v6123_v44  ;;  %4691 = vmatprep.subr.bf16.mxu0 %v6130_v47  ;;  %v1497_v44 = vld [vmem:[#allocation8 + $0xb50] sm:$0xff] }
 0x2f8   :  { %4863 = vmatprep.subr.bf16.mxu1 %v6132_v22  ;;  %v1501_v47 = vld [vmem:[#allocation8 + $0xb70] sm:$0xff]  ;;  %v1498_v22 = vld [vmem:[#allocation8 + $0xb58] sm:$0xff] }
 0x2f9   :  { %v6186_v51 = vcombine.high %v1497_v44, %v1501_v47  ;;  %v6185_v59 = vcombine.low %v1497_v44, %v1501_v47  ;;  %v6187_v60 = vcombine.low %v1498_v22, %v1502_v49  ;;  %v1550_v44 = vld [vmem:[#allocation8 + $0xcf8] sm:$0xff] }
 0x2fa   :  { %4692 = vmatpush1.bf16.msra.mxu0 %v6129_v53  ;;  %v6188_v53 = vcombine.high %v1498_v22, %v1502_v49 }
 0x2fb   :  { %4864 = vmatpush1.bf16.msra.mxu1 %v6131_v54  ;;  %4693 = vmatprep.subr.bf16.mxu0 %v6138_v55  ;;  %v1505_v54 = vld [vmem:[#allocation8 + $0xb90] sm:$0xff] }
 0x2fc   :  { %4865 = vmatprep.subr.bf16.mxu1 %v6140_v57  ;;  %v1509_v55 = vld [vmem:[#allocation8 + $0xbb0] sm:$0xff]  ;;  %v1506_v57 = vld [vmem:[#allocation8 + $0xb98] sm:$0xff] }
 0x2fd   :  { %v6194_v61 = vcombine.high %v1505_v54, %v1509_v55  ;;  %v6193_v23 = vcombine.low %v1505_v54, %v1509_v55  ;;  %v6195_v1 = vcombine.low %v1506_v57, %v1510_v58 }
 0x2fe   :  { %4694 = vmatpush1.bf16.msra.mxu0 %v6137_v62  ;;  %v6196_v62 = vcombine.high %v1506_v57, %v1510_v58  ;;  %v1561_v58 = vld [vmem:[#allocation8 + $0xd50] sm:$0xff] }
 0x2ff   :  { %4866 = vmatpush1.bf16.msra.mxu1 %v6139_v63  ;;  %4695 = vmatprep.subr.bf16.mxu0 %v6146_v0  ;;  %v1513_v63 = vld [vmem:[#allocation8 + $0xbd0] sm:$0xff] }
 0x300   :  { %4867 = vmatprep.subr.bf16.mxu1 %v6148_v4  ;;  %v1517_v0 = vld [vmem:[#allocation8 + $0xbf0] sm:$0xff]  ;;  %v1514_v4 = vld [vmem:[#allocation8 + $0xbd8] sm:$0xff] }
 0x301   :  { %v6202_v2 = vcombine.high %v1513_v63, %v1517_v0  ;;  %v6201_v9 = vcombine.low %v1513_v63, %v1517_v0  ;;  %v6203_v10 = vcombine.low %v1514_v4, %v1518_v5  ;;  %v7083_v63 = vld [vmem:[#allocation10] sm:$0xff] }
 0x302   :  { %4696 = vmatpush1.bf16.msra.mxu0 %v6145_v8  ;;  %v6204_v8 = vcombine.high %v1514_v4, %v1518_v5 }
 0x303   :  { %4868 = vmatpush1.bf16.msra.mxu1 %v6147_v7  ;;  %4697 = vmatprep.subr.bf16.mxu0 %v6154_v3  ;;  %v1521_v7 = vld [vmem:[#allocation8 + $0xc10] sm:$0xff] }
 0x304   :  { %4869 = vmatprep.subr.bf16.mxu1 %v6156_v6  ;;  %v1525_v3 = vld [vmem:[#allocation8 + $0xc30] sm:$0xff]  ;;  %v1522_v6 = vld [vmem:[#allocation8 + $0xc18] sm:$0xff] }
 0x305   :  { %v6210_v11 = vcombine.high %v1521_v7, %v1525_v3  ;;  %v6211_v17 = vcombine.low %v1522_v6, %v1526_v18 }
 0x306   :  { %4698 = vmatpush1.bf16.msra.mxu0 %v6153_v12  ;;  %v6212_v12 = vcombine.high %v1522_v6, %v1526_v18  ;;  %v1656_v6 = vrot.slane %v7083_v63, %v255_v24  ;;  %v1664_v18 = vrot.slane %v7083_v63, %v263_v39 }
 0x307   :  { %4870 = vmatpush1.bf16.msra.mxu1 %v6155_v13  ;;  %4699 = vmatprep.subr.bf16.mxu0 %v6162_v14  ;;  %v1529_v13 = vld [vmem:[#allocation8 + $0xc50] sm:$0xff] }
 0x308   :  { %4871 = vmatprep.subr.bf16.mxu1 %v6164_v48  ;;  %v1533_v14 = vld [vmem:[#allocation8 + $0xc70] sm:$0xff]  ;;  %v6209_v48 = vcombine.low %v1521_v7, %v1525_v3  ;;  %v1570_v7 = vld [vmem:[#allocation8 + $0xd98] sm:$0xff] }
 0x309   :  { %v6218_v26 = vcombine.high %v1529_v13, %v1533_v14  ;;  %v6217_v36 = vcombine.low %v1529_v13, %v1533_v14  ;;  %v1574_v3 = vld [vmem:[#allocation8 + $0xdb8] sm:$0xff] }
 0x30a   :  { %4700 = vmatpush1.bf16.msra.mxu0 %v6161_v27  ;;  %v1537_v27 = vld [vmem:[#allocation8 + $0xc90] sm:$0xff]  ;;  %v6260_v14 = vcombine.high %v1570_v7, %v1574_v3 }
 0x30b   :  { %4872 = vmatpush1.bf16.msra.mxu1 %v6163_v28  ;;  %4701 = vmatprep.subr.bf16.mxu0 %v6170_v29  ;;  %v1541_v28 = vld [vmem:[#allocation8 + $0xcb0] sm:$0xff]  ;;  %v6220_v29 = vcombine.high %v1530_v15, %v1534_v16 }
 0x30c   :  { %4873 = vmatprep.subr.bf16.mxu1 %v6172_v33  ;;  %v1538_v33 = vld [vmem:[#allocation8 + $0xc98] sm:$0xff]  ;;  %v6226_v40 = vcombine.high %v1537_v27, %v1541_v28  ;;  %v6225_v47 = vcombine.low %v1537_v27, %v1541_v28 }
 0x30d   :  { %v1582_v27 = vld [vmem:[#allocation8 + $0xdf8] sm:$0xff] }
 0x30e   :  { %4702 = vmatpush1.bf16.msra.mxu0 %v6169_v41  ;;  %v6228_v41 = vcombine.high %v1538_v33, %v1542_v34 }
 0x30f   :  { %4874 = vmatpush1.bf16.msra.mxu1 %v6171_v45  ;;  %4703 = vmatprep.subr.bf16.mxu0 %v6178_v42  ;;  %v1545_v45 = vld [vmem:[#allocation8 + $0xcd0] sm:$0xff] }
 0x310   :  { %4875 = vmatprep.subr.bf16.mxu1 %v6180_v43  ;;  %v1549_v42 = vld [vmem:[#allocation8 + $0xcf0] sm:$0xff]  ;;  %v1546_v43 = vld [vmem:[#allocation8 + $0xcd8] sm:$0xff] }
 0x311   :  { %v6234_v22 = vcombine.high %v1545_v45, %v1549_v42  ;;  %v6236_v49 = vcombine.high %v1546_v43, %v1550_v44  ;;  %v6235_v54 = vcombine.low %v1546_v43, %v1550_v44 }
 0x312   :  { %4704 = vmatpush1.bf16.msra.mxu0 %v6177_v25  ;;  %v1553_v25 = vld [vmem:[#allocation8 + $0xd10] sm:$0xff] }
 0x313   :  { %4876 = vmatpush1.bf16.msra.mxu1 %v6179_v50  ;;  %4705 = vmatprep.subr.bf16.mxu0 %v6186_v51  ;;  %v1557_v50 = vld [vmem:[#allocation8 + $0xd30] sm:$0xff]  ;;  %v1554_v51 = vld [vmem:[#allocation8 + $0xd18] sm:$0xff] }
 0x314   :  { %4877 = vmatprep.subr.bf16.mxu1 %v6188_v53  ;;  %v1558_v53 = vld [vmem:[#allocation8 + $0xd38] sm:$0xff]  ;;  %v6242_v55 = vcombine.high %v1553_v25, %v1557_v50 }
 0x315   :  { %v6244_v57 = vcombine.high %v1554_v51, %v1558_v53  ;;  %v6243_v0 = vcombine.low %v1554_v51, %v1558_v53 }
 0x316   :  { %4706 = vmatpush1.bf16.msra.mxu0 %v6185_v59  ;;  %v1565_v59 = vld [vmem:[#allocation8 + $0xd70] sm:$0xff] }
 0x317   :  { %4878 = vmatpush1.bf16.msra.mxu1 %v6187_v60  ;;  %4707 = vmatprep.subr.bf16.mxu0 %v6194_v61  ;;  %v1562_v60 = vld [vmem:[#allocation8 + $0xd58] sm:$0xff]  ;;  %v6250_v4 = vcombine.high %v1561_v58, %v1565_v59 }
 0x318   :  { %4879 = vmatprep.subr.bf16.mxu1 %v6196_v62  ;;  %v1566_v61 = vld [vmem:[#allocation8 + $0xd78] sm:$0xff]  ;;  %v6241_v62 = vcombine.low %v1553_v25, %v1557_v50 }
 0x319   :  { %v6252_v5 = vcombine.high %v1562_v60, %v1566_v61 }
 0x31a   :  { %4708 = vmatpush1.bf16.msra.mxu0 %v6193_v23  ;;  %v1569_v23 = vld [vmem:[#allocation8 + $0xd90] sm:$0xff] }
 0x31b   :  { %4880 = vmatpush1.bf16.msra.mxu1 %v6195_v1  ;;  %4709 = vmatprep.subr.bf16.mxu0 %v6202_v2  ;;  %v1573_v1 = vld [vmem:[#allocation8 + $0xdb0] sm:$0xff]  ;;  %v1652_v2 = vrot.slane %v7083_v63, %v251_v21 }
 0x31c   :  { %4881 = vmatprep.subr.bf16.mxu1 %v6204_v8  ;;  %v1660_v8 = vrot.slane %v7083_v63, %v259_v35  ;;  %v6258_v21 = vcombine.high %v1569_v23, %v1573_v1  ;;  %v6257_v24 = vcombine.low %v1569_v23, %v1573_v1  ;;  %v1593_v23 = vld [vmem:[#allocation8 + $0xe50] sm:$0xff] }
 0x31d   :  { %v1597_v1 = vld [vmem:[#allocation8 + $0xe70] sm:$0xff] }
 0x31e   :  { %4710 = vmatpush1.bf16.msra.mxu0 %v6201_v9  ;;  %v6249_v9 = vcombine.low %v1561_v58, %v1565_v59 }
 0x31f   :  { %4882 = vmatpush1.bf16.msra.mxu1 %v6203_v10  ;;  %4722 = vmatprep.subr.bf16.mxu0 %v6210_v11  ;;  %v6251_v10 = vcombine.low %v1562_v60, %v1566_v61  ;;  %v1577_v11 = vld [vmem:[#allocation8 + $0xdd0] sm:$0xff] }
 0x320   :  { %4894 = vmatprep.subr.bf16.mxu1 %v6212_v12  ;;  %v1581_v12 = vld [vmem:[#allocation8 + $0xdf0] sm:$0xff] }
 0x321   :  { %4712 = vmatmul.mubr.bf16.vlgmr.msra.gmra.mrb[12].mxu0 %v7045_v46 }
 0x322   :  { %4884 = vmatmul.mubr.bf16.vlgmr.msra.gmra.mrb[12].mxu1 %v7045_v46  ;;  %4723 = vmatpush1.bf16.msra.mxu0 %v6209_v48  ;;  %v6227_v46 = vcombine.low %v1538_v33, %v1542_v34  ;;  %v6259_v34 = vcombine.low %v1570_v7, %v1574_v3 }
 0x323   :  { %4754 = vmatprep.mubr.bf16.mxu0 %v7061_v31  ;;  %4895 = vmatpush1.bf16.msra.mxu1 %v6211_v17 }
 0x324   :  { %4926 = vmatprep.mubr.bf16.mxu1 %v7061_v31  ;;  %4724 = vmatprep.subr.bf16.mxu0 %v6218_v26  ;;  %v6233_v31 = vcombine.low %v1545_v45, %v1549_v42  ;;  %v1578_v26 = vld [vmem:[#allocation8 + $0xdd8] sm:$0xff]  ;;  %v6266_v42 = vcombine.high %v1577_v11, %v1581_v12 }
 0x325   :  { %4896 = vmatprep.subr.bf16.mxu1 %v6220_v29 }
 0x326   :  { %4725 = vmatpush1.bf16.msra.mxu0 %v6217_v36  ;;  %v6265_v36 = vcombine.low %v1577_v11, %v1581_v12  ;;  %v1606_v11 = vld [vmem:[#allocation8 + $0xeb8] sm:$0xff]  ;;  %v6281_v12 = vcombine.low %v1593_v23, %v1597_v1 }
 0x327   :  { %4897 = vmatpush1.bf16.msra.mxu1 %v6219_v37  ;;  %4726 = vmatprep.subr.bf16.mxu0 %v6226_v40 }
 0x328   :  { %4898 = vmatprep.subr.bf16.mxu1 %v6228_v41 }
 0x32a   :  { %4727 = vmatpush1.bf16.msra.mxu0 %v6225_v47  ;;  %v6267_v47 = vcombine.low %v1578_v26, %v1582_v27 }
 0x32b   :  { %4899 = vmatpush1.bf16.msra.mxu1 %v6227_v46  ;;  %4728 = vmatprep.subr.bf16.mxu0 %v6234_v22  ;;  %v6268_v46 = vcombine.high %v1578_v26, %v1582_v27  ;;  %v1585_v22 = vld [vmem:[#allocation8 + $0xe10] sm:$0xff] }
 0x32c   :  { %4900 = vmatprep.subr.bf16.mxu1 %v6236_v49  ;;  %v1589_v49 = vld [vmem:[#allocation8 + $0xe30] sm:$0xff] }
 0x32d   :  { %v6273_v7 = vcombine.low %v1585_v22, %v1589_v49 }
 0x32e   :  { %4729 = vmatpush1.bf16.msra.mxu0 %v6233_v31  ;;  %v1586_v31 = vld [vmem:[#allocation8 + $0xe18] sm:$0xff] }
 0x32f   :  { %4901 = vmatpush1.bf16.msra.mxu1 %v6235_v54  ;;  %4730 = vmatprep.subr.bf16.mxu0 %v6242_v55  ;;  %v1590_v54 = vld [vmem:[#allocation8 + $0xe38] sm:$0xff] }
 0x330   :  { %4902 = vmatprep.subr.bf16.mxu1 %v6244_v57  ;;  %v6275_v3 = vcombine.low %v1586_v31, %v1590_v54 }
 0x332   :  { %4731 = vmatpush1.bf16.msra.mxu0 %v6241_v62  ;;  %v6274_v62 = vcombine.high %v1585_v22, %v1589_v49 }
 0x333   :  { %4903 = vmatpush1.bf16.msra.mxu1 %v6243_v0  ;;  %4732 = vmatprep.subr.bf16.mxu0 %v6250_v4 }
 0x334   :  { %v4412_v13 = vpop.f32.mrb[8].mxu0  ;;  %v4584_v35 = vpop.f32.mrb[8].mxu1  ;;  %4904 = vmatprep.subr.bf16.mxu1 %v6252_v5  ;;  %v6276_v5 = vcombine.high %v1586_v31, %v1590_v54 }
 0x335   :  { %v6486_v48 = vadd.f32 %v4412_v13, %v1652_v2  ;;  %v6490_v15 = vadd.f32 %v4584_v35, %v1660_v8  ;;  %v4414_v16 = vpop.f32.mrb[9].mxu0  ;;  %v4586_v17 = vpop.f32.mrb[9].mxu1 }
 0x336   :  { %v6487_v28 = vadd.f32 %v4414_v16, %v1656_v6  ;;  %v6491_v39 = vadd.f32 %v4586_v17, %v1664_v18  ;;  %v4416_v29 = vpop.f32.mrb[10].mxu0  ;;  %v4588_v33 = vpop.f32.mrb[10].mxu1  ;;  %4733 = vmatpush1.bf16.msra.mxu0 %v6249_v9  ;;  %v1601_v9 = vld [vmem:[#allocation8 + $0xe90] sm:$0xff]  ;;  %v1610_v16 = vld [vmem:[#allocation8 + $0xed8] sm:$0xff] }
 0x337   :  { %v6488_v37 = vadd.f32 %v4416_v29, %v1652_v2  ;;  %v6492_v40 = vadd.f32 %v4588_v33, %v1660_v8  ;;  %4905 = vmatpush1.bf16.msra.mxu1 %v6251_v10  ;;  %v4418_v41 = vpop.f32.mrb[11].mxu0  ;;  %v4590_v45 = vpop.f32.mrb[11].mxu1  ;;  %4734 = vmatprep.subr.bf16.mxu0 %v6258_v21  ;;  %v4937_v25 = vmax.f32 %v6486_v48, 0.0  ;;  %v4939_v50 = vmax.f32 %v6490_v15, 0.0  ;;  %v1594_v2 = vld [vmem:[#allocation8 + $0xe58] sm:$0xff]  ;;  %v1605_v10 = vld [vmem:[#allocation8 + $0xeb0] sm:$0xff] }
 0x338   :  { %v6489_v43 = vadd.f32 %v4418_v41, %v1656_v6  ;;  %v6493_v44 = vadd.f32 %v4590_v45, %v1664_v18  ;;  %4906 = vmatprep.subr.bf16.mxu1 %v6260_v14  ;;  %v4938_v55 = vmax.f32 %v6487_v28, 0.0  ;;  %v4940_v57 = vmax.f32 %v6491_v39, 0.0  ;;  %v1598_v8 = vld [vmem:[#allocation8 + $0xe78] sm:$0xff]  ;;  %v1609_v48 = vld [vmem:[#allocation8 + $0xed0] sm:$0xff] }
 0x339   :  { %v4945_v51 = vmax.f32 %v6488_v37, 0.0  ;;  %v4947_v53 = vmax.f32 %v6492_v40, 0.0  ;;  %v6282_v6 = vcombine.high %v1593_v23, %v1597_v1  ;;  %v6284_v18 = vcombine.high %v1594_v2, %v1598_v8  ;;  %v1602_v21 = vld [vmem:[#allocation8 + $0xe98] sm:$0xff]  ;;  %v1613_v15 = vld [vmem:[#allocation8 + $0xef0] sm:$0xff] }
 0x33a   :  { %v4946_v58 = vmax.f32 %v6489_v43, 0.0  ;;  %v4948_v59 = vmax.f32 %v6493_v44, 0.0  ;;  %4735 = vmatpush1.bf16.msra.mxu0 %v6257_v24  ;;  %v6283_v13 = vcombine.low %v1594_v2, %v1598_v8  ;;  %v6290_v35 = vcombine.high %v1601_v9, %v1605_v10  ;;  %v1614_v17 = vld [vmem:[#allocation8 + $0xef8] sm:$0xff]  ;;  %v1617_v39 = vld [vmem:[#allocation8 + $0xf10] sm:$0xff] }
 0x33b   :  { %v7097_v60 = vpack.c.bf16 %v4945_v51, %v4937_v25  ;;  %v7099_v61 = vpack.c.bf16 %v4947_v53, %v4939_v50  ;;  %4907 = vmatpush1.bf16.msra.mxu1 %v6259_v34  ;;  %4736 = vmatprep.subr.bf16.mxu0 %v6266_v42  ;;  %v6292_v14 = vcombine.high %v1602_v21, %v1606_v11  ;;  %v1621_v29 = vld [vmem:[#allocation8 + $0xf30] sm:$0xff]  ;;  %v1618_v33 = vld [vmem:[#allocation8 + $0xf18] sm:$0xff] }
 0x33c   :  { %v7101_v0 = vpack.c.bf16 %v4946_v58, %v4938_v55  ;;  %v7103_v4 = vpack.c.bf16 %v4948_v59, %v4940_v57  ;;  %4908 = vmatprep.subr.bf16.mxu1 %v6268_v46  ;;  %v6289_v24 = vcombine.low %v1601_v9, %v1605_v10  ;;  %v6291_v26 = vcombine.low %v1602_v21, %v1606_v11  ;;  %v1622_v34 = vld [vmem:[#allocation8 + $0xf38] sm:$0xff]  ;;  %v1625_v45 = vld [vmem:[#allocation8 + $0xf50] sm:$0xff]  ;;  %v6569_v9 = vld [vmem:[#allocation11] sm:$0xff]  }
 0x33d   :  { %v6298_v27 = vcombine.high %v1609_v48, %v1613_v15  ;;  %v6300_v28 = vcombine.high %v1610_v16, %v1614_v17  ;;  %v6299_v37 = vcombine.low %v1610_v16, %v1614_v17  ;;  %v6306_v40 = vcombine.high %v1617_v39, %v1621_v29  ;;  %v1629_v42 = vld [vmem:[#allocation8 + $0xf70] sm:$0xff]  ;;  %v1626_v43 = vld [vmem:[#allocation8 + $0xf58] sm:$0xff]  ;;  %v6570_v10 = vld [vmem:[#allocation11 + $0x80] sm:$0xff]  }
 0x33e   :  { %4737 = vmatpush1.bf16.msra.mxu0 %v6265_v36  ;;  %v6297_v36 = vcombine.low %v1609_v48, %v1613_v15  ;;  %v6308_v41 = vcombine.high %v1618_v33, %v1622_v34  ;;  %v1630_v44 = vld [vmem:[#allocation8 + $0xf78] sm:$0xff]  ;;  %v6307_v46 = vcombine.low %v1618_v33, %v1622_v34  ;;  %v6314_v22 = vcombine.high %v1625_v45, %v1629_v42  ;;  %v1633_v25 = vld [vmem:[#allocation8 + $0xf90] sm:$0xff]  ;;  %v6579_v16 = vld [vmem:[#allocation11 + $0x58] sm:$0xff]  }
 0x33f   :  { %4909 = vmatpush1.bf16.msra.mxu1 %v6267_v47  ;;  %4738 = vmatprep.subr.bf16.mxu0 %v6274_v62  ;;  %v6305_v47 = vcombine.low %v1617_v39, %v1621_v29  ;;  %v6316_v49 = vcombine.high %v1626_v43, %v1630_v44  ;;  %v1637_v50 = vld [vmem:[#allocation8 + $0xfb0] sm:$0xff]  ;;  %v1634_v51 = vld [vmem:[#allocation8 + $0xf98] sm:$0xff]  ;;  %v6313_v31 = vcombine.low %v1625_v45, %v1629_v42  ;;  %v6581_v17 = vld [vmem:[#allocation11 + $0x18] sm:$0xff]  }
 0x340   :  { %4910 = vmatprep.subr.bf16.mxu1 %v6276_v5  ;;  %v1638_v53 = vld [vmem:[#allocation8 + $0xfb8] sm:$0xff]  ;;  %v6315_v54 = vcombine.low %v1626_v43, %v1630_v44  ;;  %v6322_v55 = vcombine.high %v1633_v25, %v1637_v50  ;;  %v1641_v58 = vld [vmem:[#allocation8 + $0xfd0] sm:$0xff]  ;;  %v6321_v23 = vcombine.low %v1633_v25, %v1637_v50  ;;  %v6596_v45 = vld [vmem:[#allocation11 + $0xf8] sm:$0xff]  }
 0x341   :  { %v6324_v57 = vcombine.high %v1634_v51, %v1638_v53  ;;  %v1645_v59 = vld [vmem:[#allocation8 + $0xff0] sm:$0xff]  ;;  %v1642_v62 = vld [vmem:[#allocation8 + $0xfd8] sm:$0xff]  ;;  %v6323_v1 = vcombine.low %v1634_v51, %v1638_v53  ;;  %v6597_v42 = vld [vmem:[#allocation11 + $0x38] sm:$0xff]  }
 0x342   :  { %4739 = vmatpush1.bf16.msra.mxu0 %v6273_v7  ;;  %v1646_v5 = vld [vmem:[#allocation8 + $0xff8] sm:$0xff]  ;;  %v6330_v2 = vcombine.high %v1641_v58, %v1645_v59  ;;  %v6329_v7 = vcombine.low %v1641_v58, %v1645_v59  ;;  %v6571_v21 = vld [vmem:[#allocation11 + $0x48] sm:$0xff]   ;;  %v6598_v43 = vld [vmem:[#allocation11 + $0xb8] sm:$0xff]  }
 0x343   :  { %4911 = vmatpush1.bf16.msra.mxu1 %v6275_v3  ;;  %4740 = vmatprep.subr.bf16.mxu0 %v6282_v6  ;;  %v6332_v8 = vcombine.high %v1642_v62, %v1646_v5  ;;  %v6331_v3 = vcombine.low %v1642_v62, %v1646_v5  ;;  %v6567_v6 = vld [vmem:[#allocation11 + $0x40] sm:$0xff]   ;;  %v6572_v11 = vld [vmem:[#allocation11 + $0xc8] sm:$0xff]   ;;  %v6577_v48 = vld [vmem:[#allocation11 + $0x10] sm:$0xff]  }
 0x344   :  { %4912 = vmatprep.subr.bf16.mxu1 %v6284_v18  ;;  %v6568_v18 = vld [vmem:[#allocation11 + $0xc0] sm:$0xff]   ;;  %v6578_v15 = vld [vmem:[#allocation11 + $0x90] sm:$0xff]   ;;  %v6588_v39 = vld [vmem:[#allocation11 + $0xe8] sm:$0xff]  }
 0x345   :  { %v6589_v29 = vld [vmem:[#allocation11 + $0x28] sm:$0xff]   ;;  %v6591_v34 = vld [vmem:[#allocation11 + $0x70] sm:$0xff]   ;;  %v6599_v44 = vld [vmem:[#allocation11 + $0x140] sm:$0xff]  }
 0x346   :  { %4741 = vmatpush1.bf16.msra.mxu0 %v6281_v12  ;;  %v6573_v12 = vld [vmem:[#allocation11 + $0x8] sm:$0xff]   ;;  %v6607_v53 = vld [vmem:[#allocation11 + $0x150] sm:$0xff]   ;;  %v6612_v58 = vld [vmem:[#allocation11 + $0x1d8] sm:$0xff]  }
 0x347   :  { %4913 = vmatpush1.bf16.msra.mxu1 %v6283_v13  ;;  %4742 = vmatprep.subr.bf16.mxu0 %v6290_v35  ;;  %v6574_v13 = vld [vmem:[#allocation11 + $0x88] sm:$0xff]   ;;  %v6575_v35 = vld [vmem:[#allocation11 + $0x50] sm:$0xff]   ;;  %v6615_v59 = vld [vmem:[#allocation11 + $0x160] sm:$0xff]  }
 0x348   :  { %4914 = vmatprep.subr.bf16.mxu1 %v6292_v14  ;;  %v6576_v14 = vld [vmem:[#allocation11 + $0xd0] sm:$0xff]   ;;  %v6590_v33 = vld [vmem:[#allocation11 + $0xa8] sm:$0xff]   ;;  %v6616_v62 = vld [vmem:[#allocation11 + $0x1e0] sm:$0xff]  }
 0x349   :  { %v6604_v25 = vld [vmem:[#allocation11 + $0x1c8] sm:$0xff]   ;;  %v6617_v5 = vld [vmem:[#allocation11 + $0x120] sm:$0xff]  }
 0x34a   :  { %4743 = vmatpush1.bf16.msra.mxu0 %v6289_v24  ;;  %v6583_v24 = vld [vmem:[#allocation11 + $0x60] sm:$0xff]   ;;  %v6605_v50 = vld [vmem:[#allocation11 + $0x108] sm:$0xff]  }
 0x34b   :  { %4915 = vmatpush1.bf16.msra.mxu1 %v6291_v26  ;;  %4744 = vmatprep.subr.bf16.mxu0 %v6298_v27  ;;  %v6584_v26 = vld [vmem:[#allocation11 + $0xe0] sm:$0xff]   ;;  %v6606_v51 = vld [vmem:[#allocation11 + $0x188] sm:$0xff]  }
 0x34c   :  { %4916 = vmatprep.subr.bf16.mxu1 %v6300_v28  ;;  %v6586_v27 = vld [vmem:[#allocation11 + $0xa0] sm:$0xff]   ;;  %v6587_v28 = vld [vmem:[#allocation11 + $0x68] sm:$0xff]  }
 0x34e   :  { %4745 = vmatpush1.bf16.msra.mxu0 %v6297_v36  ;;  %v6592_v36 = vld [vmem:[#allocation11 + $0xf0] sm:$0xff]  }
 0x34f   :  { %4917 = vmatpush1.bf16.msra.mxu1 %v6299_v37  ;;  %4746 = vmatprep.subr.bf16.mxu0 %v6306_v40  ;;  %v6593_v37 = vld [vmem:[#allocation11 + $0x30] sm:$0xff]  }
 0x350   :  { %4918 = vmatprep.subr.bf16.mxu1 %v6308_v41  ;;  %v6594_v40 = vld [vmem:[#allocation11 + $0xb0] sm:$0xff]   ;;  %v6595_v41 = vld [vmem:[#allocation11 + $0x78] sm:$0xff]  }
 0x352   :  { %4747 = vmatpush1.bf16.msra.mxu0 %v6305_v47  ;;  %v6600_v47 = vld [vmem:[#allocation11 + $0x1c0] sm:$0xff]  }
 0x353   :  { %4919 = vmatpush1.bf16.msra.mxu1 %v6307_v46  ;;  %4748 = vmatprep.subr.bf16.mxu0 %v6314_v22  ;;  %v6601_v46 = vld [vmem:[#allocation11 + $0x100] sm:$0xff]  }
 0x354   :  { %4920 = vmatprep.subr.bf16.mxu1 %v6316_v49  ;;  %v6602_v22 = vld [vmem:[#allocation11 + $0x180] sm:$0xff]   ;;  %v6603_v49 = vld [vmem:[#allocation11 + $0x148] sm:$0xff]  }
 0x356   :  { %4749 = vmatpush1.bf16.msra.mxu0 %v6313_v31  ;;  %v6608_v31 = vld [vmem:[#allocation11 + $0x1d0] sm:$0xff]  }
 0x357   :  { %4921 = vmatpush1.bf16.msra.mxu1 %v6315_v54  ;;  %4750 = vmatprep.subr.bf16.mxu0 %v6322_v55  ;;  %v6609_v54 = vld [vmem:[#allocation11 + $0x110] sm:$0xff]  }
 0x358   :  { %4922 = vmatprep.subr.bf16.mxu1 %v6324_v57  ;;  %v6610_v55 = vld [vmem:[#allocation11 + $0x190] sm:$0xff]   ;;  %v6611_v57 = vld [vmem:[#allocation11 + $0x158] sm:$0xff]  }
 0x35a   :  { %4751 = vmatpush1.bf16.msra.mxu0 %v6321_v23  ;;  %v6618_v23 = vld [vmem:[#allocation11 + $0x1a0] sm:$0xff]  }
 0x35b   :  { %4923 = vmatpush1.bf16.msra.mxu1 %v6323_v1  ;;  %4752 = vmatprep.subr.bf16.mxu0 %v6330_v2  ;;  %v6619_v1 = vld [vmem:[#allocation11 + $0x168] sm:$0xff]  }
 0x35c   :  { %4924 = vmatprep.subr.bf16.mxu1 %v6332_v8  ;;  %v6620_v2 = vld [vmem:[#allocation11 + $0x1e8] sm:$0xff]  }
 0x35d   :  { %v6621_v8 = vld [vmem:[#allocation11 + $0x128] sm:$0xff]  }
 0x35e   :  { %4753 = vmatpush1.bf16.msra.mxu0 %v6329_v7  ;;  %v6622_v7 = vld [vmem:[#allocation11 + $0x1a8] sm:$0xff]  }
 0x35f   :  { %4925 = vmatpush1.bf16.msra.mxu1 %v6331_v3  ;;  %6398 = vmatprep.subr.bf16.mxu0 %v6567_v6  ;;  %v6623_v3 = vld [vmem:[#allocation11 + $0x170] sm:$0xff]  }
 0x360   :  { %6420 = vmatprep.subr.bf16.mxu1 %v6568_v18  ;;  %v6624_v6 = vld [vmem:[#allocation11 + $0x1f0] sm:$0xff]  }
 0x361   :  { %4755 = vmatmul.mubr.bf16.vlgmr.msra.gmra.mrb[12].mxu0 %v7059_v30  ;;  %v6625_v18 = vld [vmem:[#allocation11 + $0x130] sm:$0xff]  }
 0x362   :  { %4927 = vmatmul.mubr.bf16.vlgmr.msra.gmra.mrb[12].mxu1 %v7059_v30  ;;  %6399 = vmatpush3.bf16.msra.mxu0 %v6569_v9  ;;  %v6580_v30 = vld [vmem:[#allocation11 + $0xd8] sm:$0xff]   ;;  %v6626_v9 = vld [vmem:[#allocation11 + $0x1b0] sm:$0xff]  }
 0x363   :  { %5512 = vmatprep.mubr.bf16.mxu0 %v7101_v0  ;;  %6421 = vmatpush3.bf16.msra.mxu1 %v6570_v10  ;;  %v6582_v0 = vld [vmem:[#allocation11 + $0x98] sm:$0xff]  }
 0x364   :  { %5553 = vmatprep.mubr.bf16.mxu1 %v7103_v4  ;;  %6400 = vmatprep.subr.bf16.mxu0 %v6571_v21  ;;  %v6585_v4 = vld [vmem:[#allocation11 + $0x20] sm:$0xff]   ;;  %v6627_v10 = vld [vmem:[#allocation11 + $0x178] sm:$0xff]  }
 0x365   :  { %6422 = vmatprep.subr.bf16.mxu1 %v6572_v11  ;;  %v6628_v21 = vld [vmem:[#allocation11 + $0x1f8] sm:$0xff]  }
 0x366   :  { %6401 = vmatpush3.bf16.msra.mxu0 %v6573_v12  ;;  %v6629_v11 = vld [vmem:[#allocation11 + $0x138] sm:$0xff]  }
 0x367   :  { %6423 = vmatpush3.bf16.msra.mxu1 %v6574_v13  ;;  %6402 = vmatprep.subr.bf16.mxu0 %v6575_v35  ;;  %v6630_v12 = vld [vmem:[#allocation11 + $0x1b8] sm:$0xff]   ;;  %v1668_v13 = vrot.slane %v7083_v63, %v267_v52  ;;  %v1676_v35 = vrot.slane %v7083_v63, %v275_v32 }
 0x368   :  { %6424 = vmatprep.subr.bf16.mxu1 %v6576_v14  ;;  %v1672_v14 = vrot.slane %v7083_v63, %v271_v56 }
 0x36a   :  { %6403 = vmatpush3.bf16.msra.mxu0 %v6577_v48  ;;  %v1680_v48 = vrot.slane %v7083_v63, %v279_v38 }
 0x36b   :  { %6425 = vmatpush3.bf16.msra.mxu1 %v6578_v15  ;;  %6404 = vmatprep.subr.bf16.mxu0 %v6579_v16 }
 0x36c   :  { %6426 = vmatprep.subr.bf16.mxu1 %v6580_v30 }
 0x36e   :  { %6405 = vmatpush3.bf16.msra.mxu0 %v6581_v17 }
 0x36f   :  { %6427 = vmatpush3.bf16.msra.mxu1 %v6582_v0  ;;  %6406 = vmatprep.subr.bf16.mxu0 %v6583_v24 }
 0x370   :  { %6428 = vmatprep.subr.bf16.mxu1 %v6584_v26 }
 0x372   :  { %6407 = vmatpush3.bf16.msra.mxu0 %v6585_v4 }
 0x373   :  { %6429 = vmatpush3.bf16.msra.mxu1 %v6586_v27  ;;  %6408 = vmatprep.subr.bf16.mxu0 %v6587_v28 }
 0x374   :  { %6430 = vmatprep.subr.bf16.mxu1 %v6588_v39 }
 0x376   :  { %6409 = vmatpush3.bf16.msra.mxu0 %v6589_v29 }
 0x377   :  { %6431 = vmatpush3.bf16.msra.mxu1 %v6590_v33  ;;  %6410 = vmatprep.subr.bf16.mxu0 %v6591_v34 }
 0x378   :  { %6432 = vmatprep.subr.bf16.mxu1 %v6592_v36 }
 0x37a   :  { %6411 = vmatpush3.bf16.msra.mxu0 %v6593_v37 }
 0x37b   :  { %6433 = vmatpush3.bf16.msra.mxu1 %v6594_v40  ;;  %6412 = vmatprep.subr.bf16.mxu0 %v6595_v41 }
 0x37c   :  { %6434 = vmatprep.subr.bf16.mxu1 %v6596_v45 }
 0x37e   :  { %6413 = vmatpush3.bf16.msra.mxu0 %v6597_v42 }
 0x37f   :  { %6435 = vmatpush3.bf16.msra.mxu1 %v6598_v43  ;;  %6442 = vmatprep.subr.bf16.mxu0 %v6599_v44 }
 0x380   :  { %6464 = vmatprep.subr.bf16.mxu1 %v6600_v47 }
 0x381   :  { %5513 = vmatmul.mubr.bf16.vlgmr.msra.gmra.mrb[16].mxu0 %v7097_v60  ;;  %v6613_v60 = vld [vmem:[#allocation11 + $0x118] sm:$0xff]  }
 0x382   :  { %5554 = vmatmul.mubr.bf16.vlgmr.msra.gmra.mrb[16].mxu1 %v7099_v61  ;;  %6443 = vmatpush3.bf16.msra.mxu0 %v6601_v46  ;;  %v6614_v61 = vld [vmem:[#allocation11 + $0x198] sm:$0xff]  }
 0x383   :  { %6465 = vmatpush3.bf16.msra.mxu1 %v6602_v22  ;;  %6444 = vmatprep.subr.bf16.mxu0 %v6603_v49  ;;  %v6333_v22 = vld [vmem:[#allocation13] ss:$0 sm:$0xff] }
 0x384   :  { %6466 = vmatprep.subr.bf16.mxu1 %v6604_v25 }
 0x386   :  { %6445 = vmatpush3.bf16.msra.mxu0 %v6605_v50 }
 0x387   :  { %6467 = vmatpush3.bf16.msra.mxu1 %v6606_v51  ;;  %6446 = vmatprep.subr.bf16.mxu0 %v6607_v53 }
 0x388   :  { %6468 = vmatprep.subr.bf16.mxu1 %v6608_v31 }
 0x38a   :  { %6447 = vmatpush3.bf16.msra.mxu0 %v6609_v54 }
 0x38b   :  { %6469 = vmatpush3.bf16.msra.mxu1 %v6610_v55  ;;  %6448 = vmatprep.subr.bf16.mxu0 %v6611_v57 }
 0x38c   :  { %6470 = vmatprep.subr.bf16.mxu1 %v6612_v58 }
 0x38e   :  { %6449 = vmatpush3.bf16.msra.mxu0 %v6613_v60 }
 0x38f   :  { %6471 = vmatpush3.bf16.msra.mxu1 %v6614_v61  ;;  %6450 = vmatprep.subr.bf16.mxu0 %v6615_v59 }
 0x390   :  { %6472 = vmatprep.subr.bf16.mxu1 %v6616_v62 }
 0x392   :  { %6451 = vmatpush3.bf16.msra.mxu0 %v6617_v5 }
 0x393   :  { %6473 = vmatpush3.bf16.msra.mxu1 %v6618_v23  ;;  %6452 = vmatprep.subr.bf16.mxu0 %v6619_v1 }
 0x394   :  { %6474 = vmatprep.subr.bf16.mxu1 %v6620_v2  ;;  %v5645_v2 = vand.u32 127, %v249_v19 }
 0x396   :  { %6453 = vmatpush3.bf16.msra.mxu0 %v6621_v8  ;;  %vm5646_vm0 = vcmp.lt.s32.totalorder %v5645_v2, 21 }
 0x397   :  { %6475 = vmatpush3.bf16.msra.mxu1 %v6622_v7  ;;  %6454 = vmatprep.subr.bf16.mxu0 %v6623_v3 }
 0x398   :  { %6476 = vmatprep.subr.bf16.mxu1 %v6624_v6 }
 0x39a   :  { %6455 = vmatpush3.bf16.msra.mxu0 %v6625_v18 }
 0x39b   :  { %6477 = vmatpush3.bf16.msra.mxu1 %v6626_v9  ;;  %6456 = vmatprep.subr.bf16.mxu0 %v6627_v10 }
 0x39c   :  { %6478 = vmatprep.subr.bf16.mxu1 %v6628_v21 }
 0x39e   :  { %6457 = vmatpush3.bf16.msra.mxu0 %v6629_v11 }
 0x39f   :  { %6479 = vmatpush3.bf16.msra.mxu1 %v6630_v12 }
 0x434   :  { %v4756_v15 = vpop.f32.mrb[12].mxu0 }
 0x435   :  { %v6494_v16 = vadd.f32 %v4756_v15, %v1668_v13  ;;  %v4928_v30 = vpop.f32.mrb[12].mxu1  ;;  %v4758_v17 = vpop.f32.mrb[13].mxu0 }
 0x436   :  { %v6498_v0 = vadd.f32 %v4928_v30, %v1676_v35  ;;  %v6495_v24 = vadd.f32 %v4758_v17, %v1672_v14  ;;  %v4930_v26 = vpop.f32.mrb[13].mxu1  ;;  %v4760_v52 = vpop.f32.mrb[14].mxu0 }
 0x437   :  { %v6499_v4 = vadd.f32 %v4930_v26, %v1680_v48  ;;  %v6496_v27 = vadd.f32 %v4760_v52, %v1668_v13  ;;  %v4932_v28 = vpop.f32.mrb[14].mxu1  ;;  %v4762_v32 = vpop.f32.mrb[15].mxu0  ;;  %v4941_v56 = vmax.f32 %v6494_v16, 0.0 }
 0x438   :  { %v6500_v39 = vadd.f32 %v4932_v28, %v1676_v35  ;;  %v6497_v29 = vadd.f32 %v4762_v32, %v1672_v14  ;;  %v4934_v33 = vpop.f32.mrb[15].mxu1  ;;  %v4943_v36 = vmax.f32 %v6498_v0, 0.0  ;;  %v4942_v38 = vmax.f32 %v6495_v24, 0.0 }
 0x439   :  { %v4949_v34 = vmax.f32 %v6496_v27, 0.0  ;;  %v6501_v20 = vadd.f32 %v4934_v33, %v1680_v48  ;;  %v4944_v40 = vmax.f32 %v6499_v4, 0.0 }
 0x43a   :  { %v4951_v63 = vmax.f32 %v6500_v39, 0.0  ;;  %v4950_v37 = vmax.f32 %v6497_v29, 0.0 }
 0x43b   :  { %v4957_v41 = vpack.c.bf16 %v4949_v34, %v4941_v56  ;;  %v4952_v45 = vmax.f32 %v6501_v20, 0.0 }
 0x43c   :  { %v4959_v42 = vpack.c.bf16 %v4951_v63, %v4943_v36  ;;  %v4958_v43 = vpack.c.bf16 %v4950_v37, %v4942_v38 }
 0x43d   :  { %v4960_v44 = vpack.c.bf16 %v4952_v45, %v4944_v40 }
 0x43e   :  { %5594 = vmatprep.mubr.bf16.mxu0 %v4958_v43 }
 0x43f   :  { %5635 = vmatprep.mubr.bf16.mxu1 %v4960_v44  ;;  %5595 = vmatmul.mubr.bf16.vlgmr.msra.gmra.mrb[20].mxu0 %v4957_v41 }
 0x440   :  { %5636 = vmatmul.mubr.bf16.vlgmr.msra.gmra.mrb[20].mxu1 %v4959_v42 }
 0x454   :  { %v6414_v47 = vpop.f32.mrb[16].mxu0 }
 0x455   :  { %v6436_v46 = vpop.f32.mrb[16].mxu1  ;;  %v6415_v49 = vpop.f32.mrb[17].mxu0 }
 0x456   :  { %v6416_v25 = vadd.f32 %v6415_v49, %v6414_v47  ;;  %v6437_v50 = vpop.f32.mrb[17].mxu1  ;;  %v6417_v51 = vpop.f32.mrb[18].mxu0 }
 0x457   :  { %v6438_v53 = vadd.f32 %v6437_v50, %v6436_v46  ;;  %v6439_v31 = vpop.f32.mrb[18].mxu1  ;;  %v6418_v54 = vpop.f32.mrb[19].mxu0 }
 0x458   :  { %v5515_v55 = vadd.f32 %v6416_v25, %v6333_v22  ;;  %v6419_v57 = vadd.f32 %v6418_v54, %v6417_v51  ;;  %v6440_v58 = vpop.f32.mrb[19].mxu1 }
 0x459   :  { %v6441_v60 = vadd.f32 %v6440_v58, %v6439_v31 }
 0x45a   :  { %v5556_v61 = vadd.f32 %v6438_v53, %v5515_v55  ;;  %v5518_v59 = vadd.f32 %v6419_v57, %v6333_v22 }
 0x45c   :  { %v5559_v62 = vadd.f32 %v6441_v60, %v5518_v59 }
 0x512   :  { %v6458_v5 = vpop.f32.mrb[20].mxu0 }
 0x513   :  { %v6480_v23 = vpop.f32.mrb[20].mxu1  ;;  %v6459_v1 = vpop.f32.mrb[21].mxu0 }
 0x514   :  { %v6460_v8 = vadd.f32 %v6459_v1, %v6458_v5  ;;  %v6481_v7 = vpop.f32.mrb[21].mxu1  ;;  %v6461_v3 = vpop.f32.mrb[22].mxu0 }
 0x515   :  { %v6482_v6 = vadd.f32 %v6481_v7, %v6480_v23  ;;  %v6483_v18 = vpop.f32.mrb[22].mxu1  ;;  %v6462_v9 = vpop.f32.mrb[23].mxu0 }
 0x516   :  { %v5597_v10 = vadd.f32 %v6460_v8, %v5556_v61  ;;  %v6463_v21 = vadd.f32 %v6462_v9, %v6461_v3  ;;  %v6484_v11 = vpop.f32.mrb[23].mxu1 }
 0x517   :  { %v6485_v12 = vadd.f32 %v6484_v11, %v6483_v18 }
 0x518   :  { %v5600_v13 = vadd.f32 %v6463_v21, %v5559_v62  ;;  %v5638_v35 = vadd.f32 %v6482_v6, %v5597_v10 }
 0x51a   :  { %v5647_v14 = vsel %vm5646_vm0, %v5638_v35, -1e+30  ;;  %v5641_v48 = vadd.f32 %v6485_v12, %v5600_v13 }
 0x51b   :  { %5649 = vmax.xlane.f32.xlu0 %v5647_v14 }
 0x51c   :  { %v5648_v15 = vsel %vm5646_vm0, %v5641_v48, -1e+30 }
 0x51f   :  { %5651 = vmax.xlane.f32.xlu0 %v5648_v15 }
 0x5a8   :  { %v5650_v19 = vpop.xlane.xlu0 %5649 }
 0x5a9   :  { %v5653_v16 = vsub.f32 %v5647_v14, %v5650_v19 }
 0x5ab   :  { %v5655_v30 = vmul.f32 1.442695, %v5653_v16 }
 0x5ac   :  { %v5652_v17 = vpop.xlane.xlu0 %5651 }
 0x5ad   :  { %6631 = vpow2.f32 %v5655_v30  ;;  %v5654_v0 = vsub.f32 %v5648_v15, %v5652_v17 }
 0x5af   :  { %v5657_v24 = vmul.f32 1.442695, %v5654_v0 }
 0x5b1   :  { %6633 = vpow2.f32 %v5657_v24 }
 0x5b7   :  { %v6632_v26 = vpop.eup %6631 }
 0x5b8   :  { %5659 = vadd.xlane.f32.xlu1 %v6632_v26 }
 0x5bb   :  { %v6634_v52 = vpop.eup %6633 }
 0x5bc   :  { %5661 = vadd.xlane.f32.xlu1 %v6634_v52 }
 0x645   :  { %v5660_v4 = vpop.xlane.xlu1 %5659 }
 0x646   :  { %6635 = vrcp.f32 %v5660_v4 }
 0x649   :  { %v5662_v27 = vpop.xlane.xlu1 %5661 }
 0x64a   :  { %6637 = vrcp.f32 %v5662_v27 }
 0x650   :  { %v6636_v28 = vpop.eup %6635 }
 0x651   :  { %v5665_v32 = vmul.f32 %v6636_v28, %v6632_v26 }
 0x653   :  { %v5667_v39 = vsel %vm5646_vm0, %v5665_v32, %v5638_v35 }
 0x654   :  { %v6638_v29 = vpop.eup %6637  ;;  %5669 = vst [vmem:[#allocation14] sm:$0xff] %v5667_v39 }
 0x655   :  { %v5666_v33 = vmul.f32 %v6638_v29, %v6634_v52 }
 0x657   :  { %v5668_v56 = vsel %vm5646_vm0, %v5666_v33, %v5641_v48 }
 0x658   :  { %5670 = vst [vmem:[#allocation14 + $0x8] sm:$0xff] %v5668_v56 }
 0x659   :  { %6804 = shalt.err (!%p6801_p4)
}
 0x65a   :  { %s6805_s17 = scalar_lea.hbm %s7150_s7, 256 }
 0x65b   :  { %p6806_p5 = scmp.ne.s32.totalorder %s7150_s7, %s6805_s17  ;;  %p6809_p6 = scmp.lt.u32.totalorder %s6805_s17, %s7150_s7 }
 0x65d   :  { %p6811_p7 = pnand %p6809_p6, %p6806_p5 }
 0x65f   :  { %6814 = shalt.err (!%p6811_p7)
}
 0x660   :  { %5682 = dma.vmem_to_hbm [thread:$0]  %s5677_s12, 256, %s7150_s7, [#allocation4], %s6833_s5, %s6833_s5, %s6834_s18  }
 0x661   :  { %6823 = dma.done.wait [#allocation4], 256  }
 0x662   :  { %6824 = vsyncadd [#allocation4], 4294967040 }
 0x663   :  { %5686 = vsyncpa [#allocation3], 1 }
 0x664   :  { %5687 = vsyncpa [#allocation6], 1 }
 0x665   :  { %5688 = vsyncpa [#allocation9], 1 }
 0x666   :  { %5689 = vsyncpa [#allocation12], 1 }
 0x667   :  { %5690 = vsyncpa [#allocation4], 1 }

</bundles_post_ra>
